<compile_context>
chip_gen: v7x
topology: tpu7x:2x2x1
jax: 0.10.0
libtpu: 0.0.40
codegen_flags: <defaults>
</compile_context>

<pallas_src>
import jax
import jax.numpy as jnp
from jax import lax
from jax.experimental import pallas as pl
from jax.experimental.pallas import tpu as pltpu

BN_EPS = 1e-5
LEAKY_SLOPE = 0.2


# ----------------------------------------------------------------------------
# Fused whole-decoder kernel (one invocation per batch block)
# ----------------------------------------------------------------------------
def _make_decoder_kernel(num_residual_layers, base_t, c_pad):
    L = num_residual_layers
    T = base_t

    def kernel(x_ref, aft_w, aft_b, d1_w, d1_b, u2_w, u2_b, d2_w, d2_b,
               u3_w, u3_b, d3_w, d3_b, pj_w, pj_b, o_ref):
        f32 = jnp.float32
        bblk = x_ref.shape[0]
        e_dim = x_ref.shape[2]
        M = bblk * T                       # rows per matmul (batch*base-time)

        def mm(a, w):
            # bf16 (or f32) operands, f32 accumulation on the MXU.
            return jnp.dot(a.astype(w.dtype), w, preferred_element_type=f32)

        def leaky(y):
            return jnp.where(y >= 0.0, y, LEAKY_SLOPE * y)

        # Per-batch-segment boundary masks, built once per grid step (O(M) VPU work).
        row = lax.broadcasted_iota(jnp.int32, (M, 1), 0)
        seg_first = (row % T) == 0
        seg_last = (row % T) == (T - 1)

        def prev_rows(h):
            # h_prev[i] = h[i-1] within each length-T batch segment, 0 at segment start.
            return jnp.where(seg_first, 0.0, pltpu.roll(h, shift=1, axis=0))

        def next_rows(h):
            # h_next[i] = h[i+1] within each length-T batch segment, 0 at segment end.
            return jnp.where(seg_last, 0.0, pltpu.roll(h, shift=(M - 1) % M, axis=0))

        def res_stack(phases, w_ref, b_ref):
            # L x [Conv1d(k=3,s=1,p=1) -> folded BN -> + identity -> LeakyReLU],
            # evaluated in polyphase form: interleaved signal y[P*m + j] = phases[j][m].
            P = len(phases)
            for l in range(L):
                k0, k1, k2 = w_ref[l, 0], w_ref[l, 1], w_ref[l, 2]
                b = b_ref[l]
                new = []
                for j in range(P):
                    left = phases[j - 1] if j > 0 else prev_rows(phases[P - 1])
                    right = phases[j + 1] if j < P - 1 else next_rows(phases[0])
                    y = (mm(left, k0) + mm(phases[j], k1) + mm(right, k2)
                         + b + phases[j])
                    new.append(leaky(y))
                phases = new
            return phases

        def up_cnr(phases, w_ref, b_ref):
            # ConvTranspose1d(k=4,s=2,p=1); BN + the parallel residual transposed
            # conv are already folded into (w_ref, b_ref).  Doubles the phase count:
            #   y[2t']   = x[t'] @ W1 + x[t'-1] @ W3
            #   y[2t'+1] = x[t'] @ W2 + x[t'+1] @ W0
            P = len(phases)
            w0, w1, w2, w3 = w_ref[0], w_ref[1], w_ref[2], w_ref[3]
            b = b_ref[...]
            out = []
            for j in range(P):
                xc = phases[j]
                xl = phases[j - 1] if j > 0 else prev_rows(phases[P - 1])
                xr = phases[j + 1] if j < P - 1 else next_rows(phases[0])
                out.append(leaky(mm(xc, w1) + mm(xl, w3) + b))   # even child
                out.append(leaky(mm(xc, w2) + mm(xr, w0) + b))   # odd child
            return out

        h = x_ref[...].reshape(M, e_dim)
        h = mm(h, aft_w[...]) + aft_b[...]               # aft_vq_conv (1x1)
        phases = res_stack([h], d1_w, d1_b)              # _dec_1
        phases = up_cnr(phases, u2_w, u2_b)              # _up_2   (T  -> 2T), 2 phases
        phases = res_stack(phases, d2_w, d2_b)           # _dec_2
        phases = up_cnr(phases, u3_w, u3_b)              # _up_3   (2T -> 4T), 4 phases
        phases = res_stack(phases, d3_w, d3_b)           # _dec_3

        pw = pj_w[...]
        pb = pj_b[...]
        for j in range(4):                               # project (1x1), 128-lane padded
            r = mm(phases[j], pw) + pb
            o_ref[j] = r.reshape(bblk, T, c_pad).astype(o_ref.dtype)

    return kernel


# ----------------------------------------------------------------------------
# Trace-time folding of BatchNorm (+ parallel residual conv for 'up' layers)
# ----------------------------------------------------------------------------
def _fold_bn(w, b, bn):
    scale = bn["gamma"] * lax.rsqrt(bn["var"] + BN_EPS)          # (Cout,)
    return w * scale, (b - bn["mean"]) * scale + bn["beta"]


def _fold_stack(layer_params):
    ws, bs = [], []
    for p in layer_params:
        w, b = _fold_bn(p["w"], p["b"], p["bn"])
        ws.append(w)
        bs.append(b.reshape(1, -1))
    return jnp.stack(ws, 0), jnp.stack(bs, 0)                     # (L,3,C,C),(L,1,C)


def _fold_up(p):
    w, b = _fold_bn(p["w"], p["b"], p["bn"])
    return w + p["res"]["w"], (b + p["res"]["b"]).reshape(1, -1)  # (4,Cin,Cout),(1,Cout)


def _pick_batch_block(batch, t):
    # Largest divisor of batch with <= 256 matmul rows per grid step.
    best = 1
    for d in range(1, batch + 1):
        if batch % d == 0 and d * t <= 256:
            best = d
    return best


# ----------------------------------------------------------------------------
# Decoder forward (matches the PyTorch module's layer sequence; ae=False path)
# ----------------------------------------------------------------------------
def decoder_forward(params, h_ncw, last_frame=None, matmul_dtype=jnp.bfloat16):
    # h_ncw: (B, embedding_dim, T) -- PyTorch Conv1d layout.
    B, E, T = h_ncw.shape
    x = jnp.transpose(h_ncw, (0, 2, 1)).astype(jnp.float32)       # NCW -> NTC

    L = len(params["dec_1"])

    def cast(w):
        return w.astype(matmul_dtype)

    aft_w = cast(params["aft_vq"]["w"])                           # (E, H)
    aft_b = params["aft_vq"]["b"].reshape(1, -1).astype(jnp.float32)
    d1_w, d1_b = _fold_stack(params["dec_1"])
    u2_w, u2_b = _fold_up(params["up_2"])
    d2_w, d2_b = _fold_stack(params["dec_2"])
    u3_w, u3_b = _fold_up(params["up_3"])
    d3_w, d3_b = _fold_stack(params["dec_3"])
    d1_w, u2_w, d2_w, u3_w, d3_w = map(cast, (d1_w, u2_w, d2_w, u3_w, d3_w))

    # Zero-pad the projection to a 128-lane multiple so output stores are unmasked.
    out_dim = params["project"]["w"].shape[-1]
    c_pad = 128 * pl.cdiv(out_dim, 128)
    pj_w = jnp.zeros((params["project"]["w"].shape[0], c_pad), jnp.float32)
    pj_w = cast(pj_w.at[:, :out_dim].set(params["project"]["w"]))
    pj_b = jnp.zeros((1, c_pad), jnp.float32)
    pj_b = pj_b.at[:, :out_dim].set(params["project"]["b"].reshape(1, -1))

    weights = [aft_w, aft_b, d1_w, d1_b, u2_w, u2_b, d2_w, d2_b,
               u3_w, u3_b, d3_w, d3_b, pj_w, pj_b]

    bblk = _pick_batch_block(B, T)
    grid = (B // bblk,)

    def _resident(shape):
        zeros = (0,) * len(shape)
        return pl.BlockSpec(shape, lambda i: zeros)

    in_specs = [pl.BlockSpec((bblk, T, E), lambda i: (i, 0, 0))]
    in_specs += [_resident(w.shape) for w in weights]

    kernel = _make_decoder_kernel(L, T, c_pad)
    out = pl.pallas_call(
        kernel,
        out_shape=jax.ShapeDtypeStruct((4, B, T, c_pad), jnp.float32),
        grid=grid,
        in_specs=in_specs,
        out_specs=pl.BlockSpec((4, bblk, T, c_pad), lambda i: (0, i, 0, 0)),
        compiler_params=pltpu.CompilerParams(dimension_semantics=("parallel",)),
    )(x, *weights)

    # Phase recombine + layout plumbing in the wrapper (pure XLA, tiny):
    # (4, B, T, c_pad) -> (B, T, 4, c_pad) -> (B, 4T, out_dim) -> (B, out_dim, 4T)
    recon = out.transpose(1, 2, 0, 3).reshape(B, 4 * T, c_pad)[..., :out_dim]
    return jnp.transpose(recon, (0, 2, 1)), None


# ----------------------------------------------------------------------------
# Pure-JAX reference (time-domain, non-polyphase) for validation
# ----------------------------------------------------------------------------
def _leaky_ref(x):
    return jnp.where(x >= 0.0, x, LEAKY_SLOPE * x)


def _bn_ref(x, bn):
    return (x - bn["mean"]) * (bn["gamma"] * lax.rsqrt(bn["var"] + BN_EPS)) + bn["beta"]


def _mm_ref(x, w):
    return jnp.einsum("btc,cd->btd", x, w, precision=lax.Precision.HIGHEST)


def _conv3_ref(x, w, b):                              # Conv1d k=3 s=1 p=1
    xp = jnp.pad(x, ((0, 0), (1, 1), (0, 0)))
    return _mm_ref(xp[:, :-2], w[0]) + _mm_ref(xp[:, 1:-1], w[1]) + _mm_ref(xp[:, 2:], w[2]) + b


def _convT4_ref(x, w, b):                             # ConvTranspose1d k=4 s=2 p=1
    Bq, Tq, _ = x.shape
    xp = jnp.pad(x, ((0, 0), (1, 1), (0, 0)))
    even = _mm_ref(x, w[1]) + _mm_ref(xp[:, :-2], w[3])
    odd = _mm_ref(x, w[2]) + _mm_ref(xp[:, 2:], w[0])
    return jnp.stack([even, odd], axis=2).reshape(Bq, 2 * Tq, -1) + b


def decoder_reference(params, h_ncw):
    x = jnp.transpose(h_ncw, (0, 2, 1)).astype(jnp.float32)
    h = _mm_ref(x, params["aft_vq"]["w"]) + params["aft_vq"]["b"]

    def stack(h, layers):
        for p in layers:
            h = _leaky_ref(_bn_ref(_conv3_ref(h, p["w"], p["b"]), p["bn"]) + h)
        return h

    def up(h, p):
        y = _bn_ref(_convT4_ref(h, p["w"], p["b"]), p["bn"])
        r = _convT4_ref(h, p["res"]["w"], p["res"]["b"])
        return _leaky_ref(y + r)

    h = stack(h, params["dec_1"])
    h = up(h, params["up_2"])
    h = stack(h, params["dec_2"])
    h = up(h, params["up_3"])
    h = stack(h, params["dec_3"])
    recon = _mm_ref(h, params["project"]["w"]) + params["project"]["b"]
    return jnp.transpose(recon, (0, 2, 1))


# ----------------------------------------------------------------------------
# Deterministic synthetic parameters (shapes follow Decoder.__init__)
# ----------------------------------------------------------------------------
class ParamGen:
    def __init__(self, key):
        self.key = key

    def normal(self, shape, scale=0.1):
        self.key, sub = jax.random.split(self.key)
        return scale * jax.random.normal(sub, shape, dtype=jnp.float32)


def _cnr_params(pg, cin, cout, k, residual_conv=False):
    p = {
        "w": pg.normal((k, cin, cout)),
        "b": pg.normal((cout,)),
        "bn": {
            "gamma": 1.0 + pg.normal((cout,), 0.05),
            "beta": pg.normal((cout,), 0.05),
            "mean": pg.normal((cout,), 0.05),
            "var": 1.0 + jnp.abs(pg.normal((cout,), 0.05)),
        },
    }
    if residual_conv:
        p["res"] = {"w": pg.normal((k, cin, cout)), "b": pg.normal((cout,))}
    return p


def decoder_init(key, out_dim, embedding_dim, num_hiddens, num_residual_layers,
                 num_residual_hiddens=None):  # num_residual_hiddens unused (as in the module)
    pg = ParamGen(key)
    h, h2, h4 = num_hiddens, num_hiddens // 2, num_hiddens // 4
    return {
        "aft_vq": {"w": pg.normal((embedding_dim, h)), "b": pg.normal((h,))},
        "dec_1": [_cnr_params(pg, h, h, 3) for _ in range(num_residual_layers)],
        "up_2": _cnr_params(pg, h, h2, 4, residual_conv=True),
        "dec_2": [_cnr_params(pg, h2, h2, 3) for _ in range(num_residual_layers)],
        "up_3": _cnr_params(pg, h2, h4, 4, residual_conv=True),
        "dec_3": [_cnr_params(pg, h4, h4, 3) for _ in range(num_residual_layers)],
        "project": {"w": pg.normal((h4, out_dim)), "b": pg.normal((out_dim,))},
    }


if __name__ == "__main__":
    # Small shapes consistent with the module: Decoder input is (B, embedding_dim, T).
    B, T = 2, 8
    embedding_dim, num_hiddens, num_residual_layers = 8, 32, 2
    num_residual_hiddens = 32
    out_dim = 12

    key = jax.random.PRNGKey(0)
    k_x, k_p = jax.random.split(key)
    h_in = jax.random.normal(k_x, (B, embedding_dim, T), dtype=jnp.float32)
    params = decoder_init(k_p, out_dim, embedding_dim, num_hiddens,
                          num_residual_layers, num_residual_hiddens)

    fwd = jax.jit(decoder_forward)
    recon, aux = fwd(params, h_in)
    jax.block_until_ready(recon)

    expected = (B, out_dim, 4 * T)   # two 'up' stages: T -> 4T
    assert recon.shape == expected, (recon.shape, expected)
    assert aux is None
    assert bool(jnp.all(jnp.isfinite(recon)))

    # Validate the polyphase/roll formulation against a plain time-domain reference
    # (bf16 matmul operands in the kernel -> loose tolerance).
    ref = decoder_reference(params, h_in)
    err = float(jnp.max(jnp.abs(recon - ref)))
    assert err < 5e-2, f"max |kernel - reference| = {err}"
    print("KERNEL_OK")
</pallas_src>

<mosaic_0001>
module attributes {stable_mosaic.version = 11 : i64} {
  func.func @kernel(%arg0: i32, %arg1: memref<2x8x8xf32, #tpu.memory_space<vmem>>, %arg2: memref<8x32xbf16, #tpu.memory_space<vmem>>, %arg3: memref<1x32xf32, #tpu.memory_space<vmem>>, %arg4: memref<2x3x32x32xbf16, #tpu.memory_space<vmem>>, %arg5: memref<2x1x32xf32, #tpu.memory_space<vmem>>, %arg6: memref<4x32x16xbf16, #tpu.memory_space<vmem>>, %arg7: memref<1x16xf32, #tpu.memory_space<vmem>>, %arg8: memref<2x3x16x16xbf16, #tpu.memory_space<vmem>>, %arg9: memref<2x1x16xf32, #tpu.memory_space<vmem>>, %arg10: memref<4x16x8xbf16, #tpu.memory_space<vmem>>, %arg11: memref<1x8xf32, #tpu.memory_space<vmem>>, %arg12: memref<2x3x8x8xbf16, #tpu.memory_space<vmem>>, %arg13: memref<2x1x8xf32, #tpu.memory_space<vmem>>, %arg14: memref<8x128xbf16, #tpu.memory_space<vmem>>, %arg15: memref<1x128xf32, #tpu.memory_space<vmem>>, %arg16: memref<4x2x8x128xf32, #tpu.memory_space<vmem>>) attributes {dimension_semantics = [#tpu.dimension_semantics<parallel>], iteration_bounds = array<i64: 1>, scalar_prefetch = 0 : i64, scratch_operands = 0 : i64, tpu.core_type = #tpu.core_type<tc>, window_params = [{transform_indices = @transform_0, window_bounds = array<i64: 2, 8, 8>}, {pipeline_mode = #tpu.pipeline_mode<synchronous>, transform_indices = @transform_1, window_bounds = array<i64: 8, 32>}, {pipeline_mode = #tpu.pipeline_mode<synchronous>, transform_indices = @transform_2, window_bounds = array<i64: 1, 32>}, {pipeline_mode = #tpu.pipeline_mode<synchronous>, transform_indices = @transform_3, window_bounds = array<i64: 2, 3, 32, 32>}, {pipeline_mode = #tpu.pipeline_mode<synchronous>, transform_indices = @transform_4, window_bounds = array<i64: 2, 1, 32>}, {pipeline_mode = #tpu.pipeline_mode<synchronous>, transform_indices = @transform_5, window_bounds = array<i64: 4, 32, 16>}, {pipeline_mode = #tpu.pipeline_mode<synchronous>, transform_indices = @transform_6, window_bounds = array<i64: 1, 16>}, {pipeline_mode = #tpu.pipeline_mode<synchronous>, transform_indices = @transform_7, window_bounds = array<i64: 2, 3, 16, 16>}, {pipeline_mode = #tpu.pipeline_mode<synchronous>, transform_indices = @transform_8, window_bounds = array<i64: 2, 1, 16>}, {pipeline_mode = #tpu.pipeline_mode<synchronous>, transform_indices = @transform_9, window_bounds = array<i64: 4, 16, 8>}, {pipeline_mode = #tpu.pipeline_mode<synchronous>, transform_indices = @transform_10, window_bounds = array<i64: 1, 8>}, {pipeline_mode = #tpu.pipeline_mode<synchronous>, transform_indices = @transform_11, window_bounds = array<i64: 2, 3, 8, 8>}, {pipeline_mode = #tpu.pipeline_mode<synchronous>, transform_indices = @transform_12, window_bounds = array<i64: 2, 1, 8>}, {pipeline_mode = #tpu.pipeline_mode<synchronous>, transform_indices = @transform_13, window_bounds = array<i64: 8, 128>}, {pipeline_mode = #tpu.pipeline_mode<synchronous>, transform_indices = @transform_14, window_bounds = array<i64: 1, 128>}, {transform_indices = @transform_15, window_bounds = array<i64: 4, 2, 8, 128>}]} {
    %0 = tpu.iota {dimensions = array<i32: 0>} : vector<16x1xi32>
    %c8_i32 = arith.constant 8 : i32
    %c0_i32 = arith.constant 0 : i32
    %1 = arith.cmpi eq, %c8_i32, %c0_i32 : i32
    %c1_i32 = arith.constant 1 : i32
    %2 = arith.select %1, %c1_i32, %c8_i32 : i32
    %3 = vector.broadcast %2 : i32 to vector<16x1xi32>
    %4 = arith.remsi %0, %3 : vector<16x1xi32>
    %c0_i32_0 = arith.constant 0 : i32
    %5 = vector.broadcast %c0_i32_0 : i32 to vector<16x1xi32>
    %6 = arith.cmpi ne, %4, %5 : vector<16x1xi32>
    %c0_i32_1 = arith.constant 0 : i32
    %7 = vector.broadcast %c0_i32_1 : i32 to vector<16x1xi32>
    %8 = arith.cmpi slt, %4, %7 : vector<16x1xi32>
    %c0_i32_2 = arith.constant 0 : i32
    %9 = arith.cmpi slt, %2, %c0_i32_2 : i32
    %10 = vector.broadcast %9 : i1 to vector<16x1xi1>
    %11 = vector.broadcast %10 : vector<16x1xi1> to vector<16x1xi1>
    %12 = arith.xori %8, %11 : vector<16x1xi1>
    %13 = arith.andi %12, %6 : vector<16x1xi1>
    %14 = vector.broadcast %2 : i32 to vector<16x1xi32>
    %15 = arith.addi %4, %14 : vector<16x1xi32>
    %16 = arith.select %13, %15, %4 : vector<16x1xi1>, vector<16x1xi32>
    %c0_i32_3 = arith.constant 0 : i32
    %17 = vector.broadcast %c0_i32_3 : i32 to vector<16x1xi32>
    %18 = arith.cmpi eq, %16, %17 : vector<16x1xi32>
    %c8_i32_4 = arith.constant 8 : i32
    %c0_i32_5 = arith.constant 0 : i32
    %19 = arith.cmpi eq, %c8_i32_4, %c0_i32_5 : i32
    %c1_i32_6 = arith.constant 1 : i32
    %20 = arith.select %19, %c1_i32_6, %c8_i32_4 : i32
    %21 = vector.broadcast %20 : i32 to vector<16x1xi32>
    %22 = arith.remsi %0, %21 : vector<16x1xi32>
    %c0_i32_7 = arith.constant 0 : i32
    %23 = vector.broadcast %c0_i32_7 : i32 to vector<16x1xi32>
    %24 = arith.cmpi ne, %22, %23 : vector<16x1xi32>
    %c0_i32_8 = arith.constant 0 : i32
    %25 = vector.broadcast %c0_i32_8 : i32 to vector<16x1xi32>
    %26 = arith.cmpi slt, %22, %25 : vector<16x1xi32>
    %c0_i32_9 = arith.constant 0 : i32
    %27 = arith.cmpi slt, %20, %c0_i32_9 : i32
    %28 = vector.broadcast %27 : i1 to vector<16x1xi1>
    %29 = vector.broadcast %28 : vector<16x1xi1> to vector<16x1xi1>
    %30 = arith.xori %26, %29 : vector<16x1xi1>
    %31 = arith.andi %30, %24 : vector<16x1xi1>
    %32 = vector.broadcast %20 : i32 to vector<16x1xi32>
    %33 = arith.addi %22, %32 : vector<16x1xi32>
    %34 = arith.select %31, %33, %22 : vector<16x1xi1>, vector<16x1xi32>
    %c7_i32 = arith.constant 7 : i32
    %35 = vector.broadcast %c7_i32 : i32 to vector<16x1xi32>
    %36 = arith.cmpi eq, %34, %35 : vector<16x1xi32>
    %c0 = arith.constant 0 : index
    %c0_10 = arith.constant 0 : index
    %c0_11 = arith.constant 0 : index
    %37 = vector.load %arg1[%c0, %c0_10, %c0_11] : memref<2x8x8xf32, #tpu.memory_space<vmem>>, vector<2x8x8xf32>
    %38 = vector.shape_cast %37 : vector<2x8x8xf32> to vector<16x8xf32>
    %c0_12 = arith.constant 0 : index
    %c0_13 = arith.constant 0 : index
    %39 = vector.load %arg2[%c0_12, %c0_13] : memref<8x32xbf16, #tpu.memory_space<vmem>>, vector<8x32xbf16>
    %40 = arith.truncf %38 : vector<16x8xf32> to vector<16x8xbf16>
    %cst = arith.constant dense<0.000000e+00> : vector<16x32xf32>
    %41 = tpu.matmul %40, %39, %cst {dimension_numbers = #tpu.dot_dimension_numbers<[1], [0], [0], [1], [0, 0, 1, 1], [], []>} : vector<16x8xbf16>, vector<8x32xbf16>, vector<16x32xf32> -> vector<16x32xf32>
    %c0_14 = arith.constant 0 : index
    %c0_15 = arith.constant 0 : index
    %42 = vector.load %arg3[%c0_14, %c0_15] : memref<1x32xf32, #tpu.memory_space<vmem>>, vector<1x32xf32>
    %43 = vector.broadcast %42 : vector<1x32xf32> to vector<16x32xf32>
    %44 = arith.addf %41, %43 : vector<16x32xf32>
    %c0_16 = arith.constant 0 : index
    %c0_17 = arith.constant 0 : index
    %c0_18 = arith.constant 0 : index
    %c0_19 = arith.constant 0 : index
    %45 = vector.load %arg4[%c0_16, %c0_17, %c0_18, %c0_19] : memref<2x3x32x32xbf16, #tpu.memory_space<vmem>>, vector<1x1x32x32xbf16>
    %46 = vector.shape_cast %45 : vector<1x1x32x32xbf16> to vector<32x32xbf16>
    %c0_20 = arith.constant 0 : index
    %c1 = arith.constant 1 : index
    %c0_21 = arith.constant 0 : index
    %c0_22 = arith.constant 0 : index
    %47 = vector.load %arg4[%c0_20, %c1, %c0_21, %c0_22] : memref<2x3x32x32xbf16, #tpu.memory_space<vmem>>, vector<1x1x32x32xbf16>
    %48 = vector.shape_cast %47 : vector<1x1x32x32xbf16> to vector<32x32xbf16>
    %c0_23 = arith.constant 0 : index
    %c2 = arith.constant 2 : index
    %c0_24 = arith.constant 0 : index
    %c0_25 = arith.constant 0 : index
    %49 = vector.load %arg4[%c0_23, %c2, %c0_24, %c0_25] : memref<2x3x32x32xbf16, #tpu.memory_space<vmem>>, vector<1x1x32x32xbf16>
    %50 = vector.shape_cast %49 : vector<1x1x32x32xbf16> to vector<32x32xbf16>
    %c0_26 = arith.constant 0 : index
    %c0_27 = arith.constant 0 : index
    %c0_28 = arith.constant 0 : index
    %51 = vector.load %arg5[%c0_26, %c0_27, %c0_28] : memref<2x1x32xf32, #tpu.memory_space<vmem>>, vector<1x1x32xf32>
    %52 = vector.shape_cast %51 : vector<1x1x32xf32> to vector<1x32xf32>
    %c1_i32_29 = arith.constant 1 : i32
    %53 = tpu.dynamic_rotate %44 by %c1_i32_29 dim 0 : vector<16x32xf32>, i32 -> vector<16x32xf32>
    %cst_30 = arith.constant 0.000000e+00 : f32
    %54 = vector.shape_cast %18 : vector<16x1xi1> to vector<16x1xi1>
    %55 = vector.broadcast %54 : vector<16x1xi1> to vector<16x32xi1>
    %56 = vector.broadcast %cst_30 : f32 to vector<16x32xf32>
    %57 = arith.select %55, %56, %53 : vector<16x32xi1>, vector<16x32xf32>
    %c15_i32 = arith.constant 15 : i32
    %58 = tpu.dynamic_rotate %44 by %c15_i32 dim 0 : vector<16x32xf32>, i32 -> vector<16x32xf32>
    %cst_31 = arith.constant 0.000000e+00 : f32
    %59 = vector.shape_cast %36 : vector<16x1xi1> to vector<16x1xi1>
    %60 = vector.broadcast %59 : vector<16x1xi1> to vector<16x32xi1>
    %61 = vector.broadcast %cst_31 : f32 to vector<16x32xf32>
    %62 = arith.select %60, %61, %58 : vector<16x32xi1>, vector<16x32xf32>
    %63 = arith.truncf %57 : vector<16x32xf32> to vector<16x32xbf16>
    %cst_32 = arith.constant dense<0.000000e+00> : vector<16x32xf32>
    %64 = tpu.matmul %63, %46, %cst_32 {dimension_numbers = #tpu.dot_dimension_numbers<[1], [0], [0], [1], [0, 0, 1, 1], [], []>} : vector<16x32xbf16>, vector<32x32xbf16>, vector<16x32xf32> -> vector<16x32xf32>
    %65 = arith.truncf %44 : vector<16x32xf32> to vector<16x32xbf16>
    %cst_33 = arith.constant dense<0.000000e+00> : vector<16x32xf32>
    %66 = tpu.matmul %65, %48, %cst_33 {dimension_numbers = #tpu.dot_dimension_numbers<[1], [0], [0], [1], [0, 0, 1, 1], [], []>} : vector<16x32xbf16>, vector<32x32xbf16>, vector<16x32xf32> -> vector<16x32xf32>
    %67 = arith.addf %64, %66 : vector<16x32xf32>
    %68 = arith.truncf %62 : vector<16x32xf32> to vector<16x32xbf16>
    %cst_34 = arith.constant dense<0.000000e+00> : vector<16x32xf32>
    %69 = tpu.matmul %68, %50, %cst_34 {dimension_numbers = #tpu.dot_dimension_numbers<[1], [0], [0], [1], [0, 0, 1, 1], [], []>} : vector<16x32xbf16>, vector<32x32xbf16>, vector<16x32xf32> -> vector<16x32xf32>
    %70 = arith.addf %67, %69 : vector<16x32xf32>
    %71 = vector.broadcast %52 : vector<1x32xf32> to vector<16x32xf32>
    %72 = arith.addf %70, %71 : vector<16x32xf32>
    %73 = arith.addf %72, %44 : vector<16x32xf32>
    %cst_35 = arith.constant 0.000000e+00 : f32
    %74 = vector.broadcast %cst_35 : f32 to vector<16x32xf32>
    %75 = arith.cmpf oge, %73, %74 : vector<16x32xf32>
    %cst_36 = arith.constant 2.000000e-01 : f32
    %76 = vector.broadcast %cst_36 : f32 to vector<16x32xf32>
    %77 = arith.mulf %76, %73 : vector<16x32xf32>
    %78 = arith.select %75, %73, %77 : vector<16x32xi1>, vector<16x32xf32>
    %c1_37 = arith.constant 1 : index
    %c0_38 = arith.constant 0 : index
    %c0_39 = arith.constant 0 : index
    %c0_40 = arith.constant 0 : index
    %79 = vector.load %arg4[%c1_37, %c0_38, %c0_39, %c0_40] : memref<2x3x32x32xbf16, #tpu.memory_space<vmem>>, vector<1x1x32x32xbf16>
    %80 = vector.shape_cast %79 : vector<1x1x32x32xbf16> to vector<32x32xbf16>
    %c1_41 = arith.constant 1 : index
    %c1_42 = arith.constant 1 : index
    %c0_43 = arith.constant 0 : index
    %c0_44 = arith.constant 0 : index
    %81 = vector.load %arg4[%c1_41, %c1_42, %c0_43, %c0_44] : memref<2x3x32x32xbf16, #tpu.memory_space<vmem>>, vector<1x1x32x32xbf16>
    %82 = vector.shape_cast %81 : vector<1x1x32x32xbf16> to vector<32x32xbf16>
    %c1_45 = arith.constant 1 : index
    %c2_46 = arith.constant 2 : index
    %c0_47 = arith.constant 0 : index
    %c0_48 = arith.constant 0 : index
    %83 = vector.load %arg4[%c1_45, %c2_46, %c0_47, %c0_48] : memref<2x3x32x32xbf16, #tpu.memory_space<vmem>>, vector<1x1x32x32xbf16>
    %84 = vector.shape_cast %83 : vector<1x1x32x32xbf16> to vector<32x32xbf16>
    %c1_49 = arith.constant 1 : index
    %c0_50 = arith.constant 0 : index
    %c0_51 = arith.constant 0 : index
    %85 = vector.load %arg5[%c1_49, %c0_50, %c0_51] : memref<2x1x32xf32, #tpu.memory_space<vmem>>, vector<1x1x32xf32>
    %86 = vector.shape_cast %85 : vector<1x1x32xf32> to vector<1x32xf32>
    %c1_i32_52 = arith.constant 1 : i32
    %87 = tpu.dynamic_rotate %78 by %c1_i32_52 dim 0 : vector<16x32xf32>, i32 -> vector<16x32xf32>
    %cst_53 = arith.constant 0.000000e+00 : f32
    %88 = vector.shape_cast %18 : vector<16x1xi1> to vector<16x1xi1>
    %89 = vector.broadcast %88 : vector<16x1xi1> to vector<16x32xi1>
    %90 = vector.broadcast %cst_53 : f32 to vector<16x32xf32>
    %91 = arith.select %89, %90, %87 : vector<16x32xi1>, vector<16x32xf32>
    %c15_i32_54 = arith.constant 15 : i32
    %92 = tpu.dynamic_rotate %78 by %c15_i32_54 dim 0 : vector<16x32xf32>, i32 -> vector<16x32xf32>
    %cst_55 = arith.constant 0.000000e+00 : f32
    %93 = vector.shape_cast %36 : vector<16x1xi1> to vector<16x1xi1>
    %94 = vector.broadcast %93 : vector<16x1xi1> to vector<16x32xi1>
    %95 = vector.broadcast %cst_55 : f32 to vector<16x32xf32>
    %96 = arith.select %94, %95, %92 : vector<16x32xi1>, vector<16x32xf32>
    %97 = arith.truncf %91 : vector<16x32xf32> to vector<16x32xbf16>
    %cst_56 = arith.constant dense<0.000000e+00> : vector<16x32xf32>
    %98 = tpu.matmul %97, %80, %cst_56 {dimension_numbers = #tpu.dot_dimension_numbers<[1], [0], [0], [1], [0, 0, 1, 1], [], []>} : vector<16x32xbf16>, vector<32x32xbf16>, vector<16x32xf32> -> vector<16x32xf32>
    %99 = arith.truncf %78 : vector<16x32xf32> to vector<16x32xbf16>
    %cst_57 = arith.constant dense<0.000000e+00> : vector<16x32xf32>
    %100 = tpu.matmul %99, %82, %cst_57 {dimension_numbers = #tpu.dot_dimension_numbers<[1], [0], [0], [1], [0, 0, 1, 1], [], []>} : vector<16x32xbf16>, vector<32x32xbf16>, vector<16x32xf32> -> vector<16x32xf32>
    %101 = arith.addf %98, %100 : vector<16x32xf32>
    %102 = arith.truncf %96 : vector<16x32xf32> to vector<16x32xbf16>
    %cst_58 = arith.constant dense<0.000000e+00> : vector<16x32xf32>
    %103 = tpu.matmul %102, %84, %cst_58 {dimension_numbers = #tpu.dot_dimension_numbers<[1], [0], [0], [1], [0, 0, 1, 1], [], []>} : vector<16x32xbf16>, vector<32x32xbf16>, vector<16x32xf32> -> vector<16x32xf32>
    %104 = arith.addf %101, %103 : vector<16x32xf32>
    %105 = vector.broadcast %86 : vector<1x32xf32> to vector<16x32xf32>
    %106 = arith.addf %104, %105 : vector<16x32xf32>
    %107 = arith.addf %106, %78 : vector<16x32xf32>
    %cst_59 = arith.constant 0.000000e+00 : f32
    %108 = vector.broadcast %cst_59 : f32 to vector<16x32xf32>
    %109 = arith.cmpf oge, %107, %108 : vector<16x32xf32>
    %cst_60 = arith.constant 2.000000e-01 : f32
    %110 = vector.broadcast %cst_60 : f32 to vector<16x32xf32>
    %111 = arith.mulf %110, %107 : vector<16x32xf32>
    %112 = arith.select %109, %107, %111 : vector<16x32xi1>, vector<16x32xf32>
    %c0_61 = arith.constant 0 : index
    %c0_62 = arith.constant 0 : index
    %c0_63 = arith.constant 0 : index
    %113 = vector.load %arg6[%c0_61, %c0_62, %c0_63] : memref<4x32x16xbf16, #tpu.memory_space<vmem>>, vector<1x32x16xbf16>
    %114 = vector.shape_cast %113 : vector<1x32x16xbf16> to vector<32x16xbf16>
    %c1_64 = arith.constant 1 : index
    %c0_65 = arith.constant 0 : index
    %c0_66 = arith.constant 0 : index
    %115 = vector.load %arg6[%c1_64, %c0_65, %c0_66] : memref<4x32x16xbf16, #tpu.memory_space<vmem>>, vector<1x32x16xbf16>
    %116 = vector.shape_cast %115 : vector<1x32x16xbf16> to vector<32x16xbf16>
    %c2_67 = arith.constant 2 : index
    %c0_68 = arith.constant 0 : index
    %c0_69 = arith.constant 0 : index
    %117 = vector.load %arg6[%c2_67, %c0_68, %c0_69] : memref<4x32x16xbf16, #tpu.memory_space<vmem>>, vector<1x32x16xbf16>
    %118 = vector.shape_cast %117 : vector<1x32x16xbf16> to vector<32x16xbf16>
    %c3 = arith.constant 3 : index
    %c0_70 = arith.constant 0 : index
    %c0_71 = arith.constant 0 : index
    %119 = vector.load %arg6[%c3, %c0_70, %c0_71] : memref<4x32x16xbf16, #tpu.memory_space<vmem>>, vector<1x32x16xbf16>
    %120 = vector.shape_cast %119 : vector<1x32x16xbf16> to vector<32x16xbf16>
    %c0_72 = arith.constant 0 : index
    %c0_73 = arith.constant 0 : index
    %121 = vector.load %arg7[%c0_72, %c0_73] : memref<1x16xf32, #tpu.memory_space<vmem>>, vector<1x16xf32>
    %c1_i32_74 = arith.constant 1 : i32
    %122 = tpu.dynamic_rotate %112 by %c1_i32_74 dim 0 : vector<16x32xf32>, i32 -> vector<16x32xf32>
    %cst_75 = arith.constant 0.000000e+00 : f32
    %123 = vector.shape_cast %18 : vector<16x1xi1> to vector<16x1xi1>
    %124 = vector.broadcast %123 : vector<16x1xi1> to vector<16x32xi1>
    %125 = vector.broadcast %cst_75 : f32 to vector<16x32xf32>
    %126 = arith.select %124, %125, %122 : vector<16x32xi1>, vector<16x32xf32>
    %c15_i32_76 = arith.constant 15 : i32
    %127 = tpu.dynamic_rotate %112 by %c15_i32_76 dim 0 : vector<16x32xf32>, i32 -> vector<16x32xf32>
    %cst_77 = arith.constant 0.000000e+00 : f32
    %128 = vector.shape_cast %36 : vector<16x1xi1> to vector<16x1xi1>
    %129 = vector.broadcast %128 : vector<16x1xi1> to vector<16x32xi1>
    %130 = vector.broadcast %cst_77 : f32 to vector<16x32xf32>
    %131 = arith.select %129, %130, %127 : vector<16x32xi1>, vector<16x32xf32>
    %132 = arith.truncf %112 : vector<16x32xf32> to vector<16x32xbf16>
    %cst_78 = arith.constant dense<0.000000e+00> : vector<16x16xf32>
    %133 = tpu.matmul %132, %116, %cst_78 {dimension_numbers = #tpu.dot_dimension_numbers<[1], [0], [0], [1], [0, 0, 1, 1], [], []>} : vector<16x32xbf16>, vector<32x16xbf16>, vector<16x16xf32> -> vector<16x16xf32>
    %134 = arith.truncf %126 : vector<16x32xf32> to vector<16x32xbf16>
    %cst_79 = arith.constant dense<0.000000e+00> : vector<16x16xf32>
    %135 = tpu.matmul %134, %120, %cst_79 {dimension_numbers = #tpu.dot_dimension_numbers<[1], [0], [0], [1], [0, 0, 1, 1], [], []>} : vector<16x32xbf16>, vector<32x16xbf16>, vector<16x16xf32> -> vector<16x16xf32>
    %136 = arith.addf %133, %135 : vector<16x16xf32>
    %137 = vector.broadcast %121 : vector<1x16xf32> to vector<16x16xf32>
    %138 = arith.addf %136, %137 : vector<16x16xf32>
    %cst_80 = arith.constant 0.000000e+00 : f32
    %139 = vector.broadcast %cst_80 : f32 to vector<16x16xf32>
    %140 = arith.cmpf oge, %138, %139 : vector<16x16xf32>
    %cst_81 = arith.constant 2.000000e-01 : f32
    %141 = vector.broadcast %cst_81 : f32 to vector<16x16xf32>
    %142 = arith.mulf %141, %138 : vector<16x16xf32>
    %143 = arith.select %140, %138, %142 : vector<16x16xi1>, vector<16x16xf32>
    %144 = arith.truncf %112 : vector<16x32xf32> to vector<16x32xbf16>
    %cst_82 = arith.constant dense<0.000000e+00> : vector<16x16xf32>
    %145 = tpu.matmul %144, %118, %cst_82 {dimension_numbers = #tpu.dot_dimension_numbers<[1], [0], [0], [1], [0, 0, 1, 1], [], []>} : vector<16x32xbf16>, vector<32x16xbf16>, vector<16x16xf32> -> vector<16x16xf32>
    %146 = arith.truncf %131 : vector<16x32xf32> to vector<16x32xbf16>
    %cst_83 = arith.constant dense<0.000000e+00> : vector<16x16xf32>
    %147 = tpu.matmul %146, %114, %cst_83 {dimension_numbers = #tpu.dot_dimension_numbers<[1], [0], [0], [1], [0, 0, 1, 1], [], []>} : vector<16x32xbf16>, vector<32x16xbf16>, vector<16x16xf32> -> vector<16x16xf32>
    %148 = arith.addf %145, %147 : vector<16x16xf32>
    %149 = vector.broadcast %121 : vector<1x16xf32> to vector<16x16xf32>
    %150 = arith.addf %148, %149 : vector<16x16xf32>
    %cst_84 = arith.constant 0.000000e+00 : f32
    %151 = vector.broadcast %cst_84 : f32 to vector<16x16xf32>
    %152 = arith.cmpf oge, %150, %151 : vector<16x16xf32>
    %cst_85 = arith.constant 2.000000e-01 : f32
    %153 = vector.broadcast %cst_85 : f32 to vector<16x16xf32>
    %154 = arith.mulf %153, %150 : vector<16x16xf32>
    %155 = arith.select %152, %150, %154 : vector<16x16xi1>, vector<16x16xf32>
    %c0_86 = arith.constant 0 : index
    %c0_87 = arith.constant 0 : index
    %c0_88 = arith.constant 0 : index
    %c0_89 = arith.constant 0 : index
    %156 = vector.load %arg8[%c0_86, %c0_87, %c0_88, %c0_89] : memref<2x3x16x16xbf16, #tpu.memory_space<vmem>>, vector<1x1x16x16xbf16>
    %157 = vector.shape_cast %156 : vector<1x1x16x16xbf16> to vector<16x16xbf16>
    %c0_90 = arith.constant 0 : index
    %c1_91 = arith.constant 1 : index
    %c0_92 = arith.constant 0 : index
    %c0_93 = arith.constant 0 : index
    %158 = vector.load %arg8[%c0_90, %c1_91, %c0_92, %c0_93] : memref<2x3x16x16xbf16, #tpu.memory_space<vmem>>, vector<1x1x16x16xbf16>
    %159 = vector.shape_cast %158 : vector<1x1x16x16xbf16> to vector<16x16xbf16>
    %c0_94 = arith.constant 0 : index
    %c2_95 = arith.constant 2 : index
    %c0_96 = arith.constant 0 : index
    %c0_97 = arith.constant 0 : index
    %160 = vector.load %arg8[%c0_94, %c2_95, %c0_96, %c0_97] : memref<2x3x16x16xbf16, #tpu.memory_space<vmem>>, vector<1x1x16x16xbf16>
    %161 = vector.shape_cast %160 : vector<1x1x16x16xbf16> to vector<16x16xbf16>
    %c0_98 = arith.constant 0 : index
    %c0_99 = arith.constant 0 : index
    %c0_100 = arith.constant 0 : index
    %162 = vector.load %arg9[%c0_98, %c0_99, %c0_100] : memref<2x1x16xf32, #tpu.memory_space<vmem>>, vector<1x1x16xf32>
    %163 = vector.shape_cast %162 : vector<1x1x16xf32> to vector<1x16xf32>
    %c1_i32_101 = arith.constant 1 : i32
    %164 = tpu.dynamic_rotate %155 by %c1_i32_101 dim 0 : vector<16x16xf32>, i32 -> vector<16x16xf32>
    %cst_102 = arith.constant 0.000000e+00 : f32
    %165 = vector.shape_cast %18 : vector<16x1xi1> to vector<16x1xi1>
    %166 = vector.broadcast %165 : vector<16x1xi1> to vector<16x16xi1>
    %167 = vector.broadcast %cst_102 : f32 to vector<16x16xf32>
    %168 = arith.select %166, %167, %164 : vector<16x16xi1>, vector<16x16xf32>
    %169 = arith.truncf %168 : vector<16x16xf32> to vector<16x16xbf16>
    %cst_103 = arith.constant dense<0.000000e+00> : vector<16x16xf32>
    %170 = tpu.matmul %169, %157, %cst_103 {dimension_numbers = #tpu.dot_dimension_numbers<[1], [0], [0], [1], [0, 0, 1, 1], [], []>} : vector<16x16xbf16>, vector<16x16xbf16>, vector<16x16xf32> -> vector<16x16xf32>
    %171 = arith.truncf %143 : vector<16x16xf32> to vector<16x16xbf16>
    %cst_104 = arith.constant dense<0.000000e+00> : vector<16x16xf32>
    %172 = tpu.matmul %171, %159, %cst_104 {dimension_numbers = #tpu.dot_dimension_numbers<[1], [0], [0], [1], [0, 0, 1, 1], [], []>} : vector<16x16xbf16>, vector<16x16xbf16>, vector<16x16xf32> -> vector<16x16xf32>
    %173 = arith.addf %170, %172 : vector<16x16xf32>
    %174 = arith.truncf %155 : vector<16x16xf32> to vector<16x16xbf16>
    %cst_105 = arith.constant dense<0.000000e+00> : vector<16x16xf32>
    %175 = tpu.matmul %174, %161, %cst_105 {dimension_numbers = #tpu.dot_dimension_numbers<[1], [0], [0], [1], [0, 0, 1, 1], [], []>} : vector<16x16xbf16>, vector<16x16xbf16>, vector<16x16xf32> -> vector<16x16xf32>
    %176 = arith.addf %173, %175 : vector<16x16xf32>
    %177 = vector.broadcast %163 : vector<1x16xf32> to vector<16x16xf32>
    %178 = arith.addf %176, %177 : vector<16x16xf32>
    %179 = arith.addf %178, %143 : vector<16x16xf32>
    %cst_106 = arith.constant 0.000000e+00 : f32
    %180 = vector.broadcast %cst_106 : f32 to vector<16x16xf32>
    %181 = arith.cmpf oge, %179, %180 : vector<16x16xf32>
    %cst_107 = arith.constant 2.000000e-01 : f32
    %182 = vector.broadcast %cst_107 : f32 to vector<16x16xf32>
    %183 = arith.mulf %182, %179 : vector<16x16xf32>
    %184 = arith.select %181, %179, %183 : vector<16x16xi1>, vector<16x16xf32>
    %c15_i32_108 = arith.constant 15 : i32
    %185 = tpu.dynamic_rotate %143 by %c15_i32_108 dim 0 : vector<16x16xf32>, i32 -> vector<16x16xf32>
    %cst_109 = arith.constant 0.000000e+00 : f32
    %186 = vector.shape_cast %36 : vector<16x1xi1> to vector<16x1xi1>
    %187 = vector.broadcast %186 : vector<16x1xi1> to vector<16x16xi1>
    %188 = vector.broadcast %cst_109 : f32 to vector<16x16xf32>
    %189 = arith.select %187, %188, %185 : vector<16x16xi1>, vector<16x16xf32>
    %190 = arith.truncf %143 : vector<16x16xf32> to vector<16x16xbf16>
    %cst_110 = arith.constant dense<0.000000e+00> : vector<16x16xf32>
    %191 = tpu.matmul %190, %157, %cst_110 {dimension_numbers = #tpu.dot_dimension_numbers<[1], [0], [0], [1], [0, 0, 1, 1], [], []>} : vector<16x16xbf16>, vector<16x16xbf16>, vector<16x16xf32> -> vector<16x16xf32>
    %192 = arith.truncf %155 : vector<16x16xf32> to vector<16x16xbf16>
    %cst_111 = arith.constant dense<0.000000e+00> : vector<16x16xf32>
    %193 = tpu.matmul %192, %159, %cst_111 {dimension_numbers = #tpu.dot_dimension_numbers<[1], [0], [0], [1], [0, 0, 1, 1], [], []>} : vector<16x16xbf16>, vector<16x16xbf16>, vector<16x16xf32> -> vector<16x16xf32>
    %194 = arith.addf %191, %193 : vector<16x16xf32>
    %195 = arith.truncf %189 : vector<16x16xf32> to vector<16x16xbf16>
    %cst_112 = arith.constant dense<0.000000e+00> : vector<16x16xf32>
    %196 = tpu.matmul %195, %161, %cst_112 {dimension_numbers = #tpu.dot_dimension_numbers<[1], [0], [0], [1], [0, 0, 1, 1], [], []>} : vector<16x16xbf16>, vector<16x16xbf16>, vector<16x16xf32> -> vector<16x16xf32>
    %197 = arith.addf %194, %196 : vector<16x16xf32>
    %198 = vector.broadcast %163 : vector<1x16xf32> to vector<16x16xf32>
    %199 = arith.addf %197, %198 : vector<16x16xf32>
    %200 = arith.addf %199, %155 : vector<16x16xf32>
    %cst_113 = arith.constant 0.000000e+00 : f32
    %201 = vector.broadcast %cst_113 : f32 to vector<16x16xf32>
    %202 = arith.cmpf oge, %200, %201 : vector<16x16xf32>
    %cst_114 = arith.constant 2.000000e-01 : f32
    %203 = vector.broadcast %cst_114 : f32 to vector<16x16xf32>
    %204 = arith.mulf %203, %200 : vector<16x16xf32>
    %205 = arith.select %202, %200, %204 : vector<16x16xi1>, vector<16x16xf32>
    %c1_115 = arith.constant 1 : index
    %c0_116 = arith.constant 0 : index
    %c0_117 = arith.constant 0 : index
    %c0_118 = arith.constant 0 : index
    %206 = vector.load %arg8[%c1_115, %c0_116, %c0_117, %c0_118] : memref<2x3x16x16xbf16, #tpu.memory_space<vmem>>, vector<1x1x16x16xbf16>
    %207 = vector.shape_cast %206 : vector<1x1x16x16xbf16> to vector<16x16xbf16>
    %c1_119 = arith.constant 1 : index
    %c1_120 = arith.constant 1 : index
    %c0_121 = arith.constant 0 : index
    %c0_122 = arith.constant 0 : index
    %208 = vector.load %arg8[%c1_119, %c1_120, %c0_121, %c0_122] : memref<2x3x16x16xbf16, #tpu.memory_space<vmem>>, vector<1x1x16x16xbf16>
    %209 = vector.shape_cast %208 : vector<1x1x16x16xbf16> to vector<16x16xbf16>
    %c1_123 = arith.constant 1 : index
    %c2_124 = arith.constant 2 : index
    %c0_125 = arith.constant 0 : index
    %c0_126 = arith.constant 0 : index
    %210 = vector.load %arg8[%c1_123, %c2_124, %c0_125, %c0_126] : memref<2x3x16x16xbf16, #tpu.memory_space<vmem>>, vector<1x1x16x16xbf16>
    %211 = vector.shape_cast %210 : vector<1x1x16x16xbf16> to vector<16x16xbf16>
    %c1_127 = arith.constant 1 : index
    %c0_128 = arith.constant 0 : index
    %c0_129 = arith.constant 0 : index
    %212 = vector.load %arg9[%c1_127, %c0_128, %c0_129] : memref<2x1x16xf32, #tpu.memory_space<vmem>>, vector<1x1x16xf32>
    %213 = vector.shape_cast %212 : vector<1x1x16xf32> to vector<1x16xf32>
    %c1_i32_130 = arith.constant 1 : i32
    %214 = tpu.dynamic_rotate %205 by %c1_i32_130 dim 0 : vector<16x16xf32>, i32 -> vector<16x16xf32>
    %cst_131 = arith.constant 0.000000e+00 : f32
    %215 = vector.shape_cast %18 : vector<16x1xi1> to vector<16x1xi1>
    %216 = vector.broadcast %215 : vector<16x1xi1> to vector<16x16xi1>
    %217 = vector.broadcast %cst_131 : f32 to vector<16x16xf32>
    %218 = arith.select %216, %217, %214 : vector<16x16xi1>, vector<16x16xf32>
    %219 = arith.truncf %218 : vector<16x16xf32> to vector<16x16xbf16>
    %cst_132 = arith.constant dense<0.000000e+00> : vector<16x16xf32>
    %220 = tpu.matmul %219, %207, %cst_132 {dimension_numbers = #tpu.dot_dimension_numbers<[1], [0], [0], [1], [0, 0, 1, 1], [], []>} : vector<16x16xbf16>, vector<16x16xbf16>, vector<16x16xf32> -> vector<16x16xf32>
    %221 = arith.truncf %184 : vector<16x16xf32> to vector<16x16xbf16>
    %cst_133 = arith.constant dense<0.000000e+00> : vector<16x16xf32>
    %222 = tpu.matmul %221, %209, %cst_133 {dimension_numbers = #tpu.dot_dimension_numbers<[1], [0], [0], [1], [0, 0, 1, 1], [], []>} : vector<16x16xbf16>, vector<16x16xbf16>, vector<16x16xf32> -> vector<16x16xf32>
    %223 = arith.addf %220, %222 : vector<16x16xf32>
    %224 = arith.truncf %205 : vector<16x16xf32> to vector<16x16xbf16>
    %cst_134 = arith.constant dense<0.000000e+00> : vector<16x16xf32>
    %225 = tpu.matmul %224, %211, %cst_134 {dimension_numbers = #tpu.dot_dimension_numbers<[1], [0], [0], [1], [0, 0, 1, 1], [], []>} : vector<16x16xbf16>, vector<16x16xbf16>, vector<16x16xf32> -> vector<16x16xf32>
    %226 = arith.addf %223, %225 : vector<16x16xf32>
    %227 = vector.broadcast %213 : vector<1x16xf32> to vector<16x16xf32>
    %228 = arith.addf %226, %227 : vector<16x16xf32>
    %229 = arith.addf %228, %184 : vector<16x16xf32>
    %cst_135 = arith.constant 0.000000e+00 : f32
    %230 = vector.broadcast %cst_135 : f32 to vector<16x16xf32>
    %231 = arith.cmpf oge, %229, %230 : vector<16x16xf32>
    %cst_136 = arith.constant 2.000000e-01 : f32
    %232 = vector.broadcast %cst_136 : f32 to vector<16x16xf32>
    %233 = arith.mulf %232, %229 : vector<16x16xf32>
    %234 = arith.select %231, %229, %233 : vector<16x16xi1>, vector<16x16xf32>
    %c15_i32_137 = arith.constant 15 : i32
    %235 = tpu.dynamic_rotate %184 by %c15_i32_137 dim 0 : vector<16x16xf32>, i32 -> vector<16x16xf32>
    %cst_138 = arith.constant 0.000000e+00 : f32
    %236 = vector.shape_cast %36 : vector<16x1xi1> to vector<16x1xi1>
    %237 = vector.broadcast %236 : vector<16x1xi1> to vector<16x16xi1>
    %238 = vector.broadcast %cst_138 : f32 to vector<16x16xf32>
    %239 = arith.select %237, %238, %235 : vector<16x16xi1>, vector<16x16xf32>
    %240 = arith.truncf %184 : vector<16x16xf32> to vector<16x16xbf16>
    %cst_139 = arith.constant dense<0.000000e+00> : vector<16x16xf32>
    %241 = tpu.matmul %240, %207, %cst_139 {dimension_numbers = #tpu.dot_dimension_numbers<[1], [0], [0], [1], [0, 0, 1, 1], [], []>} : vector<16x16xbf16>, vector<16x16xbf16>, vector<16x16xf32> -> vector<16x16xf32>
    %242 = arith.truncf %205 : vector<16x16xf32> to vector<16x16xbf16>
    %cst_140 = arith.constant dense<0.000000e+00> : vector<16x16xf32>
    %243 = tpu.matmul %242, %209, %cst_140 {dimension_numbers = #tpu.dot_dimension_numbers<[1], [0], [0], [1], [0, 0, 1, 1], [], []>} : vector<16x16xbf16>, vector<16x16xbf16>, vector<16x16xf32> -> vector<16x16xf32>
    %244 = arith.addf %241, %243 : vector<16x16xf32>
    %245 = arith.truncf %239 : vector<16x16xf32> to vector<16x16xbf16>
    %cst_141 = arith.constant dense<0.000000e+00> : vector<16x16xf32>
    %246 = tpu.matmul %245, %211, %cst_141 {dimension_numbers = #tpu.dot_dimension_numbers<[1], [0], [0], [1], [0, 0, 1, 1], [], []>} : vector<16x16xbf16>, vector<16x16xbf16>, vector<16x16xf32> -> vector<16x16xf32>
    %247 = arith.addf %244, %246 : vector<16x16xf32>
    %248 = vector.broadcast %213 : vector<1x16xf32> to vector<16x16xf32>
    %249 = arith.addf %247, %248 : vector<16x16xf32>
    %250 = arith.addf %249, %205 : vector<16x16xf32>
    %cst_142 = arith.constant 0.000000e+00 : f32
    %251 = vector.broadcast %cst_142 : f32 to vector<16x16xf32>
    %252 = arith.cmpf oge, %250, %251 : vector<16x16xf32>
    %cst_143 = arith.constant 2.000000e-01 : f32
    %253 = vector.broadcast %cst_143 : f32 to vector<16x16xf32>
    %254 = arith.mulf %253, %250 : vector<16x16xf32>
    %255 = arith.select %252, %250, %254 : vector<16x16xi1>, vector<16x16xf32>
    %c0_144 = arith.constant 0 : index
    %c0_145 = arith.constant 0 : index
    %c0_146 = arith.constant 0 : index
    %256 = vector.load %arg10[%c0_144, %c0_145, %c0_146] : memref<4x16x8xbf16, #tpu.memory_space<vmem>>, vector<1x16x8xbf16>
    %257 = vector.shape_cast %256 : vector<1x16x8xbf16> to vector<16x8xbf16>
    %c1_147 = arith.constant 1 : index
    %c0_148 = arith.constant 0 : index
    %c0_149 = arith.constant 0 : index
    %258 = vector.load %arg10[%c1_147, %c0_148, %c0_149] : memref<4x16x8xbf16, #tpu.memory_space<vmem>>, vector<1x16x8xbf16>
    %259 = vector.shape_cast %258 : vector<1x16x8xbf16> to vector<16x8xbf16>
    %c2_150 = arith.constant 2 : index
    %c0_151 = arith.constant 0 : index
    %c0_152 = arith.constant 0 : index
    %260 = vector.load %arg10[%c2_150, %c0_151, %c0_152] : memref<4x16x8xbf16, #tpu.memory_space<vmem>>, vector<1x16x8xbf16>
    %261 = vector.shape_cast %260 : vector<1x16x8xbf16> to vector<16x8xbf16>
    %c3_153 = arith.constant 3 : index
    %c0_154 = arith.constant 0 : index
    %c0_155 = arith.constant 0 : index
    %262 = vector.load %arg10[%c3_153, %c0_154, %c0_155] : memref<4x16x8xbf16, #tpu.memory_space<vmem>>, vector<1x16x8xbf16>
    %263 = vector.shape_cast %262 : vector<1x16x8xbf16> to vector<16x8xbf16>
    %c0_156 = arith.constant 0 : index
    %c0_157 = arith.constant 0 : index
    %264 = vector.load %arg11[%c0_156, %c0_157] : memref<1x8xf32, #tpu.memory_space<vmem>>, vector<1x8xf32>
    %c1_i32_158 = arith.constant 1 : i32
    %265 = tpu.dynamic_rotate %255 by %c1_i32_158 dim 0 : vector<16x16xf32>, i32 -> vector<16x16xf32>
    %cst_159 = arith.constant 0.000000e+00 : f32
    %266 = vector.shape_cast %18 : vector<16x1xi1> to vector<16x1xi1>
    %267 = vector.broadcast %266 : vector<16x1xi1> to vector<16x16xi1>
    %268 = vector.broadcast %cst_159 : f32 to vector<16x16xf32>
    %269 = arith.select %267, %268, %265 : vector<16x16xi1>, vector<16x16xf32>
    %270 = arith.truncf %234 : vector<16x16xf32> to vector<16x16xbf16>
    %cst_160 = arith.constant dense<0.000000e+00> : vector<16x8xf32>
    %271 = tpu.matmul %270, %259, %cst_160 {dimension_numbers = #tpu.dot_dimension_numbers<[1], [0], [0], [1], [0, 0, 1, 1], [], []>} : vector<16x16xbf16>, vector<16x8xbf16>, vector<16x8xf32> -> vector<16x8xf32>
    %272 = arith.truncf %269 : vector<16x16xf32> to vector<16x16xbf16>
    %cst_161 = arith.constant dense<0.000000e+00> : vector<16x8xf32>
    %273 = tpu.matmul %272, %263, %cst_161 {dimension_numbers = #tpu.dot_dimension_numbers<[1], [0], [0], [1], [0, 0, 1, 1], [], []>} : vector<16x16xbf16>, vector<16x8xbf16>, vector<16x8xf32> -> vector<16x8xf32>
    %274 = arith.addf %271, %273 : vector<16x8xf32>
    %275 = vector.broadcast %264 : vector<1x8xf32> to vector<16x8xf32>
    %276 = arith.addf %274, %275 : vector<16x8xf32>
    %cst_162 = arith.constant 0.000000e+00 : f32
    %277 = vector.broadcast %cst_162 : f32 to vector<16x8xf32>
    %278 = arith.cmpf oge, %276, %277 : vector<16x8xf32>
    %cst_163 = arith.constant 2.000000e-01 : f32
    %279 = vector.broadcast %cst_163 : f32 to vector<16x8xf32>
    %280 = arith.mulf %279, %276 : vector<16x8xf32>
    %281 = arith.select %278, %276, %280 : vector<16x8xi1>, vector<16x8xf32>
    %282 = arith.truncf %234 : vector<16x16xf32> to vector<16x16xbf16>
    %cst_164 = arith.constant dense<0.000000e+00> : vector<16x8xf32>
    %283 = tpu.matmul %282, %261, %cst_164 {dimension_numbers = #tpu.dot_dimension_numbers<[1], [0], [0], [1], [0, 0, 1, 1], [], []>} : vector<16x16xbf16>, vector<16x8xbf16>, vector<16x8xf32> -> vector<16x8xf32>
    %284 = arith.truncf %255 : vector<16x16xf32> to vector<16x16xbf16>
    %cst_165 = arith.constant dense<0.000000e+00> : vector<16x8xf32>
    %285 = tpu.matmul %284, %257, %cst_165 {dimension_numbers = #tpu.dot_dimension_numbers<[1], [0], [0], [1], [0, 0, 1, 1], [], []>} : vector<16x16xbf16>, vector<16x8xbf16>, vector<16x8xf32> -> vector<16x8xf32>
    %286 = arith.addf %283, %285 : vector<16x8xf32>
    %287 = vector.broadcast %264 : vector<1x8xf32> to vector<16x8xf32>
    %288 = arith.addf %286, %287 : vector<16x8xf32>
    %cst_166 = arith.constant 0.000000e+00 : f32
    %289 = vector.broadcast %cst_166 : f32 to vector<16x8xf32>
    %290 = arith.cmpf oge, %288, %289 : vector<16x8xf32>
    %cst_167 = arith.constant 2.000000e-01 : f32
    %291 = vector.broadcast %cst_167 : f32 to vector<16x8xf32>
    %292 = arith.mulf %291, %288 : vector<16x8xf32>
    %293 = arith.select %290, %288, %292 : vector<16x8xi1>, vector<16x8xf32>
    %c15_i32_168 = arith.constant 15 : i32
    %294 = tpu.dynamic_rotate %234 by %c15_i32_168 dim 0 : vector<16x16xf32>, i32 -> vector<16x16xf32>
    %cst_169 = arith.constant 0.000000e+00 : f32
    %295 = vector.shape_cast %36 : vector<16x1xi1> to vector<16x1xi1>
    %296 = vector.broadcast %295 : vector<16x1xi1> to vector<16x16xi1>
    %297 = vector.broadcast %cst_169 : f32 to vector<16x16xf32>
    %298 = arith.select %296, %297, %294 : vector<16x16xi1>, vector<16x16xf32>
    %299 = arith.truncf %255 : vector<16x16xf32> to vector<16x16xbf16>
    %cst_170 = arith.constant dense<0.000000e+00> : vector<16x8xf32>
    %300 = tpu.matmul %299, %259, %cst_170 {dimension_numbers = #tpu.dot_dimension_numbers<[1], [0], [0], [1], [0, 0, 1, 1], [], []>} : vector<16x16xbf16>, vector<16x8xbf16>, vector<16x8xf32> -> vector<16x8xf32>
    %301 = arith.truncf %234 : vector<16x16xf32> to vector<16x16xbf16>
    %cst_171 = arith.constant dense<0.000000e+00> : vector<16x8xf32>
    %302 = tpu.matmul %301, %263, %cst_171 {dimension_numbers = #tpu.dot_dimension_numbers<[1], [0], [0], [1], [0, 0, 1, 1], [], []>} : vector<16x16xbf16>, vector<16x8xbf16>, vector<16x8xf32> -> vector<16x8xf32>
    %303 = arith.addf %300, %302 : vector<16x8xf32>
    %304 = vector.broadcast %264 : vector<1x8xf32> to vector<16x8xf32>
    %305 = arith.addf %303, %304 : vector<16x8xf32>
    %cst_172 = arith.constant 0.000000e+00 : f32
    %306 = vector.broadcast %cst_172 : f32 to vector<16x8xf32>
    %307 = arith.cmpf oge, %305, %306 : vector<16x8xf32>
    %cst_173 = arith.constant 2.000000e-01 : f32
    %308 = vector.broadcast %cst_173 : f32 to vector<16x8xf32>
    %309 = arith.mulf %308, %305 : vector<16x8xf32>
    %310 = arith.select %307, %305, %309 : vector<16x8xi1>, vector<16x8xf32>
    %311 = arith.truncf %255 : vector<16x16xf32> to vector<16x16xbf16>
    %cst_174 = arith.constant dense<0.000000e+00> : vector<16x8xf32>
    %312 = tpu.matmul %311, %261, %cst_174 {dimension_numbers = #tpu.dot_dimension_numbers<[1], [0], [0], [1], [0, 0, 1, 1], [], []>} : vector<16x16xbf16>, vector<16x8xbf16>, vector<16x8xf32> -> vector<16x8xf32>
    %313 = arith.truncf %298 : vector<16x16xf32> to vector<16x16xbf16>
    %cst_175 = arith.constant dense<0.000000e+00> : vector<16x8xf32>
    %314 = tpu.matmul %313, %257, %cst_175 {dimension_numbers = #tpu.dot_dimension_numbers<[1], [0], [0], [1], [0, 0, 1, 1], [], []>} : vector<16x16xbf16>, vector<16x8xbf16>, vector<16x8xf32> -> vector<16x8xf32>
    %315 = arith.addf %312, %314 : vector<16x8xf32>
    %316 = vector.broadcast %264 : vector<1x8xf32> to vector<16x8xf32>
    %317 = arith.addf %315, %316 : vector<16x8xf32>
    %cst_176 = arith.constant 0.000000e+00 : f32
    %318 = vector.broadcast %cst_176 : f32 to vector<16x8xf32>
    %319 = arith.cmpf oge, %317, %318 : vector<16x8xf32>
    %cst_177 = arith.constant 2.000000e-01 : f32
    %320 = vector.broadcast %cst_177 : f32 to vector<16x8xf32>
    %321 = arith.mulf %320, %317 : vector<16x8xf32>
    %322 = arith.select %319, %317, %321 : vector<16x8xi1>, vector<16x8xf32>
    %c0_178 = arith.constant 0 : index
    %c0_179 = arith.constant 0 : index
    %c0_180 = arith.constant 0 : index
    %c0_181 = arith.constant 0 : index
    %323 = vector.load %arg12[%c0_178, %c0_179, %c0_180, %c0_181] : memref<2x3x8x8xbf16, #tpu.memory_space<vmem>>, vector<1x1x8x8xbf16>
    %324 = vector.shape_cast %323 : vector<1x1x8x8xbf16> to vector<8x8xbf16>
    %c0_182 = arith.constant 0 : index
    %c1_183 = arith.constant 1 : index
    %c0_184 = arith.constant 0 : index
    %c0_185 = arith.constant 0 : index
    %325 = vector.load %arg12[%c0_182, %c1_183, %c0_184, %c0_185] : memref<2x3x8x8xbf16, #tpu.memory_space<vmem>>, vector<1x1x8x8xbf16>
    %326 = vector.shape_cast %325 : vector<1x1x8x8xbf16> to vector<8x8xbf16>
    %c0_186 = arith.constant 0 : index
    %c2_187 = arith.constant 2 : index
    %c0_188 = arith.constant 0 : index
    %c0_189 = arith.constant 0 : index
    %327 = vector.load %arg12[%c0_186, %c2_187, %c0_188, %c0_189] : memref<2x3x8x8xbf16, #tpu.memory_space<vmem>>, vector<1x1x8x8xbf16>
    %328 = vector.shape_cast %327 : vector<1x1x8x8xbf16> to vector<8x8xbf16>
    %c0_190 = arith.constant 0 : index
    %c0_191 = arith.constant 0 : index
    %c0_192 = arith.constant 0 : index
    %329 = vector.load %arg13[%c0_190, %c0_191, %c0_192] : memref<2x1x8xf32, #tpu.memory_space<vmem>>, vector<1x1x8xf32>
    %330 = vector.shape_cast %329 : vector<1x1x8xf32> to vector<1x8xf32>
    %c1_i32_193 = arith.constant 1 : i32
    %331 = tpu.dynamic_rotate %322 by %c1_i32_193 dim 0 : vector<16x8xf32>, i32 -> vector<16x8xf32>
    %cst_194 = arith.constant 0.000000e+00 : f32
    %332 = vector.shape_cast %18 : vector<16x1xi1> to vector<16x1xi1>
    %333 = vector.broadcast %332 : vector<16x1xi1> to vector<16x8xi1>
    %334 = vector.broadcast %cst_194 : f32 to vector<16x8xf32>
    %335 = arith.select %333, %334, %331 : vector<16x8xi1>, vector<16x8xf32>
    %336 = arith.truncf %335 : vector<16x8xf32> to vector<16x8xbf16>
    %cst_195 = arith.constant dense<0.000000e+00> : vector<16x8xf32>
    %337 = tpu.matmul %336, %324, %cst_195 {dimension_numbers = #tpu.dot_dimension_numbers<[1], [0], [0], [1], [0, 0, 1, 1], [], []>} : vector<16x8xbf16>, vector<8x8xbf16>, vector<16x8xf32> -> vector<16x8xf32>
    %338 = arith.truncf %281 : vector<16x8xf32> to vector<16x8xbf16>
    %cst_196 = arith.constant dense<0.000000e+00> : vector<16x8xf32>
    %339 = tpu.matmul %338, %326, %cst_196 {dimension_numbers = #tpu.dot_dimension_numbers<[1], [0], [0], [1], [0, 0, 1, 1], [], []>} : vector<16x8xbf16>, vector<8x8xbf16>, vector<16x8xf32> -> vector<16x8xf32>
    %340 = arith.addf %337, %339 : vector<16x8xf32>
    %341 = arith.truncf %293 : vector<16x8xf32> to vector<16x8xbf16>
    %cst_197 = arith.constant dense<0.000000e+00> : vector<16x8xf32>
    %342 = tpu.matmul %341, %328, %cst_197 {dimension_numbers = #tpu.dot_dimension_numbers<[1], [0], [0], [1], [0, 0, 1, 1], [], []>} : vector<16x8xbf16>, vector<8x8xbf16>, vector<16x8xf32> -> vector<16x8xf32>
    %343 = arith.addf %340, %342 : vector<16x8xf32>
    %344 = vector.broadcast %330 : vector<1x8xf32> to vector<16x8xf32>
    %345 = arith.addf %343, %344 : vector<16x8xf32>
    %346 = arith.addf %345, %281 : vector<16x8xf32>
    %cst_198 = arith.constant 0.000000e+00 : f32
    %347 = vector.broadcast %cst_198 : f32 to vector<16x8xf32>
    %348 = arith.cmpf oge, %346, %347 : vector<16x8xf32>
    %cst_199 = arith.constant 2.000000e-01 : f32
    %349 = vector.broadcast %cst_199 : f32 to vector<16x8xf32>
    %350 = arith.mulf %349, %346 : vector<16x8xf32>
    %351 = arith.select %348, %346, %350 : vector<16x8xi1>, vector<16x8xf32>
    %352 = arith.truncf %281 : vector<16x8xf32> to vector<16x8xbf16>
    %cst_200 = arith.constant dense<0.000000e+00> : vector<16x8xf32>
    %353 = tpu.matmul %352, %324, %cst_200 {dimension_numbers = #tpu.dot_dimension_numbers<[1], [0], [0], [1], [0, 0, 1, 1], [], []>} : vector<16x8xbf16>, vector<8x8xbf16>, vector<16x8xf32> -> vector<16x8xf32>
    %354 = arith.truncf %293 : vector<16x8xf32> to vector<16x8xbf16>
    %cst_201 = arith.constant dense<0.000000e+00> : vector<16x8xf32>
    %355 = tpu.matmul %354, %326, %cst_201 {dimension_numbers = #tpu.dot_dimension_numbers<[1], [0], [0], [1], [0, 0, 1, 1], [], []>} : vector<16x8xbf16>, vector<8x8xbf16>, vector<16x8xf32> -> vector<16x8xf32>
    %356 = arith.addf %353, %355 : vector<16x8xf32>
    %357 = arith.truncf %310 : vector<16x8xf32> to vector<16x8xbf16>
    %cst_202 = arith.constant dense<0.000000e+00> : vector<16x8xf32>
    %358 = tpu.matmul %357, %328, %cst_202 {dimension_numbers = #tpu.dot_dimension_numbers<[1], [0], [0], [1], [0, 0, 1, 1], [], []>} : vector<16x8xbf16>, vector<8x8xbf16>, vector<16x8xf32> -> vector<16x8xf32>
    %359 = arith.addf %356, %358 : vector<16x8xf32>
    %360 = vector.broadcast %330 : vector<1x8xf32> to vector<16x8xf32>
    %361 = arith.addf %359, %360 : vector<16x8xf32>
    %362 = arith.addf %361, %293 : vector<16x8xf32>
    %cst_203 = arith.constant 0.000000e+00 : f32
    %363 = vector.broadcast %cst_203 : f32 to vector<16x8xf32>
    %364 = arith.cmpf oge, %362, %363 : vector<16x8xf32>
    %cst_204 = arith.constant 2.000000e-01 : f32
    %365 = vector.broadcast %cst_204 : f32 to vector<16x8xf32>
    %366 = arith.mulf %365, %362 : vector<16x8xf32>
    %367 = arith.select %364, %362, %366 : vector<16x8xi1>, vector<16x8xf32>
    %368 = arith.truncf %293 : vector<16x8xf32> to vector<16x8xbf16>
    %cst_205 = arith.constant dense<0.000000e+00> : vector<16x8xf32>
    %369 = tpu.matmul %368, %324, %cst_205 {dimension_numbers = #tpu.dot_dimension_numbers<[1], [0], [0], [1], [0, 0, 1, 1], [], []>} : vector<16x8xbf16>, vector<8x8xbf16>, vector<16x8xf32> -> vector<16x8xf32>
    %370 = arith.truncf %310 : vector<16x8xf32> to vector<16x8xbf16>
    %cst_206 = arith.constant dense<0.000000e+00> : vector<16x8xf32>
    %371 = tpu.matmul %370, %326, %cst_206 {dimension_numbers = #tpu.dot_dimension_numbers<[1], [0], [0], [1], [0, 0, 1, 1], [], []>} : vector<16x8xbf16>, vector<8x8xbf16>, vector<16x8xf32> -> vector<16x8xf32>
    %372 = arith.addf %369, %371 : vector<16x8xf32>
    %373 = arith.truncf %322 : vector<16x8xf32> to vector<16x8xbf16>
    %cst_207 = arith.constant dense<0.000000e+00> : vector<16x8xf32>
    %374 = tpu.matmul %373, %328, %cst_207 {dimension_numbers = #tpu.dot_dimension_numbers<[1], [0], [0], [1], [0, 0, 1, 1], [], []>} : vector<16x8xbf16>, vector<8x8xbf16>, vector<16x8xf32> -> vector<16x8xf32>
    %375 = arith.addf %372, %374 : vector<16x8xf32>
    %376 = vector.broadcast %330 : vector<1x8xf32> to vector<16x8xf32>
    %377 = arith.addf %375, %376 : vector<16x8xf32>
    %378 = arith.addf %377, %310 : vector<16x8xf32>
    %cst_208 = arith.constant 0.000000e+00 : f32
    %379 = vector.broadcast %cst_208 : f32 to vector<16x8xf32>
    %380 = arith.cmpf oge, %378, %379 : vector<16x8xf32>
    %cst_209 = arith.constant 2.000000e-01 : f32
    %381 = vector.broadcast %cst_209 : f32 to vector<16x8xf32>
    %382 = arith.mulf %381, %378 : vector<16x8xf32>
    %383 = arith.select %380, %378, %382 : vector<16x8xi1>, vector<16x8xf32>
    %c15_i32_210 = arith.constant 15 : i32
    %384 = tpu.dynamic_rotate %281 by %c15_i32_210 dim 0 : vector<16x8xf32>, i32 -> vector<16x8xf32>
    %cst_211 = arith.constant 0.000000e+00 : f32
    %385 = vector.shape_cast %36 : vector<16x1xi1> to vector<16x1xi1>
    %386 = vector.broadcast %385 : vector<16x1xi1> to vector<16x8xi1>
    %387 = vector.broadcast %cst_211 : f32 to vector<16x8xf32>
    %388 = arith.select %386, %387, %384 : vector<16x8xi1>, vector<16x8xf32>
    %389 = arith.truncf %310 : vector<16x8xf32> to vector<16x8xbf16>
    %cst_212 = arith.constant dense<0.000000e+00> : vector<16x8xf32>
    %390 = tpu.matmul %389, %324, %cst_212 {dimension_numbers = #tpu.dot_dimension_numbers<[1], [0], [0], [1], [0, 0, 1, 1], [], []>} : vector<16x8xbf16>, vector<8x8xbf16>, vector<16x8xf32> -> vector<16x8xf32>
    %391 = arith.truncf %322 : vector<16x8xf32> to vector<16x8xbf16>
    %cst_213 = arith.constant dense<0.000000e+00> : vector<16x8xf32>
    %392 = tpu.matmul %391, %326, %cst_213 {dimension_numbers = #tpu.dot_dimension_numbers<[1], [0], [0], [1], [0, 0, 1, 1], [], []>} : vector<16x8xbf16>, vector<8x8xbf16>, vector<16x8xf32> -> vector<16x8xf32>
    %393 = arith.addf %390, %392 : vector<16x8xf32>
    %394 = arith.truncf %388 : vector<16x8xf32> to vector<16x8xbf16>
    %cst_214 = arith.constant dense<0.000000e+00> : vector<16x8xf32>
    %395 = tpu.matmul %394, %328, %cst_214 {dimension_numbers = #tpu.dot_dimension_numbers<[1], [0], [0], [1], [0, 0, 1, 1], [], []>} : vector<16x8xbf16>, vector<8x8xbf16>, vector<16x8xf32> -> vector<16x8xf32>
    %396 = arith.addf %393, %395 : vector<16x8xf32>
    %397 = vector.broadcast %330 : vector<1x8xf32> to vector<16x8xf32>
    %398 = arith.addf %396, %397 : vector<16x8xf32>
    %399 = arith.addf %398, %322 : vector<16x8xf32>
    %cst_215 = arith.constant 0.000000e+00 : f32
    %400 = vector.broadcast %cst_215 : f32 to vector<16x8xf32>
    %401 = arith.cmpf oge, %399, %400 : vector<16x8xf32>
    %cst_216 = arith.constant 2.000000e-01 : f32
    %402 = vector.broadcast %cst_216 : f32 to vector<16x8xf32>
    %403 = arith.mulf %402, %399 : vector<16x8xf32>
    %404 = arith.select %401, %399, %403 : vector<16x8xi1>, vector<16x8xf32>
    %c1_217 = arith.constant 1 : index
    %c0_218 = arith.constant 0 : index
    %c0_219 = arith.constant 0 : index
    %c0_220 = arith.constant 0 : index
    %405 = vector.load %arg12[%c1_217, %c0_218, %c0_219, %c0_220] : memref<2x3x8x8xbf16, #tpu.memory_space<vmem>>, vector<1x1x8x8xbf16>
    %406 = vector.shape_cast %405 : vector<1x1x8x8xbf16> to vector<8x8xbf16>
    %c1_221 = arith.constant 1 : index
    %c1_222 = arith.constant 1 : index
    %c0_223 = arith.constant 0 : index
    %c0_224 = arith.constant 0 : index
    %407 = vector.load %arg12[%c1_221, %c1_222, %c0_223, %c0_224] : memref<2x3x8x8xbf16, #tpu.memory_space<vmem>>, vector<1x1x8x8xbf16>
    %408 = vector.shape_cast %407 : vector<1x1x8x8xbf16> to vector<8x8xbf16>
    %c1_225 = arith.constant 1 : index
    %c2_226 = arith.constant 2 : index
    %c0_227 = arith.constant 0 : index
    %c0_228 = arith.constant 0 : index
    %409 = vector.load %arg12[%c1_225, %c2_226, %c0_227, %c0_228] : memref<2x3x8x8xbf16, #tpu.memory_space<vmem>>, vector<1x1x8x8xbf16>
    %410 = vector.shape_cast %409 : vector<1x1x8x8xbf16> to vector<8x8xbf16>
    %c1_229 = arith.constant 1 : index
    %c0_230 = arith.constant 0 : index
    %c0_231 = arith.constant 0 : index
    %411 = vector.load %arg13[%c1_229, %c0_230, %c0_231] : memref<2x1x8xf32, #tpu.memory_space<vmem>>, vector<1x1x8xf32>
    %412 = vector.shape_cast %411 : vector<1x1x8xf32> to vector<1x8xf32>
    %c1_i32_232 = arith.constant 1 : i32
    %413 = tpu.dynamic_rotate %404 by %c1_i32_232 dim 0 : vector<16x8xf32>, i32 -> vector<16x8xf32>
    %cst_233 = arith.constant 0.000000e+00 : f32
    %414 = vector.shape_cast %18 : vector<16x1xi1> to vector<16x1xi1>
    %415 = vector.broadcast %414 : vector<16x1xi1> to vector<16x8xi1>
    %416 = vector.broadcast %cst_233 : f32 to vector<16x8xf32>
    %417 = arith.select %415, %416, %413 : vector<16x8xi1>, vector<16x8xf32>
    %418 = arith.truncf %417 : vector<16x8xf32> to vector<16x8xbf16>
    %cst_234 = arith.constant dense<0.000000e+00> : vector<16x8xf32>
    %419 = tpu.matmul %418, %406, %cst_234 {dimension_numbers = #tpu.dot_dimension_numbers<[1], [0], [0], [1], [0, 0, 1, 1], [], []>} : vector<16x8xbf16>, vector<8x8xbf16>, vector<16x8xf32> -> vector<16x8xf32>
    %420 = arith.truncf %351 : vector<16x8xf32> to vector<16x8xbf16>
    %cst_235 = arith.constant dense<0.000000e+00> : vector<16x8xf32>
    %421 = tpu.matmul %420, %408, %cst_235 {dimension_numbers = #tpu.dot_dimension_numbers<[1], [0], [0], [1], [0, 0, 1, 1], [], []>} : vector<16x8xbf16>, vector<8x8xbf16>, vector<16x8xf32> -> vector<16x8xf32>
    %422 = arith.addf %419, %421 : vector<16x8xf32>
    %423 = arith.truncf %367 : vector<16x8xf32> to vector<16x8xbf16>
    %cst_236 = arith.constant dense<0.000000e+00> : vector<16x8xf32>
    %424 = tpu.matmul %423, %410, %cst_236 {dimension_numbers = #tpu.dot_dimension_numbers<[1], [0], [0], [1], [0, 0, 1, 1], [], []>} : vector<16x8xbf16>, vector<8x8xbf16>, vector<16x8xf32> -> vector<16x8xf32>
    %425 = arith.addf %422, %424 : vector<16x8xf32>
    %426 = vector.broadcast %412 : vector<1x8xf32> to vector<16x8xf32>
    %427 = arith.addf %425, %426 : vector<16x8xf32>
    %428 = arith.addf %427, %351 : vector<16x8xf32>
    %cst_237 = arith.constant 0.000000e+00 : f32
    %429 = vector.broadcast %cst_237 : f32 to vector<16x8xf32>
    %430 = arith.cmpf oge, %428, %429 : vector<16x8xf32>
    %cst_238 = arith.constant 2.000000e-01 : f32
    %431 = vector.broadcast %cst_238 : f32 to vector<16x8xf32>
    %432 = arith.mulf %431, %428 : vector<16x8xf32>
    %433 = arith.select %430, %428, %432 : vector<16x8xi1>, vector<16x8xf32>
    %434 = arith.truncf %351 : vector<16x8xf32> to vector<16x8xbf16>
    %cst_239 = arith.constant dense<0.000000e+00> : vector<16x8xf32>
    %435 = tpu.matmul %434, %406, %cst_239 {dimension_numbers = #tpu.dot_dimension_numbers<[1], [0], [0], [1], [0, 0, 1, 1], [], []>} : vector<16x8xbf16>, vector<8x8xbf16>, vector<16x8xf32> -> vector<16x8xf32>
    %436 = arith.truncf %367 : vector<16x8xf32> to vector<16x8xbf16>
    %cst_240 = arith.constant dense<0.000000e+00> : vector<16x8xf32>
    %437 = tpu.matmul %436, %408, %cst_240 {dimension_numbers = #tpu.dot_dimension_numbers<[1], [0], [0], [1], [0, 0, 1, 1], [], []>} : vector<16x8xbf16>, vector<8x8xbf16>, vector<16x8xf32> -> vector<16x8xf32>
    %438 = arith.addf %435, %437 : vector<16x8xf32>
    %439 = arith.truncf %383 : vector<16x8xf32> to vector<16x8xbf16>
    %cst_241 = arith.constant dense<0.000000e+00> : vector<16x8xf32>
    %440 = tpu.matmul %439, %410, %cst_241 {dimension_numbers = #tpu.dot_dimension_numbers<[1], [0], [0], [1], [0, 0, 1, 1], [], []>} : vector<16x8xbf16>, vector<8x8xbf16>, vector<16x8xf32> -> vector<16x8xf32>
    %441 = arith.addf %438, %440 : vector<16x8xf32>
    %442 = vector.broadcast %412 : vector<1x8xf32> to vector<16x8xf32>
    %443 = arith.addf %441, %442 : vector<16x8xf32>
    %444 = arith.addf %443, %367 : vector<16x8xf32>
    %cst_242 = arith.constant 0.000000e+00 : f32
    %445 = vector.broadcast %cst_242 : f32 to vector<16x8xf32>
    %446 = arith.cmpf oge, %444, %445 : vector<16x8xf32>
    %cst_243 = arith.constant 2.000000e-01 : f32
    %447 = vector.broadcast %cst_243 : f32 to vector<16x8xf32>
    %448 = arith.mulf %447, %444 : vector<16x8xf32>
    %449 = arith.select %446, %444, %448 : vector<16x8xi1>, vector<16x8xf32>
    %450 = arith.truncf %367 : vector<16x8xf32> to vector<16x8xbf16>
    %cst_244 = arith.constant dense<0.000000e+00> : vector<16x8xf32>
    %451 = tpu.matmul %450, %406, %cst_244 {dimension_numbers = #tpu.dot_dimension_numbers<[1], [0], [0], [1], [0, 0, 1, 1], [], []>} : vector<16x8xbf16>, vector<8x8xbf16>, vector<16x8xf32> -> vector<16x8xf32>
    %452 = arith.truncf %383 : vector<16x8xf32> to vector<16x8xbf16>
    %cst_245 = arith.constant dense<0.000000e+00> : vector<16x8xf32>
    %453 = tpu.matmul %452, %408, %cst_245 {dimension_numbers = #tpu.dot_dimension_numbers<[1], [0], [0], [1], [0, 0, 1, 1], [], []>} : vector<16x8xbf16>, vector<8x8xbf16>, vector<16x8xf32> -> vector<16x8xf32>
    %454 = arith.addf %451, %453 : vector<16x8xf32>
    %455 = arith.truncf %404 : vector<16x8xf32> to vector<16x8xbf16>
    %cst_246 = arith.constant dense<0.000000e+00> : vector<16x8xf32>
    %456 = tpu.matmul %455, %410, %cst_246 {dimension_numbers = #tpu.dot_dimension_numbers<[1], [0], [0], [1], [0, 0, 1, 1], [], []>} : vector<16x8xbf16>, vector<8x8xbf16>, vector<16x8xf32> -> vector<16x8xf32>
    %457 = arith.addf %454, %456 : vector<16x8xf32>
    %458 = vector.broadcast %412 : vector<1x8xf32> to vector<16x8xf32>
    %459 = arith.addf %457, %458 : vector<16x8xf32>
    %460 = arith.addf %459, %383 : vector<16x8xf32>
    %cst_247 = arith.constant 0.000000e+00 : f32
    %461 = vector.broadcast %cst_247 : f32 to vector<16x8xf32>
    %462 = arith.cmpf oge, %460, %461 : vector<16x8xf32>
    %cst_248 = arith.constant 2.000000e-01 : f32
    %463 = vector.broadcast %cst_248 : f32 to vector<16x8xf32>
    %464 = arith.mulf %463, %460 : vector<16x8xf32>
    %465 = arith.select %462, %460, %464 : vector<16x8xi1>, vector<16x8xf32>
    %c15_i32_249 = arith.constant 15 : i32
    %466 = tpu.dynamic_rotate %351 by %c15_i32_249 dim 0 : vector<16x8xf32>, i32 -> vector<16x8xf32>
    %cst_250 = arith.constant 0.000000e+00 : f32
    %467 = vector.shape_cast %36 : vector<16x1xi1> to vector<16x1xi1>
    %468 = vector.broadcast %467 : vector<16x1xi1> to vector<16x8xi1>
    %469 = vector.broadcast %cst_250 : f32 to vector<16x8xf32>
    %470 = arith.select %468, %469, %466 : vector<16x8xi1>, vector<16x8xf32>
    %471 = arith.truncf %383 : vector<16x8xf32> to vector<16x8xbf16>
    %cst_251 = arith.constant dense<0.000000e+00> : vector<16x8xf32>
    %472 = tpu.matmul %471, %406, %cst_251 {dimension_numbers = #tpu.dot_dimension_numbers<[1], [0], [0], [1], [0, 0, 1, 1], [], []>} : vector<16x8xbf16>, vector<8x8xbf16>, vector<16x8xf32> -> vector<16x8xf32>
    %473 = arith.truncf %404 : vector<16x8xf32> to vector<16x8xbf16>
    %cst_252 = arith.constant dense<0.000000e+00> : vector<16x8xf32>
    %474 = tpu.matmul %473, %408, %cst_252 {dimension_numbers = #tpu.dot_dimension_numbers<[1], [0], [0], [1], [0, 0, 1, 1], [], []>} : vector<16x8xbf16>, vector<8x8xbf16>, vector<16x8xf32> -> vector<16x8xf32>
    %475 = arith.addf %472, %474 : vector<16x8xf32>
    %476 = arith.truncf %470 : vector<16x8xf32> to vector<16x8xbf16>
    %cst_253 = arith.constant dense<0.000000e+00> : vector<16x8xf32>
    %477 = tpu.matmul %476, %410, %cst_253 {dimension_numbers = #tpu.dot_dimension_numbers<[1], [0], [0], [1], [0, 0, 1, 1], [], []>} : vector<16x8xbf16>, vector<8x8xbf16>, vector<16x8xf32> -> vector<16x8xf32>
    %478 = arith.addf %475, %477 : vector<16x8xf32>
    %479 = vector.broadcast %412 : vector<1x8xf32> to vector<16x8xf32>
    %480 = arith.addf %478, %479 : vector<16x8xf32>
    %481 = arith.addf %480, %404 : vector<16x8xf32>
    %cst_254 = arith.constant 0.000000e+00 : f32
    %482 = vector.broadcast %cst_254 : f32 to vector<16x8xf32>
    %483 = arith.cmpf oge, %481, %482 : vector<16x8xf32>
    %cst_255 = arith.constant 2.000000e-01 : f32
    %484 = vector.broadcast %cst_255 : f32 to vector<16x8xf32>
    %485 = arith.mulf %484, %481 : vector<16x8xf32>
    %486 = arith.select %483, %481, %485 : vector<16x8xi1>, vector<16x8xf32>
    %c0_256 = arith.constant 0 : index
    %c0_257 = arith.constant 0 : index
    %487 = vector.load %arg14[%c0_256, %c0_257] : memref<8x128xbf16, #tpu.memory_space<vmem>>, vector<8x128xbf16>
    %c0_258 = arith.constant 0 : index
    %c0_259 = arith.constant 0 : index
    %488 = vector.load %arg15[%c0_258, %c0_259] : memref<1x128xf32, #tpu.memory_space<vmem>>, vector<1x128xf32>
    %489 = arith.truncf %433 : vector<16x8xf32> to vector<16x8xbf16>
    %cst_260 = arith.constant dense<0.000000e+00> : vector<16x128xf32>
    %490 = tpu.matmul %489, %487, %cst_260 {dimension_numbers = #tpu.dot_dimension_numbers<[1], [0], [0], [1], [0, 0, 1, 1], [], []>} : vector<16x8xbf16>, vector<8x128xbf16>, vector<16x128xf32> -> vector<16x128xf32>
    %491 = vector.broadcast %488 : vector<1x128xf32> to vector<16x128xf32>
    %492 = arith.addf %490, %491 : vector<16x128xf32>
    %493 = vector.shape_cast %492 : vector<16x128xf32> to vector<2x8x128xf32>
    %c0_261 = arith.constant 0 : index
    %c0_262 = arith.constant 0 : index
    %c0_263 = arith.constant 0 : index
    %c0_264 = arith.constant 0 : index
    %494 = vector.load %arg16[%c0_261, %c0_262, %c0_263, %c0_264] : memref<4x2x8x128xf32, #tpu.memory_space<vmem>>, vector<1x2x8x128xf32>
    %495 = vector.shape_cast %494 : vector<1x2x8x128xf32> to vector<2x8x128xf32>
    %496 = vector.shape_cast %493 : vector<2x8x128xf32> to vector<1x2x8x128xf32>
    tpu.vector_store %arg16[%c0_261, %c0_262, %c0_263, %c0_264], %496 {strides = array<i32>} : memref<4x2x8x128xf32, #tpu.memory_space<vmem>>, vector<1x2x8x128xf32>,
    %497 = arith.truncf %449 : vector<16x8xf32> to vector<16x8xbf16>
    %cst_265 = arith.constant dense<0.000000e+00> : vector<16x128xf32>
    %498 = tpu.matmul %497, %487, %cst_265 {dimension_numbers = #tpu.dot_dimension_numbers<[1], [0], [0], [1], [0, 0, 1, 1], [], []>} : vector<16x8xbf16>, vector<8x128xbf16>, vector<16x128xf32> -> vector<16x128xf32>
    %499 = vector.broadcast %488 : vector<1x128xf32> to vector<16x128xf32>
    %500 = arith.addf %498, %499 : vector<16x128xf32>
    %501 = vector.shape_cast %500 : vector<16x128xf32> to vector<2x8x128xf32>
    %c1_266 = arith.constant 1 : index
    %c0_267 = arith.constant 0 : index
    %c0_268 = arith.constant 0 : index
    %c0_269 = arith.constant 0 : index
    %502 = vector.load %arg16[%c1_266, %c0_267, %c0_268, %c0_269] : memref<4x2x8x128xf32, #tpu.memory_space<vmem>>, vector<1x2x8x128xf32>
    %503 = vector.shape_cast %502 : vector<1x2x8x128xf32> to vector<2x8x128xf32>
    %504 = vector.shape_cast %501 : vector<2x8x128xf32> to vector<1x2x8x128xf32>
    tpu.vector_store %arg16[%c1_266, %c0_267, %c0_268, %c0_269], %504 {strides = array<i32>} : memref<4x2x8x128xf32, #tpu.memory_space<vmem>>, vector<1x2x8x128xf32>,
    %505 = arith.truncf %465 : vector<16x8xf32> to vector<16x8xbf16>
    %cst_270 = arith.constant dense<0.000000e+00> : vector<16x128xf32>
    %506 = tpu.matmul %505, %487, %cst_270 {dimension_numbers = #tpu.dot_dimension_numbers<[1], [0], [0], [1], [0, 0, 1, 1], [], []>} : vector<16x8xbf16>, vector<8x128xbf16>, vector<16x128xf32> -> vector<16x128xf32>
    %507 = vector.broadcast %488 : vector<1x128xf32> to vector<16x128xf32>
    %508 = arith.addf %506, %507 : vector<16x128xf32>
    %509 = vector.shape_cast %508 : vector<16x128xf32> to vector<2x8x128xf32>
    %c2_271 = arith.constant 2 : index
    %c0_272 = arith.constant 0 : index
    %c0_273 = arith.constant 0 : index
    %c0_274 = arith.constant 0 : index
    %510 = vector.load %arg16[%c2_271, %c0_272, %c0_273, %c0_274] : memref<4x2x8x128xf32, #tpu.memory_space<vmem>>, vector<1x2x8x128xf32>
    %511 = vector.shape_cast %510 : vector<1x2x8x128xf32> to vector<2x8x128xf32>
    %512 = vector.shape_cast %509 : vector<2x8x128xf32> to vector<1x2x8x128xf32>
    tpu.vector_store %arg16[%c2_271, %c0_272, %c0_273, %c0_274], %512 {strides = array<i32>} : memref<4x2x8x128xf32, #tpu.memory_space<vmem>>, vector<1x2x8x128xf32>,
    %513 = arith.truncf %486 : vector<16x8xf32> to vector<16x8xbf16>
    %cst_275 = arith.constant dense<0.000000e+00> : vector<16x128xf32>
    %514 = tpu.matmul %513, %487, %cst_275 {dimension_numbers = #tpu.dot_dimension_numbers<[1], [0], [0], [1], [0, 0, 1, 1], [], []>} : vector<16x8xbf16>, vector<8x128xbf16>, vector<16x128xf32> -> vector<16x128xf32>
    %515 = vector.broadcast %488 : vector<1x128xf32> to vector<16x128xf32>
    %516 = arith.addf %514, %515 : vector<16x128xf32>
    %517 = vector.shape_cast %516 : vector<16x128xf32> to vector<2x8x128xf32>
    %c3_276 = arith.constant 3 : index
    %c0_277 = arith.constant 0 : index
    %c0_278 = arith.constant 0 : index
    %c0_279 = arith.constant 0 : index
    %518 = vector.load %arg16[%c3_276, %c0_277, %c0_278, %c0_279] : memref<4x2x8x128xf32, #tpu.memory_space<vmem>>, vector<1x2x8x128xf32>
    %519 = vector.shape_cast %518 : vector<1x2x8x128xf32> to vector<2x8x128xf32>
    %520 = vector.shape_cast %517 : vector<2x8x128xf32> to vector<1x2x8x128xf32>
    tpu.vector_store %arg16[%c3_276, %c0_277, %c0_278, %c0_279], %520 {strides = array<i32>} : memref<4x2x8x128xf32, #tpu.memory_space<vmem>>, vector<1x2x8x128xf32>,
    return
  }
  func.func @transform_0(%arg0: i32) -> (i32, i32, i32) {
    %c0_i32 = arith.constant 0 : i32
    %c0_i32_0 = arith.constant 0 : i32
    %c0_i32_1 = arith.constant 0 : i32
    return %arg0, %c0_i32, %c0_i32_0 : i32, i32, i32
  }
  func.func @transform_1(%arg0: i32) -> (i32, i32) {
    %c0_i32 = arith.constant 0 : i32
    %c0_i32_0 = arith.constant 0 : i32
    %c0_i32_1 = arith.constant 0 : i32
    return %c0_i32, %c0_i32_0 : i32, i32
  }
  func.func @transform_2(%arg0: i32) -> (i32, i32) {
    %c0_i32 = arith.constant 0 : i32
    %c0_i32_0 = arith.constant 0 : i32
    %c0_i32_1 = arith.constant 0 : i32
    return %c0_i32, %c0_i32_0 : i32, i32
  }
  func.func @transform_3(%arg0: i32) -> (i32, i32, i32, i32) {
    %c0_i32 = arith.constant 0 : i32
    %c0_i32_0 = arith.constant 0 : i32
    %c0_i32_1 = arith.constant 0 : i32
    %c0_i32_2 = arith.constant 0 : i32
    %c0_i32_3 = arith.constant 0 : i32
    return %c0_i32, %c0_i32_0, %c0_i32_1, %c0_i32_2 : i32, i32, i32, i32
  }
  func.func @transform_4(%arg0: i32) -> (i32, i32, i32) {
    %c0_i32 = arith.constant 0 : i32
    %c0_i32_0 = arith.constant 0 : i32
    %c0_i32_1 = arith.constant 0 : i32
    %c0_i32_2 = arith.constant 0 : i32
    return %c0_i32, %c0_i32_0, %c0_i32_1 : i32, i32, i32
  }
  func.func @transform_5(%arg0: i32) -> (i32, i32, i32) {
    %c0_i32 = arith.constant 0 : i32
    %c0_i32_0 = arith.constant 0 : i32
    %c0_i32_1 = arith.constant 0 : i32
    %c0_i32_2 = arith.constant 0 : i32
    return %c0_i32, %c0_i32_0, %c0_i32_1 : i32, i32, i32
  }
  func.func @transform_6(%arg0: i32) -> (i32, i32) {
    %c0_i32 = arith.constant 0 : i32
    %c0_i32_0 = arith.constant 0 : i32
    %c0_i32_1 = arith.constant 0 : i32
    return %c0_i32, %c0_i32_0 : i32, i32
  }
  func.func @transform_7(%arg0: i32) -> (i32, i32, i32, i32) {
    %c0_i32 = arith.constant 0 : i32
    %c0_i32_0 = arith.constant 0 : i32
    %c0_i32_1 = arith.constant 0 : i32
    %c0_i32_2 = arith.constant 0 : i32
    %c0_i32_3 = arith.constant 0 : i32
    return %c0_i32, %c0_i32_0, %c0_i32_1, %c0_i32_2 : i32, i32, i32, i32
  }
  func.func @transform_8(%arg0: i32) -> (i32, i32, i32) {
    %c0_i32 = arith.constant 0 : i32
    %c0_i32_0 = arith.constant 0 : i32
    %c0_i32_1 = arith.constant 0 : i32
    %c0_i32_2 = arith.constant 0 : i32
    return %c0_i32, %c0_i32_0, %c0_i32_1 : i32, i32, i32
  }
  func.func @transform_9(%arg0: i32) -> (i32, i32, i32) {
    %c0_i32 = arith.constant 0 : i32
    %c0_i32_0 = arith.constant 0 : i32
    %c0_i32_1 = arith.constant 0 : i32
    %c0_i32_2 = arith.constant 0 : i32
    return %c0_i32, %c0_i32_0, %c0_i32_1 : i32, i32, i32
  }
  func.func @transform_10(%arg0: i32) -> (i32, i32) {
    %c0_i32 = arith.constant 0 : i32
    %c0_i32_0 = arith.constant 0 : i32
    %c0_i32_1 = arith.constant 0 : i32
    return %c0_i32, %c0_i32_0 : i32, i32
  }
  func.func @transform_11(%arg0: i32) -> (i32, i32, i32, i32) {
    %c0_i32 = arith.constant 0 : i32
    %c0_i32_0 = arith.constant 0 : i32
    %c0_i32_1 = arith.constant 0 : i32
    %c0_i32_2 = arith.constant 0 : i32
    %c0_i32_3 = arith.constant 0 : i32
    return %c0_i32, %c0_i32_0, %c0_i32_1, %c0_i32_2 : i32, i32, i32, i32
  }
  func.func @transform_12(%arg0: i32) -> (i32, i32, i32) {
    %c0_i32 = arith.constant 0 : i32
    %c0_i32_0 = arith.constant 0 : i32
    %c0_i32_1 = arith.constant 0 : i32
    %c0_i32_2 = arith.constant 0 : i32
    return %c0_i32, %c0_i32_0, %c0_i32_1 : i32, i32, i32
  }
  func.func @transform_13(%arg0: i32) -> (i32, i32) {
    %c0_i32 = arith.constant 0 : i32
    %c0_i32_0 = arith.constant 0 : i32
    %c0_i32_1 = arith.constant 0 : i32
    return %c0_i32, %c0_i32_0 : i32, i32
  }
  func.func @transform_14(%arg0: i32) -> (i32, i32) {
    %c0_i32 = arith.constant 0 : i32
    %c0_i32_0 = arith.constant 0 : i32
    %c0_i32_1 = arith.constant 0 : i32
    return %c0_i32, %c0_i32_0 : i32, i32
  }
  func.func @transform_15(%arg0: i32) -> (i32, i32, i32, i32) {
    %c0_i32 = arith.constant 0 : i32
    %c0_i32_0 = arith.constant 0 : i32
    %c0_i32_1 = arith.constant 0 : i32
    %c0_i32_2 = arith.constant 0 : i32
    return %c0_i32, %arg0, %c0_i32_0, %c0_i32_1 : i32, i32, i32, i32
  }
}

</mosaic_0001>

<bundles_post_ra>
// kernel: decoder_forward.1
= control target key start
LH: loop header
LB: loop body
LE: loop exit
PB: predicated region body
PF: predicated region fallthrough
CT: control target
= control target key end

     0   :  { %vm97_vm0 = vcmask 1043456   ;;  %v4057_v0 = vmov 0.0   ;;  %vm4058_vm1 = vmmov 0   ;;  %vm93_vm2 = vcmask 64512   ;;  %s4946_s1 = inlined_call_operand.vmem [shape: bf16[8,32], index: 1, kind: input, shape index: {}]   ;;  %s4947_s0 = inlined_call_operand.vmem [shape: f32[2,8,8], index: 0, kind: input, shape index: {}]   ;;  %s4948_s3 = inlined_call_operand.vmem [shape: bf16[2,3,32,32], index: 3, kind: input, shape index: {}]   ;;  %s4949_s2 = inlined_call_operand.vmem [shape: f32[1,32], index: 2, kind: input, shape index: {}]   ;;  %s4950_s4 = inlined_call_operand.vmem [shape: f32[2,1,32], index: 4, kind: input, shape index: {}]   ;;  %s4951_s5 = inlined_call_operand.vmem [shape: bf16[4,32,16], index: 5, kind: input, shape index: {}]   ;;  %s4952_s7 = inlined_call_operand.vmem [shape: bf16[2,3,16,16], index: 7, kind: input, shape index: {}]   ;;  %s4953_s6 = inlined_call_operand.vmem [shape: f32[1,16], index: 6, kind: input, shape index: {}]   ;;  %s4954_s8 = inlined_call_operand.vmem [shape: f32[2,1,16], index: 8, kind: input, shape index: {}]   ;;  %s4955_s9 = inlined_call_operand.vmem [shape: bf16[4,16,8], index: 9, kind: input, shape index: {}]   ;;  %s4956_s11 = inlined_call_operand.vmem [shape: bf16[2,3,8,8], index: 11, kind: input, shape index: {}]   ;;  %s4957_s10 = inlined_call_operand.vmem [shape: f32[1,8], index: 10, kind: input, shape index: {}]   ;;  %s4958_s12 = inlined_call_operand.vmem [shape: f32[2,1,8], index: 12, kind: input, shape index: {}]   ;;  %s4959_s13 = inlined_call_operand.vmem [shape: bf16[8,128], index: 13, kind: input, shape index: {}]   ;;  %s4960_s14 = inlined_call_operand.vmem [shape: f32[1,128], index: 14, kind: input, shape index: {}]   ;;  %s4961_s15 = inlined_call_operand.vmem [shape: f32[4,2,8,128], index: 15, kind: output, shape index: {}]  }
   0x1   :  { %3651 = vmatprep.subr.bf16.mxu0 %v4057_v0  ;;  %v84_v1 = vld [vmem:[%s4946_s1] sm:$0xf]  ;;  %3653 = vmatprep.mubr.msk.bf16.mxu0 %vm4058_vm1, %v4057_v0  ;;  %v83_v3 = vld [vmem:[%s4947_s0 + $0x8] sm:$0xff]  ;;  %v4027_v6 = vld [vmem:[%s4948_s3 + $0x10] sm:$0xff]   ;;  %v51_v10 = vlaneseq  ;;  %vm193_vm5 = vcmask 261120  }
   0x2   :  { %v82_v2 = vld [vmem:[%s4947_s0] sm:$0xff]  ;;  %v99_v4 = vsel %vm97_vm0, %v84_v1, 0  ;;  %3657 = vmatprep.subr.bf16.mxu1 %v4057_v0  ;;  %3661 = vmatprep.mubr.msk.bf16.mxu1 %vm4058_vm1, %v4057_v0  ;;  %v4028_v7 = vld [vmem:[%s4948_s3 + $0x18] sm:$0xff]   ;;  %v4031_v9 = vld [vmem:[%s4948_s3 + $0x8] sm:$0xff]  }
   0x3   :  { %v85_v5 = vpack.c.bf16 %v83_v3, %v82_v2  ;;  %3652 = vmatpush3.bf16.msra.mxu0 %v99_v4  ;;  %3658 = vmatpush3.bf16.msra.mxu1 %v4027_v6  ;;  %v4029_v8 = vld [vmem:[%s4948_s3] sm:$0xff]   ;;  %v4175_v11 = vshrl.u32 %v51_v10, 7  ;;  %v4032_v38 = vld [vmem:[%s4948_s3 + $0x28] sm:$0xff]   ;;  %v4035_v45 = vld [vmem:[%s4948_s3 + $0x30] sm:$0xff]  }
   0x4   :  { %3665 = vmatprep.subr.bf16.mxu0 %v4057_v0  ;;  %3659 = vmatprep.subr.bf16.mxu1 %v4057_v0  ;;  %v3362_v13 = vld [vmem:[%s4949_s2] ss:$0 sm:$0xff]  ;;  %v4034_v44 = vld [vmem:[%s4948_s3 + $0x48] sm:$0xff]   ;;  %v4037_v46 = vld [vmem:[%s4948_s3 + $0x38] sm:$0xff]  }
   0x5   :  { %v53_v12 = vadd.s32 8, %v4175_v11  ;;  %v58_v15 = vand.u32 7, %v4175_v11  ;;  %vm159_vm3 = vcmp.lt.s32.totalorder %v4175_v11, 1  ;;  %vm170_vm4 = vcmp.lt.s32.totalorder %v4175_v11, 7  ;;  %v4030_v23 = vld [vmem:[%s4948_s3 + $0x20] sm:$0xff]   ;;  %v4036_v10 = vld [vmem:[%s4948_s3 + $0x50] sm:$0xff]  }
   0x6   :  { %3654 = vmatmul.mubr.msk.bf16.vlgmr.msra.gmra.mrb[0].mxu0 %vm93_vm2, %v85_v5  ;;  %v4033_v43 = vld [vmem:[%s4948_s3 + $0x40] sm:$0xff]  }
   0x7   :  { %3669 = vmatprep.mubr.msk.bf16.mxu0 %vm4058_vm1, %v4057_v0  ;;  %3660 = vmatpush3.bf16.msra.mxu1 %v4028_v7  ;;  %v65_v16 = vand.u32 7, %v53_v12  ;;  %vm4192_vm6 = vcmp.eq.s32.totalorder %v58_v15, 0  ;;  %vm4205_vm8 = vcmp.eq.s32.totalorder %v58_v15, 7  ;;  %v3381_v57 = vld [vmem:[%s4950_s4] ss:$0 sm:$0xff] }
   0x8   :  { %3666 = vmatpush3.bf16.msra.mxu0 %v4029_v8  ;;  %3673 = vmatprep.subr.bf16.mxu1 %v4057_v0  ;;  %v3156_v11 = vld [vmem:[%s4959_s13] sm:$0xf] }
   0x9   :  { %3667 = vmatprep.subr.bf16.mxu0 %v4057_v0  ;;  %vm4196_vm7 = vcmp.eq.s32.totalorder %v65_v16, 0  ;;  %vm4209_vm9 = vcmp.eq.s32.totalorder %v65_v16, 7 }
   0xc   :  { %3668 = vmatpush3.bf16.msra.mxu0 %v4031_v9 }
   0xd   :  { %3681 = vmatprep.subr.bf16.mxu0 %v4057_v0 }
  0xd9   :  { %v135_v14 = vpop.f32.mrb[0].mxu0 }
  0xda   :  { %v4182_v17 = vadd.f32 %v3362_v13, %v135_v14  ;;  %v3655_v18 = vpop.f32.mrb[1].mxu0 }
  0xdb   :  { %v138_v19 = vpop.f32.mrb[2].mxu0 }
  0xdc   :  { %v4184_v20 = vadd.f32 %v3362_v13, %v138_v19  ;;  %v3656_v21 = vpop.f32.mrb[3].mxu0  ;;  %v157_v22 = vrot.slane %v4182_v17, 7  ;;  %v168_v26 = vrot.slane %v4182_v17, 1 }
  0xde   :  { %v158_v27 = vrot.slane %v4184_v20, 7  ;;  %v169_v28 = vrot.slane %v4184_v20, 1  ;;  %v180_v29 = vpack.c.bf16 %v4184_v20, %v4182_v17 }
  0xe0   :  { %v160_v32 = vsel %vm159_vm3, %v157_v22, %v158_v27  ;;  %v161_v33 = vsel %vm159_vm3, %v158_v27, %v157_v22  ;;  %v171_v34 = vsel %vm170_vm4, %v168_v26, %v169_v28  ;;  %v172_v35 = vsel %vm170_vm4, %v169_v28, %v168_v26  ;;  %3662 = vmatmul.mubr.msk.bf16.vlgmr.msra.gmra.mrb[0].mxu1 %vm193_vm5, %v180_v29  ;;  %v4038_v22 = vld [vmem:[%s4948_s3 + $0x58] sm:$0xff]   ;;  %v4039_v29 = vld [vmem:[%s4951_s5 + $0x10] sm:$0xff]  }
  0xe1   :  { %3674 = vmatpush3.bf16.msra.mxu1 %v4030_v23  ;;  %v166_v36 = vsel %vm4192_vm6, 0.0, %v161_v33  ;;  %v167_v37 = vsel %vm4196_vm7, 0.0, %v160_v32  ;;  %3677 = vmatprep.mubr.msk.bf16.mxu1 %vm4058_vm1, %v4057_v0  ;;  %v177_v40 = vsel %vm4205_vm8, 0.0, %v171_v34  ;;  %v178_v41 = vsel %vm4209_vm9, 0.0, %v172_v35  ;;  %v4040_v32 = vld [vmem:[%s4951_s5 + $0x30] sm:$0xff]   ;;  %v4041_v33 = vld [vmem:[%s4951_s5 + $0x18] sm:$0xff]  }
  0xe2   :  { %3675 = vmatprep.subr.bf16.mxu1 %v4057_v0  ;;  %v179_v39 = vpack.c.bf16 %v167_v37, %v166_v36  ;;  %v294_v42 = vpack.c.bf16 %v178_v41, %v177_v40  ;;  %v4042_v34 = vld [vmem:[%s4951_s5 + $0x38] sm:$0xff]  }
  0xe4   :  { %3670 = vmatmul.mubr.msk.bf16.vlgmr.msra.gmra.mrb[4].mxu0 %vm193_vm5, %v179_v39 }
  0xe5   :  { %3676 = vmatpush3.bf16.msra.mxu1 %v4032_v38  ;;  %3685 = vmatprep.mubr.msk.bf16.mxu0 %vm4058_vm1, %v4057_v0 }
  0xe6   :  { %3689 = vmatprep.subr.bf16.mxu1 %v4057_v0  ;;  %3682 = vmatpush3.bf16.msra.mxu0 %v4033_v43 }
  0xe7   :  { %3683 = vmatprep.subr.bf16.mxu0 %v4057_v0 }
  0xe8   :  { %3678 = vmatmul.mubr.msk.bf16.vlgmr.msra.gmra.mrb[4].mxu1 %vm193_vm5, %v294_v42 }
  0xe9   :  { %3693 = vmatprep.mubr.msk.bf16.mxu1 %vm4058_vm1, %v4057_v0  ;;  %3690 = vmatpush3.bf16.msra.mxu1 %v4035_v45  ;;  %v3404_v45 = vld [vmem:[%s4950_s4 + $0x1] ss:$0 sm:$0xff] }
  0xea   :  { %3684 = vmatpush3.bf16.msra.mxu0 %v4034_v44  ;;  %3691 = vmatprep.subr.bf16.mxu1 %v4057_v0 }
  0xeb   :  { %3697 = vmatprep.subr.bf16.mxu0 %v4057_v0 }
  0xed   :  { %3692 = vmatpush3.bf16.msra.mxu1 %v4037_v46 }
  0xee   :  { %3705 = vmatprep.subr.bf16.mxu1 %v4057_v0 }
 0x1b3   :  { %v231_v47 = vpop.f32.mrb[0].mxu1 }
 0x1b4   :  { %v3663_v48 = vpop.f32.mrb[1].mxu1 }
 0x1b5   :  { %v234_v49 = vpop.f32.mrb[2].mxu1 }
 0x1b6   :  { %v3664_v50 = vpop.f32.mrb[3].mxu1 }
 0x1b7   :  { %v287_v51 = vpop.f32.mrb[4].mxu0 }
 0x1b8   :  { %v288_v52 = vadd.f32 %v287_v51, %v231_v47  ;;  %v3671_v53 = vpop.f32.mrb[5].mxu0 }
 0x1b9   :  { %v290_v54 = vpop.f32.mrb[6].mxu0 }
 0x1ba   :  { %v291_v55 = vadd.f32 %v290_v54, %v234_v49  ;;  %v3672_v56 = vpop.f32.mrb[7].mxu0 }
 0x1bb   :  { %v344_v58 = vpop.f32.mrb[4].mxu1 }
 0x1bc   :  { %v351_v59 = vadd.f32 %v344_v58, %v288_v52  ;;  %v3679_v60 = vpop.f32.mrb[5].mxu1 }
 0x1bd   :  { %v347_v61 = vpop.f32.mrb[6].mxu1 }
 0x1be   :  { %v359_v62 = vadd.f32 %v3381_v57, %v351_v59  ;;  %v352_v63 = vadd.f32 %v347_v61, %v291_v55  ;;  %v3680_v1 = vpop.f32.mrb[7].mxu1  ;;  %v4043_v61 = vld [vmem:[%s4951_s5 + $0x20] sm:$0xff]  }
 0x1c0   :  { %v361_v2 = vadd.f32 %v359_v62, %v4182_v17  ;;  %v360_v3 = vadd.f32 %v3381_v57, %v352_v63 }
 0x1c2   :  { %vm363_vm10 = vcmp.ge.f32.partialorder %v361_v2, 0.0  ;;  %v365_v4 = vmul.f32 0.2, %v361_v2  ;;  %v362_v5 = vadd.f32 %v360_v3, %v4184_v20 }
 0x1c4   :  { %v367_v6 = vsel %vm363_vm10, %v361_v2, %v365_v4  ;;  %vm364_vm11 = vcmp.ge.f32.partialorder %v362_v5, 0.0  ;;  %v366_v7 = vmul.f32 0.2, %v362_v5 }
 0x1c5   :  { %v386_v8 = vrot.slane %v367_v6, 7  ;;  %v392_v12 = vrot.slane %v367_v6, 1 }
 0x1c6   :  { %v368_v9 = vsel %vm364_vm11, %v362_v5, %v366_v7 }
 0x1c7   :  { %v387_v13 = vrot.slane %v368_v9, 7  ;;  %v393_v14 = vrot.slane %v368_v9, 1  ;;  %v399_v15 = vpack.c.bf16 %v368_v9, %v367_v6 }
 0x1c9   :  { %3686 = vmatmul.mubr.msk.bf16.vlgmr.msra.gmra.mrb[8].mxu0 %vm193_vm5, %v399_v15  ;;  %v388_v16 = vsel %vm159_vm3, %v386_v8, %v387_v13  ;;  %v389_v17 = vsel %vm159_vm3, %v387_v13, %v386_v8  ;;  %v394_v18 = vsel %vm170_vm4, %v392_v12, %v393_v14  ;;  %v395_v19 = vsel %vm170_vm4, %v393_v14, %v392_v12 }
 0x1ca   :  { %3698 = vmatpush3.bf16.msra.mxu0 %v4036_v10  ;;  %v390_v20 = vsel %vm4192_vm6, 0.0, %v389_v17  ;;  %v391_v21 = vsel %vm4196_vm7, 0.0, %v388_v16  ;;  %3701 = vmatprep.mubr.msk.bf16.mxu0 %vm4058_vm1, %v4057_v0  ;;  %v396_v26 = vsel %vm4205_vm8, 0.0, %v394_v18  ;;  %v397_v27 = vsel %vm4209_vm9, 0.0, %v395_v19  ;;  %v4045_v10 = vld [vmem:[%s4951_s5 + $0x28] sm:$0xff]   ;;  %v4048_v18 = vld [vmem:[%s4952_s7] sm:$0xff]  }
 0x1cb   :  { %3699 = vmatprep.subr.bf16.mxu0 %v4057_v0  ;;  %v398_v23 = vpack.c.bf16 %v391_v21, %v390_v20  ;;  %v512_v28 = vpack.c.bf16 %v397_v27, %v396_v26  ;;  %v4046_v16 = vld [vmem:[%s4951_s5 + $0x8] sm:$0xff]  }
 0x1cc   :  { %v4363_v17 = vld [vmem:[%s4952_s7 + $0x8] sm:$0xff]  }
 0x1cd   :  { %3694 = vmatmul.mubr.msk.bf16.vlgmr.msra.gmra.mrb[8].mxu1 %vm193_vm5, %v398_v23  ;;  %v3423_v23 = vld [vmem:[%s4953_s6] ss:$0 sm:$0xff] }
 0x1ce   :  { %3700 = vmatpush3.bf16.msra.mxu0 %v4038_v22  ;;  %3709 = vmatprep.mubr.msk.bf16.mxu1 %vm4058_vm1, %v4057_v0 }
 0x1cf   :  { %3713 = vmatprep.subr.bf16.mxu0 %v4057_v0  ;;  %3706 = vmatpush3.bf16.msra.mxu1 %v4040_v32 }
 0x1d0   :  { %3707 = vmatprep.subr.bf16.mxu1 %v4057_v0 }
 0x1d1   :  { %3702 = vmatmul.mubr.msk.bf16.vlgmr.msra.gmra.mrb[12].mxu0 %vm193_vm5, %v512_v28 }
 0x1d2   :  { %3717 = vmatprep.mubr.msk.bf16.mxu0 %vm4058_vm1, %v4057_v0  ;;  %3714 = vmatpush3.bf16.msra.mxu0 %v4039_v29 }
 0x1d3   :  { %3715 = vmatprep.subr.bf16.mxu0 %v4057_v0  ;;  %3708 = vmatpush3.bf16.msra.mxu1 %v4042_v34 }
 0x1d4   :  { %3721 = vmatprep.subr.bf16.mxu1 %v4057_v0 }
 0x1d6   :  { %3716 = vmatpush3.bf16.msra.mxu0 %v4041_v33 }
 0x1d7   :  { %3729 = vmatprep.subr.bf16.mxu0 %v4057_v0 }
 0x29c   :  { %v449_v35 = vpop.f32.mrb[8].mxu0 }
 0x29d   :  { %v3687_v36 = vpop.f32.mrb[9].mxu0 }
 0x29e   :  { %v452_v37 = vpop.f32.mrb[10].mxu0 }
 0x29f   :  { %v3688_v38 = vpop.f32.mrb[11].mxu0 }
 0x2a0   :  { %v505_v39 = vpop.f32.mrb[8].mxu1 }
 0x2a1   :  { %v506_v40 = vadd.f32 %v505_v39, %v449_v35  ;;  %v3695_v41 = vpop.f32.mrb[9].mxu1 }
 0x2a2   :  { %v508_v42 = vpop.f32.mrb[10].mxu1 }
 0x2a3   :  { %v509_v43 = vadd.f32 %v508_v42, %v452_v37  ;;  %v3696_v44 = vpop.f32.mrb[11].mxu1 }
 0x2a4   :  { %v562_v46 = vpop.f32.mrb[12].mxu0 }
 0x2a5   :  { %v569_v47 = vadd.f32 %v562_v46, %v506_v40  ;;  %v3703_v48 = vpop.f32.mrb[13].mxu0 }
 0x2a6   :  { %v565_v49 = vpop.f32.mrb[14].mxu0 }
 0x2a7   :  { %v577_v50 = vadd.f32 %v3404_v45, %v569_v47  ;;  %v570_v51 = vadd.f32 %v565_v49, %v509_v43  ;;  %v3704_v52 = vpop.f32.mrb[15].mxu0  ;;  %v4049_v47 = vld [vmem:[%s4952_s7 + $0x10] sm:$0xff]  }
 0x2a9   :  { %v579_v53 = vadd.f32 %v577_v50, %v367_v6  ;;  %v578_v54 = vadd.f32 %v3404_v45, %v570_v51 }
 0x2ab   :  { %vm581_vm12 = vcmp.ge.f32.partialorder %v579_v53, 0.0  ;;  %v583_v55 = vmul.f32 0.2, %v579_v53  ;;  %v580_v56 = vadd.f32 %v578_v54, %v368_v9  ;;  %v4044_v9 = vld [vmem:[%s4951_s5] sm:$0xff]  }
 0x2ad   :  { %v585_v57 = vsel %vm581_vm12, %v579_v53, %v583_v55  ;;  %vm582_vm13 = vcmp.ge.f32.partialorder %v580_v56, 0.0  ;;  %v584_v58 = vmul.f32 0.2, %v580_v56 }
 0x2ae   :  { %v607_v59 = vrot.slane %v585_v57, 7  ;;  %v613_v62 = vrot.slane %v585_v57, 1 }
 0x2af   :  { %v586_v60 = vsel %vm582_vm13, %v580_v56, %v584_v58 }
 0x2b0   :  { %v608_v63 = vrot.slane %v586_v60, 7  ;;  %v614_v1 = vrot.slane %v586_v60, 1  ;;  %v619_v2 = vpack.c.bf16 %v586_v60, %v585_v57 }
 0x2b2   :  { %3718 = vmatmul.mubr.msk.bf16.vlgmr.msra.gmra.mrb[16].mxu0 %vm193_vm5, %v619_v2  ;;  %v609_v3 = vsel %vm159_vm3, %v607_v59, %v608_v63  ;;  %v610_v4 = vsel %vm159_vm3, %v608_v63, %v607_v59  ;;  %v615_v5 = vsel %vm170_vm4, %v613_v62, %v614_v1  ;;  %v616_v6 = vsel %vm170_vm4, %v614_v1, %v613_v62 }
 0x2b3   :  { %3730 = vmatpush3.bf16.msra.mxu0 %v4043_v61  ;;  %v611_v7 = vsel %vm4192_vm6, 0.0, %v610_v4  ;;  %v612_v8 = vsel %vm4196_vm7, 0.0, %v609_v3  ;;  %3733 = vmatprep.mubr.msk.bf16.mxu0 %vm4058_vm1, %v4057_v0  ;;  %v617_v12 = vsel %vm4205_vm8, 0.0, %v615_v5  ;;  %v618_v13 = vsel %vm4209_vm9, 0.0, %v616_v6 }
 0x2b4   :  { %v620_v14 = vpack.c.bf16 %v612_v8, %v611_v7  ;;  %3731 = vmatprep.subr.bf16.mxu0 %v4057_v0  ;;  %v747_v15 = vpack.c.bf16 %v618_v13, %v617_v12  ;;  %v4442_v12 = vld [vmem:[%s4952_s7 + $0x18] sm:$0xff]  }
 0x2b6   :  { %3710 = vmatmul.mubr.msk.bf16.vlgmr.msra.gmra.mrb[12].mxu1 %vm193_vm5, %v620_v14 }
 0x2b7   :  { %3722 = vmatpush3.bf16.msra.mxu1 %v4044_v9  ;;  %3732 = vmatpush3.bf16.msra.mxu0 %v4045_v10  ;;  %v4435_v10 = vld [vmem:[%s4952_s7 + $0x20] sm:$0xff]  }
 0x2b8   :  { %3723 = vmatprep.subr.bf16.mxu1 %v4057_v0  ;;  %3725 = vmatprep.mubr.msk.bf16.mxu1 %vm4058_vm1, %v4057_v0 }
 0x2b9   :  { %3743 = vmatprep.subr.bf16.mxu0 %v4057_v0 }
 0x2ba   :  { %3734 = vmatmul.mubr.msk.bf16.vlgmr.msra.gmra.mrb[20].mxu0 %vm193_vm5, %v619_v2 }
 0x2bb   :  { %3724 = vmatpush3.bf16.msra.mxu1 %v4046_v16  ;;  %3745 = vmatprep.mubr.msk.bf16.mxu0 %vm4058_vm1, %v4057_v0 }
 0x2bc   :  { %3737 = vmatprep.subr.bf16.mxu1 %v4057_v0  ;;  %3744 = vmatpush3.bf16.msra.mxu0 %v4048_v18 }
 0x2bd   :  { %3755 = vmatprep.subr.bf16.mxu0 %v4057_v0 }
 0x2be   :  { %3726 = vmatmul.mubr.msk.bf16.vlgmr.msra.gmra.mrb[16].mxu1 %vm193_vm5, %v747_v15  ;;  %vm888_vm5 = vcmask 130048  }
 0x2bf   :  { %3739 = vmatprep.mubr.msk.bf16.mxu1 %vm4058_vm1, %v4057_v0  ;;  %3738 = vmatpush3.bf16.msra.mxu1 %v4363_v17 }
 0x2c0   :  { %3749 = vmatprep.subr.bf16.mxu1 %v4057_v0 }
 0x385   :  { %v726_v19 = vpop.f32.mrb[16].mxu0 }
 0x386   :  { %v3719_v20 = vpop.f32.mrb[17].mxu0 }
 0x387   :  { %v729_v21 = vpop.f32.mrb[18].mxu0 }
 0x388   :  { %v3720_v22 = vpop.f32.mrb[19].mxu0 }
 0x389   :  { %v670_v26 = vpop.f32.mrb[12].mxu1 }
 0x38a   :  { %v727_v27 = vadd.f32 %v726_v19, %v670_v26  ;;  %v3711_v28 = vpop.f32.mrb[13].mxu1  ;;  %v3440_v26 = vld [vmem:[%s4954_s8] ss:$0 sm:$0xff] }
 0x38b   :  { %v673_v29 = vpop.f32.mrb[14].mxu1 }
 0x38c   :  { %v739_v32 = vadd.f32 %v3423_v23, %v727_v27  ;;  %v730_v33 = vadd.f32 %v729_v21, %v673_v29  ;;  %v3712_v34 = vpop.f32.mrb[15].mxu1 }
 0x38d   :  { %v850_v35 = vpop.f32.mrb[20].mxu0 }
 0x38e   :  { %v743_v36 = vmul.f32 0.2, %v739_v32  ;;  %v740_v37 = vadd.f32 %v3423_v23, %v730_v33  ;;  %v3735_v38 = vpop.f32.mrb[21].mxu0  ;;  %vm741_vm14 = vcmp.ge.f32.partialorder %v739_v32, 0.0 }
 0x38f   :  { %v853_v39 = vpop.f32.mrb[22].mxu0 }
 0x390   :  { %vm742_vm15 = vcmp.ge.f32.partialorder %v740_v37, 0.0  ;;  %v744_v40 = vmul.f32 0.2, %v740_v37  ;;  %v3736_v41 = vpop.f32.mrb[23].mxu0  ;;  %v4374_v43 = vsel %vm741_vm14, %v739_v32, %v743_v36 }
 0x391   :  { %v797_v42 = vpop.f32.mrb[16].mxu1  ;;  %v1052_v4 = vrot.slane %v4374_v43, 1 }
 0x392   :  { %v4376_v44 = vsel %vm742_vm15, %v740_v37, %v744_v40  ;;  %v851_v45 = vadd.f32 %v850_v35, %v797_v42  ;;  %v3727_v46 = vpop.f32.mrb[17].mxu1 }
 0x393   :  { %v881_v48 = vpack.c.bf16 %v4376_v44, %v4374_v43  ;;  %v800_v49 = vpop.f32.mrb[18].mxu1  ;;  %v1053_v3 = vrot.slane %v4376_v44, 1 }
 0x394   :  { %v857_v50 = vadd.f32 %v3423_v23, %v851_v45  ;;  %v854_v51 = vadd.f32 %v853_v39, %v800_v49  ;;  %v3728_v52 = vpop.f32.mrb[19].mxu1 }
 0x395   :  { %3740 = vmatmul.mubr.msk.bf16.vlgmr.msra.gmra.mrb[20].mxu1 %vm888_vm5, %v881_v48  ;;  %v1054_v5 = vsel %vm170_vm4, %v1052_v4, %v1053_v3  ;;  %v1055_v6 = vsel %vm170_vm4, %v1053_v3, %v1052_v4 }
 0x396   :  { %vm859_vm10 = vcmp.ge.f32.partialorder %v857_v50, 0.0  ;;  %v861_v53 = vmul.f32 0.2, %v857_v50  ;;  %v858_v54 = vadd.f32 %v3423_v23, %v854_v51  ;;  %3750 = vmatpush3.bf16.msra.mxu1 %v4049_v47  ;;  %3751 = vmatprep.mubr.msk.bf16.mxu1 %vm4058_vm1, %v4057_v0  ;;  %v1056_v7 = vsel %vm4205_vm8, 0.0, %v1054_v5 }
 0x397   :  { %3761 = vmatprep.subr.bf16.mxu1 %v4057_v0  ;;  %v1057_v8 = vsel %vm4209_vm9, 0.0, %v1055_v6 }
 0x398   :  { %v4387_v55 = vsel %vm859_vm10, %v857_v50, %v861_v53  ;;  %vm860_vm11 = vcmp.ge.f32.partialorder %v858_v54, 0.0  ;;  %v862_v56 = vmul.f32 0.2, %v858_v54  ;;  %v1140_v9 = vpack.c.bf16 %v1057_v8, %v1056_v7 }
 0x399   :  { %v874_v58 = vrot.slane %v4387_v55, 7 }
 0x39a   :  { %v4389_v57 = vsel %vm860_vm11, %v858_v54, %v862_v56 }
 0x39b   :  { %v875_v59 = vrot.slane %v4389_v57, 7  ;;  %v983_v60 = vpack.c.bf16 %v4389_v57, %v4387_v55 }
 0x39d   :  { %v876_v61 = vsel %vm159_vm3, %v874_v58, %v875_v59  ;;  %v877_v62 = vsel %vm159_vm3, %v875_v59, %v874_v58  ;;  %3752 = vmatmul.mubr.msk.bf16.vlgmr.msra.gmra.mrb[24].mxu1 %vm888_vm5, %v983_v60 }
 0x39e   :  { %v878_v63 = vsel %vm4192_vm6, 0.0, %v877_v62  ;;  %v879_v1 = vsel %vm4196_vm7, 0.0, %v876_v61  ;;  %3762 = vmatpush3.bf16.msra.mxu1 %v4048_v18  ;;  %3763 = vmatprep.mubr.msk.bf16.mxu1 %vm4058_vm1, %v4057_v0 }
 0x39f   :  { %v880_v2 = vpack.c.bf16 %v879_v1, %v878_v63  ;;  %3773 = vmatprep.subr.bf16.mxu1 %v4057_v0 }
 0x3a1   :  { %3746 = vmatmul.mubr.msk.bf16.vlgmr.msra.gmra.mrb[24].mxu0 %vm888_vm5, %v880_v2 }
 0x3a2   :  { %3756 = vmatpush3.bf16.msra.mxu0 %v4363_v17  ;;  %3757 = vmatprep.mubr.msk.bf16.mxu0 %vm4058_vm1, %v4057_v0 }
 0x3a3   :  { %3767 = vmatprep.subr.bf16.mxu0 %v4057_v0 }
 0x3a5   :  { %3764 = vmatmul.mubr.msk.bf16.vlgmr.msra.gmra.mrb[28].mxu1 %vm888_vm5, %v881_v48 }
 0x3a6   :  { %3775 = vmatprep.mubr.msk.bf16.mxu1 %vm4058_vm1, %v4057_v0  ;;  %3774 = vmatpush3.bf16.msra.mxu1 %v4435_v10 }
 0x3a7   :  { %3785 = vmatprep.subr.bf16.mxu1 %v4057_v0 }
 0x3a9   :  { %3758 = vmatmul.mubr.msk.bf16.vlgmr.msra.gmra.mrb[28].mxu0 %vm888_vm5, %v983_v60 }
 0x3aa   :  { %3768 = vmatpush3.bf16.msra.mxu0 %v4049_v47  ;;  %3769 = vmatprep.mubr.msk.bf16.mxu0 %vm4058_vm1, %v4057_v0 }
 0x3ab   :  { %3779 = vmatprep.subr.bf16.mxu0 %v4057_v0 }
 0x3b1   :  { %3770 = vmatmul.mubr.msk.bf16.vlgmr.msra.gmra.mrb[32].mxu0 %vm888_vm5, %v1140_v9 }
 0x3b2   :  { %3781 = vmatprep.mubr.msk.bf16.mxu0 %vm4058_vm1, %v4057_v0  ;;  %3780 = vmatpush3.bf16.msra.mxu0 %v4442_v12 }
 0x3b3   :  { %3791 = vmatprep.subr.bf16.mxu0 %v4057_v0 }
 0x468   :  { %v926_v13 = vpop.f32.mrb[20].mxu1 }
 0x469   :  { %v3741_v14 = vpop.f32.mrb[21].mxu1 }
 0x46a   :  { %v929_v15 = vpop.f32.mrb[22].mxu1 }
 0x46b   :  { %v3742_v16 = vpop.f32.mrb[23].mxu1 }
 0x470   :  { %v1027_v17 = vpop.f32.mrb[24].mxu1 }
 0x471   :  { %v3753_v18 = vpop.f32.mrb[25].mxu1 }
 0x472   :  { %v1030_v19 = vpop.f32.mrb[26].mxu1 }
 0x473   :  { %v3754_v20 = vpop.f32.mrb[27].mxu1 }
 0x474   :  { %v976_v21 = vpop.f32.mrb[24].mxu0 }
 0x475   :  { %v977_v22 = vadd.f32 %v976_v21, %v926_v13  ;;  %v3747_v23 = vpop.f32.mrb[25].mxu0  ;;  %v4515_v21 = vld [vmem:[%s4955_s9 + $0x8] sm:$0xff]  }
 0x476   :  { %v979_v27 = vpop.f32.mrb[26].mxu0 }
 0x477   :  { %v1034_v28 = vadd.f32 %v1027_v17, %v977_v22  ;;  %v980_v29 = vadd.f32 %v979_v27, %v929_v15  ;;  %v3748_v32 = vpop.f32.mrb[27].mxu0  ;;  %v4522_v22 = vld [vmem:[%s4955_s9 + $0x18] sm:$0xff]  }
 0x478   :  { %v1133_v33 = vpop.f32.mrb[28].mxu1 }
 0x479   :  { %v1042_v34 = vadd.f32 %v3440_v26, %v1034_v28  ;;  %v1035_v35 = vadd.f32 %v1030_v19, %v980_v29  ;;  %v3765_v36 = vpop.f32.mrb[29].mxu1 }
 0x47a   :  { %v1136_v37 = vpop.f32.mrb[30].mxu1 }
 0x47b   :  { %v1044_v38 = vadd.f32 %v1042_v34, %v4374_v43  ;;  %v1043_v39 = vadd.f32 %v3440_v26, %v1035_v35  ;;  %v3766_v40 = vpop.f32.mrb[31].mxu1  ;;  %v4052_v43 = vld [vmem:[%s4952_s7 + $0x28] sm:$0xff]  }
 0x47c   :  { %v1092_v41 = vpop.f32.mrb[28].mxu0 }
 0x47d   :  { %v1048_v42 = vmul.f32 0.2, %v1044_v38  ;;  %v1045_v45 = vadd.f32 %v1043_v39, %v4376_v44  ;;  %v1134_v46 = vadd.f32 %v1133_v33, %v1092_v41  ;;  %v3759_v47 = vpop.f32.mrb[29].mxu0  ;;  %vm1046_vm12 = vcmp.ge.f32.partialorder %v1044_v38, 0.0 }
 0x47e   :  { %v1095_v48 = vpop.f32.mrb[30].mxu0 }
 0x47f   :  { %vm1047_vm13 = vcmp.ge.f32.partialorder %v1045_v45, 0.0  ;;  %v1049_v49 = vmul.f32 0.2, %v1045_v45  ;;  %v1137_v50 = vadd.f32 %v1136_v37, %v1095_v48  ;;  %v3760_v51 = vpop.f32.mrb[31].mxu0  ;;  %v4451_v52 = vsel %vm1046_vm12, %v1044_v38, %v1048_v42  ;;  %v3457_v38 = vld [vmem:[%s4954_s8 + $0x1] ss:$0 sm:$0xff] }
 0x481   :  { %v4453_v53 = vsel %vm1047_vm13, %v1045_v45, %v1049_v49 }
 0x482   :  { %v1215_v54 = vpack.c.bf16 %v4453_v53, %v4451_v52  ;;  %v1386_v16 = vrot.slane %v4453_v53, 1 }
 0x484   :  { %v1178_v44 = vpop.f32.mrb[32].mxu0  ;;  %3776 = vmatmul.mubr.msk.bf16.vlgmr.msra.gmra.mrb[32].mxu1 %vm888_vm5, %v1215_v54 }
 0x485   :  { %v1185_v56 = vadd.f32 %v1178_v44, %v1134_v46  ;;  %v3771_v58 = vpop.f32.mrb[33].mxu0  ;;  %3786 = vmatpush3.bf16.msra.mxu1 %v4052_v43  ;;  %3787 = vmatprep.mubr.msk.bf16.mxu1 %vm4058_vm1, %v4057_v0 }
 0x486   :  { %v1181_v59 = vpop.f32.mrb[34].mxu0  ;;  %3797 = vmatprep.subr.bf16.mxu1 %v4057_v0 }
 0x487   :  { %v1187_v60 = vadd.f32 %v3440_v26, %v1185_v56  ;;  %v1186_v61 = vadd.f32 %v1181_v59, %v1137_v50  ;;  %v3772_v62 = vpop.f32.mrb[35].mxu0 }
 0x489   :  { %v1189_v63 = vadd.f32 %v1187_v60, %v4387_v55  ;;  %v1188_v1 = vadd.f32 %v3440_v26, %v1186_v61 }
 0x48b   :  { %vm1191_vm14 = vcmp.ge.f32.partialorder %v1189_v63, 0.0  ;;  %v1193_v2 = vmul.f32 0.2, %v1189_v63  ;;  %v1190_v3 = vadd.f32 %v1188_v1, %v4389_v57 }
 0x48d   :  { %v4466_v4 = vsel %vm1191_vm14, %v1189_v63, %v1193_v2  ;;  %vm1192_vm15 = vcmp.ge.f32.partialorder %v1190_v3, 0.0  ;;  %v1194_v5 = vmul.f32 0.2, %v1190_v3 }
 0x48e   :  { %v1208_v7 = vrot.slane %v4466_v4, 7 }
 0x48f   :  { %v4468_v6 = vsel %vm1192_vm15, %v1190_v3, %v1194_v5 }
 0x490   :  { %v1209_v8 = vrot.slane %v4468_v6, 7  ;;  %v1316_v9 = vpack.c.bf16 %v4468_v6, %v4466_v4 }
 0x492   :  { %3788 = vmatmul.mubr.msk.bf16.vlgmr.msra.gmra.mrb[36].mxu1 %vm888_vm5, %v1316_v9  ;;  %v1210_v55 = vsel %vm159_vm3, %v1208_v7, %v1209_v8  ;;  %v1211_v57 = vsel %vm159_vm3, %v1209_v8, %v1208_v7 }
 0x493   :  { %v1212_v13 = vsel %vm4192_vm6, 0.0, %v1211_v57  ;;  %v1213_v14 = vsel %vm4196_vm7, 0.0, %v1210_v55  ;;  %3798 = vmatpush3.bf16.msra.mxu1 %v4442_v12  ;;  %3799 = vmatprep.mubr.msk.bf16.mxu1 %vm4058_vm1, %v4057_v0  ;;  %v1385_v12 = vrot.slane %v4451_v52, 1 }
 0x494   :  { %v1214_v15 = vpack.c.bf16 %v1213_v14, %v1212_v13  ;;  %3809 = vmatprep.subr.bf16.mxu1 %v4057_v0 }
 0x495   :  { %v1387_v17 = vsel %vm170_vm4, %v1385_v12, %v1386_v16 }
 0x496   :  { %3782 = vmatmul.mubr.msk.bf16.vlgmr.msra.gmra.mrb[36].mxu0 %vm888_vm5, %v1214_v15  ;;  %v1389_v18 = vsel %vm4205_vm8, 0.0, %v1387_v17 }
 0x497   :  { %3792 = vmatpush3.bf16.msra.mxu0 %v4435_v10  ;;  %3793 = vmatprep.mubr.msk.bf16.mxu0 %vm4058_vm1, %v4057_v0  ;;  %v1388_v10 = vsel %vm170_vm4, %v1386_v16, %v1385_v12 }
 0x498   :  { %3803 = vmatprep.subr.bf16.mxu0 %v4057_v0  ;;  %v1390_v19 = vsel %vm4209_vm9, 0.0, %v1388_v10 }
 0x499   :  { %v1473_v20 = vpack.c.bf16 %v1390_v19, %v1389_v18 }
 0x49a   :  { %3800 = vmatmul.mubr.msk.bf16.vlgmr.msra.gmra.mrb[40].mxu1 %vm888_vm5, %v1215_v54 }
 0x49b   :  { %3811 = vmatprep.mubr.msk.bf16.mxu1 %vm4058_vm1, %v4057_v0  ;;  %3810 = vmatpush3.bf16.msra.mxu1 %v4522_v22 }
 0x49c   :  { %3821 = vmatprep.subr.bf16.mxu1 %v4057_v0 }
 0x49e   :  { %3794 = vmatmul.mubr.msk.bf16.vlgmr.msra.gmra.mrb[40].mxu0 %vm888_vm5, %v1316_v9 }
 0x49f   :  { %3804 = vmatpush3.bf16.msra.mxu0 %v4052_v43  ;;  %3805 = vmatprep.mubr.msk.bf16.mxu0 %vm4058_vm1, %v4057_v0 }
 0x4a0   :  { %3815 = vmatprep.subr.bf16.mxu0 %v4057_v0 }
 0x4a6   :  { %3806 = vmatmul.mubr.msk.bf16.vlgmr.msra.gmra.mrb[44].mxu0 %vm888_vm5, %v1473_v20 }
 0x4a7   :  { %3817 = vmatprep.mubr.msk.bf16.mxu0 %vm4058_vm1, %v4057_v0  ;;  %3816 = vmatpush3.bf16.msra.mxu0 %v4515_v21 }
 0x4a8   :  { %3827 = vmatprep.subr.bf16.mxu0 %v4057_v0 }
 0x557   :  { %v1259_v23 = vpop.f32.mrb[32].mxu1 }
 0x558   :  { %v3777_v26 = vpop.f32.mrb[33].mxu1 }
 0x559   :  { %v1262_v27 = vpop.f32.mrb[34].mxu1 }
 0x55a   :  { %v3778_v28 = vpop.f32.mrb[35].mxu1 }
 0x565   :  { %v1360_v29 = vpop.f32.mrb[36].mxu1 }
 0x566   :  { %v3789_v32 = vpop.f32.mrb[37].mxu1 }
 0x567   :  { %v1363_v33 = vpop.f32.mrb[38].mxu1 }
 0x568   :  { %v3790_v34 = vpop.f32.mrb[39].mxu1 }
 0x569   :  { %v1309_v35 = vpop.f32.mrb[36].mxu0 }
 0x56a   :  { %v1310_v36 = vadd.f32 %v1309_v35, %v1259_v23  ;;  %v3783_v37 = vpop.f32.mrb[37].mxu0  ;;  %v4056_v35 = vld [vmem:[%s4955_s9] sm:$0xff]  }
 0x56b   :  { %v1312_v39 = vpop.f32.mrb[38].mxu0 }
 0x56c   :  { %v1367_v40 = vadd.f32 %v1360_v29, %v1310_v36  ;;  %v1313_v41 = vadd.f32 %v1312_v39, %v1262_v27  ;;  %v3784_v42 = vpop.f32.mrb[39].mxu0 }
 0x56d   :  { %v1466_v45 = vpop.f32.mrb[40].mxu1 }
 0x56e   :  { %v1375_v46 = vadd.f32 %v3457_v38, %v1367_v40  ;;  %v1368_v47 = vadd.f32 %v1363_v33, %v1313_v41  ;;  %v3801_v48 = vpop.f32.mrb[41].mxu1 }
 0x56f   :  { %v1469_v49 = vpop.f32.mrb[42].mxu1 }
 0x570   :  { %v1377_v50 = vadd.f32 %v1375_v46, %v4451_v52  ;;  %v1376_v51 = vadd.f32 %v3457_v38, %v1368_v47  ;;  %v3802_v43 = vpop.f32.mrb[43].mxu1  ;;  %v4054_v52 = vld [vmem:[%s4955_s9 + $0x10] sm:$0xff]  }
 0x571   :  { %v1425_v54 = vpop.f32.mrb[40].mxu0  ;;  %v4606_v43 = vld [vmem:[%s4957_s10] ss:$0 sm:$0xff] }
 0x572   :  { %vm1379_vm10 = vcmp.ge.f32.partialorder %v1377_v50, 0.0  ;;  %v1381_v44 = vmul.f32 0.2, %v1377_v50  ;;  %v1378_v56 = vadd.f32 %v1376_v51, %v4453_v53  ;;  %v1467_v58 = vadd.f32 %v1466_v45, %v1425_v54  ;;  %v3795_v59 = vpop.f32.mrb[41].mxu0 }
 0x573   :  { %v1428_v60 = vpop.f32.mrb[42].mxu0 }
 0x574   :  { %v1383_v61 = vsel %vm1379_vm10, %v1377_v50, %v1381_v44  ;;  %vm1380_vm11 = vcmp.ge.f32.partialorder %v1378_v56, 0.0  ;;  %v1382_v62 = vmul.f32 0.2, %v1378_v56  ;;  %v1470_v63 = vadd.f32 %v1469_v49, %v1428_v60  ;;  %v3796_v1 = vpop.f32.mrb[43].mxu0 }
 0x575   :  { %v1770_v3 = vrot.slane %v1383_v61, 1 }
 0x576   :  { %v1384_v2 = vsel %vm1380_vm11, %v1378_v56, %v1382_v62 }
 0x577   :  { %v1771_v5 = vrot.slane %v1384_v2, 1  ;;  %v1548_v7 = vpack.c.bf16 %v1384_v2, %v1383_v61 }
 0x579   :  { %v1511_v8 = vpop.f32.mrb[44].mxu0  ;;  %3818 = vmatmul.mubr.msk.bf16.vlgmr.msra.gmra.mrb[48].mxu0 %vm888_vm5, %v1548_v7  ;;  %v1772_v53 = vsel %vm170_vm4, %v1770_v3, %v1771_v5  ;;  %v1773_v9 = vsel %vm170_vm4, %v1771_v5, %v1770_v3 }
 0x57a   :  { %v1518_v55 = vadd.f32 %v1511_v8, %v1467_v58  ;;  %v3807_v57 = vpop.f32.mrb[45].mxu0  ;;  %3828 = vmatpush3.bf16.msra.mxu0 %v4054_v52  ;;  %3829 = vmatprep.mubr.msk.bf16.mxu0 %vm4058_vm1, %v4057_v0  ;;  %v1774_v13 = vsel %vm4205_vm8, 0.0, %v1772_v53  ;;  %v1775_v14 = vsel %vm4209_vm9, 0.0, %v1773_v9 }
 0x57b   :  { %v1514_v15 = vpop.f32.mrb[46].mxu0  ;;  %3839 = vmatprep.subr.bf16.mxu0 %v4057_v0  ;;  %v1866_v16 = vpack.c.bf16 %v1775_v14, %v1774_v13 }
 0x57c   :  { %v1520_v12 = vadd.f32 %v3457_v38, %v1518_v55  ;;  %v1519_v17 = vadd.f32 %v1514_v15, %v1470_v63  ;;  %v3808_v10 = vpop.f32.mrb[47].mxu0 }
 0x57e   :  { %v1522_v18 = vadd.f32 %v1520_v12, %v4466_v4  ;;  %v1521_v19 = vadd.f32 %v3457_v38, %v1519_v17  ;;  %v1960_v38 = vld [vmem:[%s4956_s11] sm:$0xf] }
 0x57f   :  { %v4599_v39 = vsel %vm97_vm0, %v1960_v38, 0 }
 0x580   :  { %vm1524_vm12 = vcmp.ge.f32.partialorder %v1522_v18, 0.0  ;;  %v1526_v20 = vmul.f32 0.2, %v1522_v18  ;;  %v1523_v23 = vadd.f32 %v1521_v19, %v4468_v6 }
 0x581   :  { %3830 = vmatmul.mubr.msk.bf16.vlgmr.msra.gmra.mrb[52].mxu0 %vm888_vm5, %v1548_v7 }
 0x582   :  { %v1528_v26 = vsel %vm1524_vm12, %v1522_v18, %v1526_v20  ;;  %vm1525_vm13 = vcmp.ge.f32.partialorder %v1523_v23, 0.0  ;;  %v1527_v27 = vmul.f32 0.2, %v1523_v23  ;;  %3840 = vmatpush3.bf16.msra.mxu0 %v4515_v21  ;;  %3841 = vmatprep.mubr.msk.bf16.mxu0 %vm4058_vm1, %v4057_v0 }
 0x583   :  { %3851 = vmatprep.subr.bf16.mxu0 %v4057_v0  ;;  %v1542_v29 = vrot.slane %v1528_v26, 7 }
 0x584   :  { %v1529_v28 = vsel %vm1525_vm13, %v1523_v23, %v1527_v27 }
 0x585   :  { %v1543_v4 = vrot.slane %v1529_v28, 7  ;;  %v1664_v32 = vpack.c.bf16 %v1529_v28, %v1528_v26 }
 0x587   :  { %v1544_v33 = vsel %vm159_vm3, %v1542_v29, %v1543_v4  ;;  %v1545_v6 = vsel %vm159_vm3, %v1543_v4, %v1542_v29 }
 0x588   :  { %v1546_v34 = vsel %vm4192_vm6, 0.0, %v1545_v6  ;;  %v1547_v21 = vsel %vm4196_vm7, 0.0, %v1544_v33 }
 0x589   :  { %3842 = vmatmul.mubr.msk.bf16.vlgmr.msra.gmra.mrb[56].mxu0 %vm888_vm5, %v1664_v32  ;;  %v1549_v36 = vpack.c.bf16 %v1547_v21, %v1546_v34 }
 0x58a   :  { %3852 = vmatpush3.bf16.msra.mxu0 %v4054_v52  ;;  %3853 = vmatprep.mubr.msk.bf16.mxu0 %vm4058_vm1, %v4057_v0 }
 0x58b   :  { %3812 = vmatmul.mubr.msk.bf16.vlgmr.msra.gmra.mrb[44].mxu1 %vm888_vm5, %v1549_v36  ;;  %3863 = vmatprep.subr.bf16.mxu0 %v4057_v0 }
 0x58c   :  { %3822 = vmatpush3.bf16.msra.mxu1 %v4056_v35  ;;  %3823 = vmatprep.mubr.msk.bf16.mxu1 %vm4058_vm1, %v4057_v0 }
 0x58d   :  { %3833 = vmatprep.subr.bf16.mxu1 %v4057_v0 }
 0x591   :  { %3854 = vmatmul.mubr.msk.bf16.vlgmr.msra.gmra.mrb[60].mxu0 %vm888_vm5, %v1664_v32 }
 0x592   :  { %3865 = vmatprep.mubr.msk.bf16.mxu0 %vm4058_vm1, %v4057_v0  ;;  %3864 = vmatpush3.bf16.msra.mxu0 %v4599_v39 }
 0x593   :  { %3824 = vmatmul.mubr.msk.bf16.vlgmr.msra.gmra.mrb[48].mxu1 %vm888_vm5, %v1664_v32  ;;  %3875 = vmatprep.subr.bf16.mxu0 %v4057_v0 }
 0x594   :  { %3834 = vmatpush3.bf16.msra.mxu1 %v4522_v22  ;;  %3835 = vmatprep.mubr.msk.bf16.mxu1 %vm4058_vm1, %v4057_v0  ;;  %v3480_v22 = vld [vmem:[%s4956_s11 + $0x4] sm:$0xf] }
 0x595   :  { %3845 = vmatprep.subr.bf16.mxu1 %v4057_v0  ;;  %v4591_v37 = vsel %vm97_vm0, %v3480_v22, 0 }
 0x59b   :  { %3836 = vmatmul.mubr.msk.bf16.vlgmr.msra.gmra.mrb[52].mxu1 %vm888_vm5, %v1548_v7  ;;  %v3481_v7 = vld [vmem:[%s4956_s11 + $0x8] sm:$0xf] }
 0x59c   :  { %3846 = vmatpush3.bf16.msra.mxu1 %v4056_v35  ;;  %3847 = vmatprep.mubr.msk.bf16.mxu1 %vm4058_vm1, %v4057_v0  ;;  %v4620_v12 = vsel %vm97_vm0, %v3481_v7, 0 }
 0x59d   :  { %3857 = vmatprep.subr.bf16.mxu1 %v4057_v0 }
 0x5a3   :  { %3848 = vmatmul.mubr.msk.bf16.vlgmr.msra.gmra.mrb[56].mxu1 %vm888_vm5, %v1866_v16 }
 0x5a4   :  { %3859 = vmatprep.mubr.msk.bf16.mxu1 %vm4058_vm1, %v4057_v0  ;;  %3858 = vmatpush3.bf16.msra.mxu1 %v4591_v37 }
 0x5a5   :  { %3869 = vmatprep.subr.bf16.mxu1 %v4057_v0 }
 0x64c   :  { %v1643_v40 = vpop.f32.mrb[48].mxu0 }
 0x64d   :  { %v3819_v41 = vpop.f32.mrb[49].mxu0 }
 0x64e   :  { %v1646_v42 = vpop.f32.mrb[50].mxu0 }
 0x64f   :  { %v3820_v45 = vpop.f32.mrb[51].mxu0 }
 0x654   :  { %v1755_v46 = vpop.f32.mrb[52].mxu0 }
 0x655   :  { %v3831_v47 = vpop.f32.mrb[53].mxu0 }
 0x656   :  { %v1758_v48 = vpop.f32.mrb[54].mxu0 }
 0x657   :  { %v3832_v49 = vpop.f32.mrb[55].mxu0 }
 0x65c   :  { %v1851_v50 = vpop.f32.mrb[56].mxu0 }
 0x65d   :  { %v3843_v51 = vpop.f32.mrb[57].mxu0 }
 0x65e   :  { %v1593_v54 = vpop.f32.mrb[44].mxu1  ;;  %v1854_v44 = vpop.f32.mrb[58].mxu0 }
 0x65f   :  { %v1644_v56 = vadd.f32 %v1643_v40, %v1593_v54  ;;  %v3813_v58 = vpop.f32.mrb[45].mxu1  ;;  %v3844_v59 = vpop.f32.mrb[59].mxu0 }
 0x660   :  { %v1596_v60 = vpop.f32.mrb[46].mxu1 }
 0x661   :  { %v1656_v61 = vadd.f32 %v4606_v43, %v1644_v56  ;;  %v1647_v62 = vadd.f32 %v1646_v42, %v1596_v60  ;;  %v3814_v63 = vpop.f32.mrb[47].mxu1 }
 0x663   :  { %v1660_v1 = vmul.f32 0.2, %v1656_v61  ;;  %v1657_v2 = vadd.f32 %v4606_v43, %v1647_v62  ;;  %vm1658_vm5 = vcmp.ge.f32.partialorder %v1656_v61, 0.0 }
 0x664   :  { %v1945_v52 = vpop.f32.mrb[60].mxu0 }
 0x665   :  { %vm1659_vm14 = vcmp.ge.f32.partialorder %v1657_v2, 0.0  ;;  %v1661_v3 = vmul.f32 0.2, %v1657_v2  ;;  %v3855_v5 = vpop.f32.mrb[61].mxu0  ;;  %v4613_v9 = vsel %vm1658_vm5, %v1656_v61, %v1660_v1 }
 0x666   :  { %v1708_v8 = vpop.f32.mrb[48].mxu1  ;;  %v1948_v53 = vpop.f32.mrb[62].mxu0 }
 0x667   :  { %v4615_v55 = vsel %vm1659_vm14, %v1657_v2, %v1661_v3  ;;  %v1756_v57 = vadd.f32 %v1755_v46, %v1708_v8  ;;  %v3825_v13 = vpop.f32.mrb[49].mxu1  ;;  %v3856_v14 = vpop.f32.mrb[63].mxu0  ;;  %v2412_v3 = vrot.slane %v4613_v9, 1 }
 0x668   :  { %v1973_v15 = vpack.c.bf16 %v4615_v55, %v4613_v9  ;;  %v1711_v16 = vpop.f32.mrb[50].mxu1  ;;  %v3495_v13 = vld [vmem:[%s4956_s11 + $0xc] sm:$0xf] }
 0x669   :  { %v1762_v17 = vadd.f32 %v4606_v43, %v1756_v57  ;;  %v1759_v10 = vadd.f32 %v1758_v48, %v1711_v16  ;;  %v3826_v18 = vpop.f32.mrb[51].mxu1  ;;  %v4739_v14 = vsel %vm97_vm0, %v3495_v13, 0 }
 0x66a   :  { %3860 = vmatmul.mubr.msk.bf16.vlgmr.msra.gmra.mrb[60].mxu1 %vm93_vm2, %v1973_v15 }
 0x66b   :  { %v1766_v19 = vmul.f32 0.2, %v1762_v17  ;;  %v1763_v20 = vadd.f32 %v4606_v43, %v1759_v10  ;;  %3870 = vmatpush3.bf16.msra.mxu1 %v4620_v12  ;;  %3871 = vmatprep.mubr.msk.bf16.mxu1 %vm4058_vm1, %v4057_v0  ;;  %vm1764_vm15 = vcmp.ge.f32.partialorder %v1762_v17, 0.0 }
 0x66c   :  { %3881 = vmatprep.subr.bf16.mxu1 %v4057_v0 }
 0x66d   :  { %vm1765_vm10 = vcmp.ge.f32.partialorder %v1763_v20, 0.0  ;;  %v1767_v23 = vmul.f32 0.2, %v1763_v20  ;;  %v4629_v27 = vsel %vm1764_vm15, %v1762_v17, %v1766_v19 }
 0x66e   :  { %v1810_v26 = vpop.f32.mrb[52].mxu1 }
 0x66f   :  { %v4631_v28 = vsel %vm1765_vm10, %v1763_v20, %v1767_v23  ;;  %v1852_v29 = vadd.f32 %v1851_v50, %v1810_v26  ;;  %v3837_v4 = vpop.f32.mrb[53].mxu1 }
 0x670   :  { %v4635_v32 = vpack.c.bf16 %v4631_v28, %v4629_v27  ;;  %v1813_v33 = vpop.f32.mrb[54].mxu1 }
 0x671   :  { %v1855_v6 = vadd.f32 %v1854_v44, %v1813_v33  ;;  %v3838_v34 = vpop.f32.mrb[55].mxu1  ;;  %v1858_v36 = vadd.f32 %v4606_v43, %v1852_v29 }
 0x672   :  { %3872 = vmatmul.mubr.msk.bf16.vlgmr.msra.gmra.mrb[64].mxu1 %vm93_vm2, %v4635_v32 }
 0x673   :  { %3882 = vmatpush3.bf16.msra.mxu1 %v4599_v39  ;;  %3883 = vmatprep.mubr.msk.bf16.mxu1 %vm4058_vm1, %v4057_v0  ;;  %v1859_v21 = vadd.f32 %v4606_v43, %v1855_v6  ;;  %v1862_v47 = vmul.f32 0.2, %v1858_v36  ;;  %vm1860_vm13 = vcmp.ge.f32.partialorder %v1858_v36, 0.0 }
 0x674   :  { %3893 = vmatprep.subr.bf16.mxu1 %v4057_v0 }
 0x675   :  { %v1863_v41 = vmul.f32 0.2, %v1859_v21  ;;  %vm1861_vm11 = vcmp.ge.f32.partialorder %v1859_v21, 0.0  ;;  %v4656_v44 = vsel %vm1860_vm13, %v1858_v36, %v1862_v47 }
 0x676   :  { %v1904_v35 = vpop.f32.mrb[56].mxu1 }
 0x677   :  { %v1946_v22 = vadd.f32 %v1945_v52, %v1904_v35  ;;  %v3849_v38 = vpop.f32.mrb[57].mxu1  ;;  %v4652_v50 = vsel %vm1861_vm11, %v1859_v21, %v1863_v41  ;;  %v2413_v52 = vrot.slane %v4615_v55, 1 }
 0x678   :  { %v1907_v40 = vpop.f32.mrb[58].mxu1 }
 0x679   :  { %v1952_v42 = vadd.f32 %v4606_v43, %v1946_v22  ;;  %v1949_v45 = vadd.f32 %v1948_v53, %v1907_v40  ;;  %v3850_v46 = vpop.f32.mrb[59].mxu1  ;;  %v2415_v5 = vsel %vm170_vm4, %v2413_v52, %v2412_v3  ;;  %v3496_v53 = vld [vmem:[%s4956_s11 + $0x10] sm:$0xf]  ;;  %v4748_v22 = vld [vmem:[%s4958_s12] ss:$0 sm:$0xff] }
 0x67a   :  { %3884 = vmatmul.mubr.msk.bf16.vlgmr.msra.gmra.mrb[68].mxu1 %vm93_vm2, %v1973_v15  ;;  %v2417_v7 = vsel %vm4209_vm9, 0.0, %v2415_v5  ;;  %v4731_v57 = vsel %vm97_vm0, %v3496_v53, 0 }
 0x67b   :  { %vm1954_vm12 = vcmp.ge.f32.partialorder %v1952_v42, 0.0  ;;  %v1956_v48 = vmul.f32 0.2, %v1952_v42  ;;  %v1953_v49 = vadd.f32 %v4606_v43, %v1949_v45  ;;  %3894 = vmatpush3.bf16.msra.mxu1 %v4591_v37  ;;  %3895 = vmatprep.mubr.msk.bf16.mxu1 %vm4058_vm1, %v4057_v0  ;;  %v2216_v43 = vpack.c.bf16 %v4652_v50, %v4656_v44 }
 0x67c   :  { %3905 = vmatprep.subr.bf16.mxu1 %v4057_v0 }
 0x67d   :  { %v4654_v51 = vsel %vm1954_vm12, %v1952_v42, %v1956_v48  ;;  %vm1955_vm5 = vcmp.ge.f32.partialorder %v1953_v49, 0.0  ;;  %v1957_v54 = vmul.f32 0.2, %v1953_v49 }
 0x67e   :  { %v1966_v58 = vrot.slane %v4654_v51, 7 }
 0x67f   :  { %v4658_v56 = vsel %vm1955_vm5, %v1953_v49, %v1957_v54 }
 0x680   :  { %v1967_v59 = vrot.slane %v4658_v56, 7  ;;  %v2355_v2 = vpack.c.bf16 %v4658_v56, %v4654_v51 }
 0x682   :  { %v1968_v60 = vsel %vm159_vm3, %v1966_v58, %v1967_v59  ;;  %v1969_v61 = vsel %vm159_vm3, %v1967_v59, %v1966_v58  ;;  %3896 = vmatmul.mubr.msk.bf16.vlgmr.msra.gmra.mrb[72].mxu1 %vm93_vm2, %v2216_v43 }
 0x683   :  { %v1970_v62 = vsel %vm4192_vm6, 0.0, %v1969_v61  ;;  %v1971_v63 = vsel %vm4196_vm7, 0.0, %v1968_v60  ;;  %3906 = vmatpush3.bf16.msra.mxu1 %v4620_v12  ;;  %3907 = vmatprep.mubr.msk.bf16.mxu1 %vm4058_vm1, %v4057_v0 }
 0x684   :  { %v1972_v1 = vpack.c.bf16 %v1971_v63, %v1970_v62  ;;  %3917 = vmatprep.subr.bf16.mxu1 %v4057_v0 }
 0x686   :  { %3866 = vmatmul.mubr.msk.bf16.vlgmr.msra.gmra.mrb[64].mxu0 %vm93_vm2, %v1972_v1 }
 0x687   :  { %3876 = vmatpush3.bf16.msra.mxu0 %v4591_v37  ;;  %3877 = vmatprep.mubr.msk.bf16.mxu0 %vm4058_vm1, %v4057_v0 }
 0x688   :  { %3887 = vmatprep.subr.bf16.mxu0 %v4057_v0 }
 0x68a   :  { %3908 = vmatmul.mubr.msk.bf16.vlgmr.msra.gmra.mrb[76].mxu1 %vm93_vm2, %v2355_v2 }
 0x68b   :  { %3918 = vmatpush3.bf16.msra.mxu1 %v4599_v39  ;;  %3919 = vmatprep.mubr.msk.bf16.mxu1 %vm4058_vm1, %v4057_v0 }
 0x68c   :  { %3929 = vmatprep.subr.bf16.mxu1 %v4057_v0 }
 0x68e   :  { %3878 = vmatmul.mubr.msk.bf16.vlgmr.msra.gmra.mrb[68].mxu0 %vm93_vm2, %v4635_v32 }
 0x68f   :  { %3888 = vmatpush3.bf16.msra.mxu0 %v4620_v12  ;;  %3889 = vmatprep.mubr.msk.bf16.mxu0 %vm4058_vm1, %v4057_v0 }
 0x690   :  { %3899 = vmatprep.subr.bf16.mxu0 %v4057_v0 }
 0x692   :  { %3920 = vmatmul.mubr.msk.bf16.vlgmr.msra.gmra.mrb[80].mxu1 %vm93_vm2, %v2216_v43 }
 0x693   :  { %3931 = vmatprep.mubr.msk.bf16.mxu1 %vm4058_vm1, %v4057_v0  ;;  %3930 = vmatpush3.bf16.msra.mxu1 %v4731_v57 }
 0x694   :  { %3941 = vmatprep.subr.bf16.mxu1 %v4057_v0 }
 0x696   :  { %3890 = vmatmul.mubr.msk.bf16.vlgmr.msra.gmra.mrb[72].mxu0 %vm93_vm2, %v2216_v43 }
 0x697   :  { %3900 = vmatpush3.bf16.msra.mxu0 %v4599_v39  ;;  %3901 = vmatprep.mubr.msk.bf16.mxu0 %vm4058_vm1, %v4057_v0  ;;  %v2414_v39 = vsel %vm170_vm4, %v2412_v3, %v2413_v52 }
 0x698   :  { %3911 = vmatprep.subr.bf16.mxu0 %v4057_v0 }
 0x69e   :  { %3902 = vmatmul.mubr.msk.bf16.vlgmr.msra.gmra.mrb[76].mxu0 %vm93_vm2, %v4635_v32 }
 0x69f   :  { %3912 = vmatpush3.bf16.msra.mxu0 %v4591_v37  ;;  %3913 = vmatprep.mubr.msk.bf16.mxu0 %vm4058_vm1, %v4057_v0  ;;  %v2416_v37 = vsel %vm4205_vm8, 0.0, %v2414_v39  ;;  %v3497_v39 = vld [vmem:[%s4956_s11 + $0x14] sm:$0xf] }
 0x6a0   :  { %3923 = vmatprep.subr.bf16.mxu0 %v4057_v0  ;;  %v2500_v8 = vpack.c.bf16 %v2417_v7, %v2416_v37  ;;  %v4764_v53 = vsel %vm97_vm0, %v3497_v39, 0 }
 0x6a6   :  { %3914 = vmatmul.mubr.msk.bf16.vlgmr.msra.gmra.mrb[80].mxu0 %vm93_vm2, %v2355_v2 }
 0x6a7   :  { %3924 = vmatpush3.bf16.msra.mxu0 %v4620_v12  ;;  %3925 = vmatprep.mubr.msk.bf16.mxu0 %vm4058_vm1, %v4057_v0 }
 0x6a8   :  { %3935 = vmatprep.subr.bf16.mxu0 %v4057_v0 }
 0x6ae   :  { %3926 = vmatmul.mubr.msk.bf16.vlgmr.msra.gmra.mrb[84].mxu0 %vm93_vm2, %v2500_v8 }
 0x6af   :  { %3937 = vmatprep.mubr.msk.bf16.mxu0 %vm4058_vm1, %v4057_v0  ;;  %3936 = vmatpush3.bf16.msra.mxu0 %v4739_v14 }
 0x6b0   :  { %3947 = vmatprep.subr.bf16.mxu0 %v4057_v0 }
 0x73d   :  { %v2014_v15 = vpop.f32.mrb[60].mxu1 }
 0x73e   :  { %v3861_v16 = vpop.f32.mrb[61].mxu1 }
 0x73f   :  { %v2017_v12 = vpop.f32.mrb[62].mxu1 }
 0x740   :  { %v3862_v17 = vpop.f32.mrb[63].mxu1 }
 0x745   :  { %v2109_v10 = vpop.f32.mrb[64].mxu1 }
 0x746   :  { %v3873_v18 = vpop.f32.mrb[65].mxu1 }
 0x747   :  { %v2112_v19 = vpop.f32.mrb[66].mxu1 }
 0x748   :  { %v3874_v20 = vpop.f32.mrb[67].mxu1 }
 0x74d   :  { %v2209_v23 = vpop.f32.mrb[68].mxu1 }
 0x74e   :  { %v3885_v26 = vpop.f32.mrb[69].mxu1 }
 0x74f   :  { %v2212_v29 = vpop.f32.mrb[70].mxu1 }
 0x750   :  { %v3886_v4 = vpop.f32.mrb[71].mxu1 }
 0x755   :  { %v2307_v32 = vpop.f32.mrb[72].mxu1 }
 0x756   :  { %v3897_v33 = vpop.f32.mrb[73].mxu1 }
 0x757   :  { %v4743_v6 = vpop.f32.mrb[74].mxu1 }
 0x758   :  { %v3898_v34 = vpop.f32.mrb[75].mxu1 }
 0x759   :  { %v2061_v21 = vpop.f32.mrb[64].mxu0 }
 0x75a   :  { %v2062_v35 = vadd.f32 %v2061_v21, %v2014_v15  ;;  %v3867_v36 = vpop.f32.mrb[65].mxu0 }
 0x75b   :  { %v2064_v38 = vpop.f32.mrb[66].mxu0 }
 0x75c   :  { %v2116_v40 = vadd.f32 %v2109_v10, %v2062_v35  ;;  %v2065_v41 = vadd.f32 %v2064_v38, %v2017_v12  ;;  %v3868_v42 = vpop.f32.mrb[67].mxu0 }
 0x75d   :  { %v2393_v45 = vpop.f32.mrb[76].mxu1 }
 0x75e   :  { %v2124_v46 = vadd.f32 %v4748_v22, %v2116_v40  ;;  %v2117_v47 = vadd.f32 %v2112_v19, %v2065_v41  ;;  %v3909_v48 = vpop.f32.mrb[77].mxu1 }
 0x75f   :  { %v2396_v49 = vpop.f32.mrb[78].mxu1 }
 0x760   :  { %v2126_v54 = vadd.f32 %v2124_v46, %v4613_v9  ;;  %v2125_v43 = vadd.f32 %v4748_v22, %v2117_v47  ;;  %v3910_v58 = vpop.f32.mrb[79].mxu1 }
 0x761   :  { %v2168_v59 = vpop.f32.mrb[68].mxu0 }
 0x762   :  { %v2130_v60 = vmul.f32 0.2, %v2126_v54  ;;  %v2127_v61 = vadd.f32 %v2125_v43, %v4615_v55  ;;  %v2210_v62 = vadd.f32 %v2209_v23, %v2168_v59  ;;  %v3879_v63 = vpop.f32.mrb[69].mxu0  ;;  %vm2128_vm14 = vcmp.ge.f32.partialorder %v2126_v54, 0.0 }
 0x763   :  { %v2171_v1 = vpop.f32.mrb[70].mxu0 }
 0x764   :  { %vm2129_vm15 = vcmp.ge.f32.partialorder %v2127_v61, 0.0  ;;  %v2131_v2 = vmul.f32 0.2, %v2127_v61  ;;  %v2213_v52 = vadd.f32 %v2212_v29, %v2171_v1  ;;  %v3880_v3 = vpop.f32.mrb[71].mxu0  ;;  %v4757_v5 = vsel %vm2128_vm14, %v2126_v54, %v2130_v60 }
 0x765   :  { %v2493_v9 = vpop.f32.mrb[80].mxu1  ;;  %v3011_v25 = vrot.slane %v4757_v5, 1 }
 0x766   :  { %v4759_v37 = vsel %vm2129_vm15, %v2127_v61, %v2131_v2  ;;  %v3921_v7 = vpop.f32.mrb[81].mxu1 }
 0x767   :  { %v2496_v8 = vpop.f32.mrb[82].mxu1  ;;  %v2572_v55 = vpack.c.bf16 %v4759_v37, %v4757_v5  ;;  %v3012_v24 = vrot.slane %v4759_v37, 1 }
 0x768   :  { %v3922_v13 = vpop.f32.mrb[83].mxu1 }
 0x769   :  { %v2254_v15 = vpop.f32.mrb[72].mxu0  ;;  %3932 = vmatmul.mubr.msk.bf16.vlgmr.msra.gmra.mrb[84].mxu1 %vm93_vm2, %v2572_v55 }
 0x76a   :  { %v2261_v16 = vadd.f32 %v2254_v15, %v2210_v62  ;;  %v3891_v12 = vpop.f32.mrb[73].mxu0  ;;  %3942 = vmatpush3.bf16.msra.mxu1 %v4764_v53  ;;  %3943 = vmatprep.mubr.msk.bf16.mxu1 %vm4058_vm1, %v4057_v0 }
 0x76b   :  { %v2257_v17 = vpop.f32.mrb[74].mxu0  ;;  %3953 = vmatprep.subr.bf16.mxu1 %v4057_v0 }
 0x76c   :  { %v2263_v10 = vadd.f32 %v4748_v22, %v2261_v16  ;;  %v2262_v18 = vadd.f32 %v2257_v17, %v2213_v52  ;;  %v3892_v19 = vpop.f32.mrb[75].mxu0 }
 0x76e   :  { %v2265_v20 = vadd.f32 %v2263_v10, %v4629_v27  ;;  %v2264_v23 = vadd.f32 %v4748_v22, %v2262_v18 }
 0x770   :  { %v2269_v26 = vmul.f32 0.2, %v2265_v20  ;;  %v2266_v29 = vadd.f32 %v2264_v23, %v4631_v28  ;;  %vm2267_vm10 = vcmp.ge.f32.partialorder %v2265_v20, 0.0 }
 0x771   :  { %v2348_v4 = vpop.f32.mrb[76].mxu0 }
 0x772   :  { %vm2268_vm11 = vcmp.ge.f32.partialorder %v2266_v29, 0.0  ;;  %v2270_v33 = vmul.f32 0.2, %v2266_v29  ;;  %v2349_v34 = vadd.f32 %v2348_v4, %v2307_v32  ;;  %v3903_v21 = vpop.f32.mrb[77].mxu0  ;;  %v4775_v36 = vsel %vm2267_vm10, %v2265_v20, %v2269_v26 }
 0x773   :  { %v2351_v35 = vpop.f32.mrb[78].mxu0  ;;  %v3014_v20 = vsel %vm170_vm4, %v3012_v24, %v3011_v25 }
 0x774   :  { %v4777_v38 = vsel %vm2268_vm11, %v2266_v29, %v2270_v33  ;;  %v2400_v40 = vadd.f32 %v2393_v45, %v2349_v34  ;;  %v2352_v41 = vadd.f32 %v2351_v35, %v4743_v6  ;;  %v3904_v27 = vpop.f32.mrb[79].mxu0  ;;  %v3016_v23 = vsel %vm4209_vm9, 0.0, %v3014_v20 }
 0x775   :  { %v4782_v42 = vpack.c.bf16 %v4777_v38, %v4775_v36 }
 0x776   :  { %v2401_v28 = vadd.f32 %v2396_v49, %v2352_v41  ;;  %v2402_v32 = vadd.f32 %v4748_v22, %v2400_v40 }
 0x777   :  { %3944 = vmatmul.mubr.msk.bf16.vlgmr.msra.gmra.mrb[88].mxu1 %vm93_vm2, %v4782_v42 }
 0x778   :  { %v2403_v46 = vadd.f32 %v4748_v22, %v2401_v28  ;;  %3954 = vmatpush3.bf16.msra.mxu1 %v4739_v14  ;;  %3955 = vmatprep.mubr.msk.bf16.mxu1 %vm4058_vm1, %v4057_v0  ;;  %v2404_v54 = vadd.f32 %v2402_v32, %v4656_v44 }
 0x779   :  { %v2452_v45 = vpop.f32.mrb[80].mxu0  ;;  %3965 = vmatprep.subr.bf16.mxu1 %v4057_v0 }
 0x77a   :  { %v2405_v6 = vadd.f32 %v2403_v46, %v4652_v50  ;;  %v2494_v47 = vadd.f32 %v2493_v9, %v2452_v45  ;;  %v3915_v48 = vpop.f32.mrb[81].mxu0  ;;  %v2408_v60 = vmul.f32 0.2, %v2404_v54  ;;  %vm2406_vm13 = vcmp.ge.f32.partialorder %v2404_v54, 0.0 }
 0x77b   :  { %v2455_v49 = vpop.f32.mrb[82].mxu0 }
 0x77c   :  { %v2497_v43 = vadd.f32 %v2496_v8, %v2455_v49  ;;  %v3916_v58 = vpop.f32.mrb[83].mxu0  ;;  %v2409_v59 = vmul.f32 0.2, %v2405_v6  ;;  %vm2407_vm12 = vcmp.ge.f32.partialorder %v2405_v6, 0.0  ;;  %v4801_v1 = vsel %vm2406_vm13, %v2404_v54, %v2408_v60 }
 0x77e   :  { %v4799_v50 = vsel %vm2407_vm12, %v2405_v6, %v2409_v59  ;;  %v4891_v59 = vld [vmem:[%s4958_s12 + $0x1] ss:$0 sm:$0xff] }
 0x77f   :  { %3956 = vmatmul.mubr.msk.bf16.vlgmr.msra.gmra.mrb[92].mxu1 %vm93_vm2, %v2572_v55  ;;  %v2815_v39 = vpack.c.bf16 %v4799_v50, %v4801_v1 }
 0x780   :  { %3966 = vmatpush3.bf16.msra.mxu1 %v4731_v57  ;;  %3967 = vmatprep.mubr.msk.bf16.mxu1 %vm4058_vm1, %v4057_v0 }
 0x781   :  { %v2538_v61 = vpop.f32.mrb[84].mxu0  ;;  %3977 = vmatprep.subr.bf16.mxu1 %v4057_v0 }
 0x782   :  { %v2545_v62 = vadd.f32 %v2538_v61, %v2494_v47  ;;  %v3927_v44 = vpop.f32.mrb[85].mxu0 }
 0x783   :  { %v2541_v63 = vpop.f32.mrb[86].mxu0 }
 0x784   :  { %v2547_v2 = vadd.f32 %v4748_v22, %v2545_v62  ;;  %v2546_v52 = vadd.f32 %v2541_v63, %v2497_v43  ;;  %v3928_v3 = vpop.f32.mrb[87].mxu0 }
 0x786   :  { %v2549_v9 = vadd.f32 %v2547_v2, %v4654_v51  ;;  %v2548_v7 = vadd.f32 %v4748_v22, %v2546_v52 }
 0x787   :  { %3968 = vmatmul.mubr.msk.bf16.vlgmr.msra.gmra.mrb[96].mxu1 %vm93_vm2, %v2815_v39 }
 0x788   :  { %vm2551_vm5 = vcmp.ge.f32.partialorder %v2549_v9, 0.0  ;;  %v2553_v8 = vmul.f32 0.2, %v2549_v9  ;;  %v2550_v55 = vadd.f32 %v2548_v7, %v4658_v56  ;;  %3978 = vmatpush3.bf16.msra.mxu1 %v4764_v53  ;;  %3979 = vmatprep.mubr.msk.bf16.mxu1 %vm4058_vm1, %v4057_v0 }
 0x789   :  { %3989 = vmatprep.subr.bf16.mxu1 %v4057_v0 }
 0x78a   :  { %v4814_v13 = vsel %vm2551_vm5, %v2549_v9, %v2553_v8  ;;  %vm2552_vm14 = vcmp.ge.f32.partialorder %v2550_v55, 0.0  ;;  %v2554_v15 = vmul.f32 0.2, %v2550_v55 }
 0x78b   :  { %v2565_v22 = vrot.slane %v4814_v13, 7 }
 0x78c   :  { %v4816_v51 = vsel %vm2552_vm14, %v2550_v55, %v2554_v15 }
 0x78d   :  { %v2566_v16 = vrot.slane %v4816_v51, 7  ;;  %v2954_v56 = vpack.c.bf16 %v4816_v51, %v4814_v13 }
 0x78f   :  { %3980 = vmatmul.mubr.msk.bf16.vlgmr.msra.gmra.mrb[100].mxu1 %vm93_vm2, %v2954_v56  ;;  %v2567_v12 = vsel %vm159_vm3, %v2565_v22, %v2566_v16  ;;  %v2568_v17 = vsel %vm159_vm3, %v2566_v16, %v2565_v22 }
 0x790   :  { %v2569_v10 = vsel %vm4192_vm6, 0.0, %v2568_v17  ;;  %v2570_v18 = vsel %vm4196_vm7, 0.0, %v2567_v12  ;;  %3990 = vmatpush3.bf16.msra.mxu1 %v4739_v14  ;;  %3991 = vmatprep.mubr.msk.bf16.mxu1 %vm4058_vm1, %v4057_v0 }
 0x791   :  { %v2571_v19 = vpack.c.bf16 %v2570_v18, %v2569_v10  ;;  %4001 = vmatprep.subr.bf16.mxu1 %v4057_v0 }
 0x793   :  { %3938 = vmatmul.mubr.msk.bf16.vlgmr.msra.gmra.mrb[88].mxu0 %vm93_vm2, %v2571_v19 }
 0x794   :  { %3948 = vmatpush3.bf16.msra.mxu0 %v4731_v57  ;;  %3949 = vmatprep.mubr.msk.bf16.mxu0 %vm4058_vm1, %v4057_v0 }
 0x795   :  { %3959 = vmatprep.subr.bf16.mxu0 %v4057_v0 }
 0x797   :  { %3992 = vmatmul.mubr.msk.bf16.vlgmr.msra.gmra.mrb[104].mxu1 %vm93_vm2, %v2815_v39 }
 0x798   :  { %4003 = vmatprep.mubr.msk.bf16.mxu1 %vm4058_vm1, %v4057_v0 }
 0x79b   :  { %3950 = vmatmul.mubr.msk.bf16.vlgmr.msra.gmra.mrb[92].mxu0 %vm93_vm2, %v4782_v42 }
 0x79c   :  { %3960 = vmatpush3.bf16.msra.mxu0 %v4764_v53  ;;  %3961 = vmatprep.mubr.msk.bf16.mxu0 %vm4058_vm1, %v4057_v0 }
 0x79d   :  { %3971 = vmatprep.subr.bf16.mxu0 %v4057_v0 }
 0x7a3   :  { %3962 = vmatmul.mubr.msk.bf16.vlgmr.msra.gmra.mrb[96].mxu0 %vm93_vm2, %v2815_v39 }
 0x7a4   :  { %3972 = vmatpush3.bf16.msra.mxu0 %v4739_v14  ;;  %3973 = vmatprep.mubr.msk.bf16.mxu0 %vm4058_vm1, %v4057_v0  ;;  %v3013_v14 = vsel %vm170_vm4, %v3011_v25, %v3012_v24 }
 0x7a5   :  { %3983 = vmatprep.subr.bf16.mxu0 %v4057_v0 }
 0x7ab   :  { %3974 = vmatmul.mubr.msk.bf16.vlgmr.msra.gmra.mrb[100].mxu0 %vm93_vm2, %v4782_v42 }
 0x7ac   :  { %3984 = vmatpush3.bf16.msra.mxu0 %v4731_v57  ;;  %3985 = vmatprep.mubr.msk.bf16.mxu0 %vm4058_vm1, %v4057_v0  ;;  %v3015_v57 = vsel %vm4205_vm8, 0.0, %v3013_v14 }
 0x7ad   :  { %3995 = vmatprep.subr.bf16.mxu0 %v4057_v0  ;;  %v3099_v26 = vpack.c.bf16 %v3016_v23, %v3015_v57 }
 0x7b3   :  { %3986 = vmatmul.mubr.msk.bf16.vlgmr.msra.gmra.mrb[104].mxu0 %vm93_vm2, %v2954_v56 }
 0x7b4   :  { %3996 = vmatpush3.bf16.msra.mxu0 %v4764_v53  ;;  %3997 = vmatprep.mubr.msk.bf16.mxu0 %vm4058_vm1, %v4057_v0  ;;  %v4882_v53 = vsel %vm97_vm0, %v3156_v11, 0 }
 0x7b5   :  { %4007 = vmatprep.subr.bf16.mxu0 %v4057_v0  ;;  %4002 = vmatpush3.bf16.msra.mxu1 %v4882_v53 }
 0x7b6   :  { %4013 = vmatprep.subr.bf16.mxu1 %v4057_v0 }
 0x7bb   :  { %3998 = vmatmul.mubr.msk.bf16.vlgmr.msra.gmra.mrb[108].mxu0 %vm93_vm2, %v3099_v26 }
 0x7bc   :  { %4009 = vmatprep.mubr.msk.bf16.mxu0 %vm4058_vm1, %v4057_v0  ;;  %4008 = vmatpush3.bf16.msra.mxu0 %v4882_v53 }
 0x7bd   :  { %4019 = vmatprep.subr.bf16.mxu0 %v4057_v0 }
 0x83c   :  { %v2613_v30 = vpop.f32.mrb[84].mxu1 }
 0x83d   :  { %v3933_v31 = vpop.f32.mrb[85].mxu1 }
 0x83e   :  { %v2616_v29 = vpop.f32.mrb[86].mxu1 }
 0x83f   :  { %v3934_v4 = vpop.f32.mrb[87].mxu1 }
 0x84a   :  { %v2708_v33 = vpop.f32.mrb[88].mxu1 }
 0x84b   :  { %v3945_v34 = vpop.f32.mrb[89].mxu1 }
 0x84c   :  { %v2711_v21 = vpop.f32.mrb[90].mxu1 }
 0x84d   :  { %v3946_v35 = vpop.f32.mrb[91].mxu1 }
 0x852   :  { %v2808_v40 = vpop.f32.mrb[92].mxu1 }
 0x853   :  { %v3957_v41 = vpop.f32.mrb[93].mxu1 }
 0x854   :  { %v2811_v27 = vpop.f32.mrb[94].mxu1 }
 0x855   :  { %v3958_v42 = vpop.f32.mrb[95].mxu1 }
 0x85a   :  { %v2906_v28 = vpop.f32.mrb[96].mxu1 }
 0x85b   :  { %v3969_v32 = vpop.f32.mrb[97].mxu1 }
 0x85c   :  { %v2909_v46 = vpop.f32.mrb[98].mxu1 }
 0x85d   :  { %v3970_v45 = vpop.f32.mrb[99].mxu1 }
 0x862   :  { %v2992_v6 = vpop.f32.mrb[100].mxu1 }
 0x863   :  { %v3981_v47 = vpop.f32.mrb[101].mxu1 }
 0x864   :  { %v2995_v48 = vpop.f32.mrb[102].mxu1 }
 0x865   :  { %v3982_v49 = vpop.f32.mrb[103].mxu1 }
 0x866   :  { %v2660_v54 = vpop.f32.mrb[88].mxu0 }
 0x867   :  { %v2661_v43 = vadd.f32 %v2660_v54, %v2613_v30  ;;  %v3939_v58 = vpop.f32.mrb[89].mxu0 }
 0x868   :  { %v2663_v60 = vpop.f32.mrb[90].mxu0 }
 0x869   :  { %v2715_v61 = vadd.f32 %v2708_v33, %v2661_v43  ;;  %v2664_v62 = vadd.f32 %v2663_v60, %v2616_v29  ;;  %v3940_v44 = vpop.f32.mrb[91].mxu0 }
 0x86a   :  { %v3092_v63 = vpop.f32.mrb[104].mxu1 }
 0x86b   :  { %v2723_v2 = vadd.f32 %v4891_v59, %v2715_v61  ;;  %v2716_v52 = vadd.f32 %v2711_v21, %v2664_v62  ;;  %v3993_v3 = vpop.f32.mrb[105].mxu1 }
 0x86c   :  { %v3095_v39 = vpop.f32.mrb[106].mxu1 }
 0x86d   :  { %v2725_v9 = vadd.f32 %v2723_v2, %v4757_v5  ;;  %v2724_v7 = vadd.f32 %v4891_v59, %v2716_v52  ;;  %v3994_v8 = vpop.f32.mrb[107].mxu1 }
 0x86e   :  { %v2767_v55 = vpop.f32.mrb[92].mxu0 }
 0x86f   :  { %v2729_v15 = vmul.f32 0.2, %v2725_v9  ;;  %v2726_v22 = vadd.f32 %v2724_v7, %v4759_v37  ;;  %v2809_v16 = vadd.f32 %v2808_v40, %v2767_v55  ;;  %v3951_v56 = vpop.f32.mrb[93].mxu0  ;;  %vm2727_vm0 = vcmp.ge.f32.partialorder %v2725_v9, 0.0 }
 0x870   :  { %v2770_v12 = vpop.f32.mrb[94].mxu0  ;;  %v3512_v56 = vld [vmem:[%s4960_s14] ss:$0 sm:$0xff] }
 0x871   :  { %vm2728_vm3 = vcmp.ge.f32.partialorder %v2726_v22, 0.0  ;;  %v2730_v17 = vmul.f32 0.2, %v2726_v22  ;;  %v2812_v10 = vadd.f32 %v2811_v27, %v2770_v12  ;;  %v3952_v18 = vpop.f32.mrb[95].mxu0  ;;  %v2731_v19 = vsel %vm2727_vm0, %v2725_v9, %v2729_v15 }
 0x873   :  { %v2732_v24 = vsel %vm2728_vm3, %v2726_v22, %v2730_v17 }
 0x874   :  { %v3158_v25 = vpack.c.bf16 %v2732_v24, %v2731_v19 }
 0x876   :  { %v2853_v14 = vpop.f32.mrb[96].mxu0  ;;  %4004 = vmatmul.mubr.msk.bf16.vlgmr.msra.gmra.mrb[108].mxu1 %vm93_vm2, %v3158_v25 }
 0x877   :  { %v2860_v5 = vadd.f32 %v2853_v14, %v2809_v16  ;;  %v3963_v20 = vpop.f32.mrb[97].mxu0  ;;  %4014 = vmatpush3.bf16.msra.mxu1 %v4882_v53  ;;  %4015 = vmatprep.mubr.msk.bf16.mxu1 %vm4058_vm1, %v4057_v0 }
 0x878   :  { %v2856_v37 = vpop.f32.mrb[98].mxu0 }
 0x879   :  { %v2862_v57 = vadd.f32 %v4891_v59, %v2860_v5  ;;  %v2861_v23 = vadd.f32 %v2856_v37, %v2812_v10  ;;  %v3964_v26 = vpop.f32.mrb[99].mxu0 }
 0x87b   :  { %v2864_v11 = vadd.f32 %v2862_v57, %v4775_v36  ;;  %v2863_v30 = vadd.f32 %v4891_v59, %v2861_v23 }
 0x87d   :  { %v2868_v31 = vmul.f32 0.2, %v2864_v11  ;;  %v2865_v29 = vadd.f32 %v2863_v30, %v4777_v38  ;;  %vm2866_vm4 = vcmp.ge.f32.partialorder %v2864_v11, 0.0 }
 0x87e   :  { %v2947_v4 = vpop.f32.mrb[100].mxu0 }
 0x87f   :  { %vm2867_vm6 = vcmp.ge.f32.partialorder %v2865_v29, 0.0  ;;  %v2869_v33 = vmul.f32 0.2, %v2865_v29  ;;  %v2948_v34 = vadd.f32 %v2947_v4, %v2906_v28  ;;  %v3975_v21 = vpop.f32.mrb[101].mxu0  ;;  %v2870_v40 = vsel %vm2866_vm4, %v2864_v11, %v2868_v31 }
 0x880   :  { %v2950_v35 = vpop.f32.mrb[102].mxu0 }
 0x881   :  { %v2871_v41 = vsel %vm2867_vm6, %v2865_v29, %v2869_v33  ;;  %v2999_v27 = vadd.f32 %v2992_v6, %v2948_v34  ;;  %v2951_v42 = vadd.f32 %v2950_v35, %v2909_v46  ;;  %v3976_v32 = vpop.f32.mrb[103].mxu0 }
 0x882   :  { %v3214_v45 = vpack.c.bf16 %v2871_v41, %v2870_v40 }
 0x883   :  { %v3001_v36 = vadd.f32 %v4891_v59, %v2999_v27  ;;  %v3000_v47 = vadd.f32 %v2995_v48, %v2951_v42 }
 0x884   :  { %4010 = vmatmul.mubr.msk.bf16.vlgmr.msra.gmra.mrb[112].mxu0 %vm93_vm2, %v3214_v45 }
 0x885   :  { %v3003_v38 = vadd.f32 %v3001_v36, %v4801_v1  ;;  %v3002_v49 = vadd.f32 %v4891_v59, %v3000_v47  ;;  %4020 = vmatpush3.bf16.msra.mxu0 %v4882_v53  ;;  %4021 = vmatprep.mubr.msk.bf16.mxu0 %vm4058_vm1, %v4057_v0 }
 0x886   :  { %v3051_v28 = vpop.f32.mrb[104].mxu0 }
 0x887   :  { %v3007_v54 = vmul.f32 0.2, %v3003_v38  ;;  %v3004_v46 = vadd.f32 %v3002_v49, %v4799_v50  ;;  %v3093_v6 = vadd.f32 %v3092_v63, %v3051_v28  ;;  %v3987_v43 = vpop.f32.mrb[105].mxu0  ;;  %vm3005_vm7 = vcmp.ge.f32.partialorder %v3003_v38, 0.0 }
 0x888   :  { %v3054_v58 = vpop.f32.mrb[106].mxu0 }
 0x889   :  { %vm3006_vm8 = vcmp.ge.f32.partialorder %v3004_v46, 0.0  ;;  %v3008_v48 = vmul.f32 0.2, %v3004_v46  ;;  %v3096_v60 = vadd.f32 %v3095_v39, %v3054_v58  ;;  %v3988_v61 = vpop.f32.mrb[107].mxu0  ;;  %v3009_v1 = vsel %vm3005_vm7, %v3003_v38, %v3007_v54 }
 0x88b   :  { %v3010_v62 = vsel %vm3006_vm8, %v3004_v46, %v3008_v48 }
 0x88c   :  { %v3262_v44 = vpack.c.bf16 %v3010_v62, %v3009_v1 }
 0x88e   :  { %v3137_v2 = vpop.f32.mrb[108].mxu0  ;;  %4016 = vmatmul.mubr.msk.bf16.vlgmr.msra.gmra.mrb[112].mxu1 %vm93_vm2, %v3262_v44 }
 0x88f   :  { %v3144_v53 = vadd.f32 %v3137_v2, %v3093_v6  ;;  %v3999_v0 = vpop.f32.mrb[109].mxu0 }
 0x890   :  { %v3140_v52 = vpop.f32.mrb[110].mxu0 }
 0x891   :  { %v3146_v3 = vadd.f32 %v4891_v59, %v3144_v53  ;;  %v3145_v50 = vadd.f32 %v3140_v52, %v3096_v60  ;;  %v4000_v63 = vpop.f32.mrb[111].mxu0 }
 0x893   :  { %v3148_v9 = vadd.f32 %v3146_v3, %v4814_v13  ;;  %v3147_v7 = vadd.f32 %v4891_v59, %v3145_v50 }
 0x895   :  { %v3152_v8 = vmul.f32 0.2, %v3148_v9  ;;  %v3149_v39 = vadd.f32 %v3147_v7, %v4816_v51  ;;  %vm3150_vm1 = vcmp.ge.f32.partialorder %v3148_v9, 0.0 }
 0x897   :  { %vm3151_vm9 = vcmp.ge.f32.partialorder %v3149_v39, 0.0  ;;  %v3153_v55 = vmul.f32 0.2, %v3149_v39  ;;  %v3154_v15 = vsel %vm3150_vm1, %v3148_v9, %v3152_v8 }
 0x899   :  { %v3155_v22 = vsel %vm3151_vm9, %v3149_v39, %v3153_v55 }
 0x89a   :  { %v3310_v16 = vpack.c.bf16 %v3155_v22, %v3154_v15 }
 0x89c   :  { %4022 = vmatmul.mubr.msk.bf16.vlgmr.msra.gmra.mrb[116].mxu0 %vm93_vm2, %v3310_v16 }
 0x949   :  { %v3205_v12 = vpop.f32.mrb[108].mxu1 }
 0x94a   :  { %v3206_v17 = vadd.f32 %v3512_v56, %v3205_v12  ;;  %v4005_v13 = vpop.f32.mrb[109].mxu1 }
 0x94b   :  { %v3208_v10 = vpop.f32.mrb[110].mxu1 }
 0x94c   :  { %3212 = vst [vmem:[%s4961_s15] sm:$0xff] %v3206_v17  ;;  %v3209_v51 = vadd.f32 %v3512_v56, %v3208_v10  ;;  %v4006_v59 = vpop.f32.mrb[111].mxu1 }
 0x94e   :  { %3213 = vst [vmem:[%s4961_s15 + $0x8] sm:$0xff] %v3209_v51 }
 0x957   :  { %v3252_v18 = vpop.f32.mrb[112].mxu0 }
 0x958   :  { %v3253_v19 = vadd.f32 %v3512_v56, %v3252_v18  ;;  %v4011_v24 = vpop.f32.mrb[113].mxu0 }
 0x959   :  { %v3255_v25 = vpop.f32.mrb[114].mxu0 }
 0x95a   :  { %3515 = vst [vmem:[%s4961_s15 + $0x10] sm:$0xff] %v3253_v19  ;;  %v3256_v14 = vadd.f32 %v3512_v56, %v3255_v25  ;;  %v4012_v5 = vpop.f32.mrb[115].mxu0 }
 0x95c   :  { %3516 = vst [vmem:[%s4961_s15 + $0x18] sm:$0xff] %v3256_v14 }
 0x961   :  { %v3300_v20 = vpop.f32.mrb[112].mxu1 }
 0x962   :  { %v3301_v37 = vadd.f32 %v3512_v56, %v3300_v20  ;;  %v4017_v57 = vpop.f32.mrb[113].mxu1 }
 0x963   :  { %v3303_v23 = vpop.f32.mrb[114].mxu1 }
 0x964   :  { %3518 = vst [vmem:[%s4961_s15 + $0x20] sm:$0xff] %v3301_v37  ;;  %v3304_v26 = vadd.f32 %v3512_v56, %v3303_v23  ;;  %v4018_v11 = vpop.f32.mrb[115].mxu1 }
 0x966   :  { %3519 = vst [vmem:[%s4961_s15 + $0x28] sm:$0xff] %v3304_v26 }
 0x96f   :  { %v3348_v30 = vpop.f32.mrb[116].mxu0 }
 0x970   :  { %v3349_v31 = vadd.f32 %v3512_v56, %v3348_v30  ;;  %v4023_v29 = vpop.f32.mrb[117].mxu0 }
 0x971   :  { %v3351_v4 = vpop.f32.mrb[118].mxu0 }
 0x972   :  { %3521 = vst [vmem:[%s4961_s15 + $0x30] sm:$0xff] %v3349_v31  ;;  %v3352_v33 = vadd.f32 %v3512_v56, %v3351_v4  ;;  %v4024_v34 = vpop.f32.mrb[119].mxu0 }
 0x974   :  { %3522 = vst [vmem:[%s4961_s15 + $0x38] sm:$0xff] %v3352_v33 }

</bundles_post_ra>
